<compile_context>
chip_gen: v7x
topology: tpu7x:2x2x1
jax: 0.10.0
libtpu: 0.0.40
codegen_flags: <defaults>
</compile_context>

<pallas_src>
import jax
import jax.numpy as jnp
from jax.experimental import pallas as pl
from jax.experimental.pallas import tpu as pltpu

# ---- small, deterministic hyper-params consistent with the module __init__ ----
VOCAB = 50
EMB_DIM = 32          # stand-in for bert.config.hidden_size
HIDDEN_DIM = 16
OUTPUT_DIM = 2
N_LAYERS = 2          # kernel below is specialized to 2 layers, bidirectional
BIDIRECTIONAL = True
BATCH = 2
SEQ = 8


# ---------------- in-kernel GRU helper (operates on traced values) ----------------

def _gru_direction(x2d, w_ih, w_hh, b_gi, b_hn, T, B, *, reverse, collect):
    """One GRU layer, one direction, fully unrolled over time.

    x2d  : (T*B, In)  time-major rows (rows [t*B:(t+1)*B] are time step t)
    w_ih : (In, 3H)   pre-transposed, gate order (r, z, n)
    w_hh : (H, 3H)    pre-transposed, gate order (r, z, n)
    b_gi : (1, 3H)    = b_ih + [b_hr, b_hz, 0]   (r/z hidden biases pre-folded)
    b_hn : (1, H)     = b_hn (must stay inside r * (...))

    PyTorch nn.GRU semantics:
      r = sigmoid(W_ir x + b_ir + W_hr h + b_hr)
      z = sigmoid(W_iz x + b_iz + W_hz h + b_hz)
      n = tanh  (W_in x + b_in + r * (W_hn h + b_hn))
      h = (1 - z) * n + z * h
    """
    H = w_hh.shape[0]

    # Input projection for ALL time steps at once (hoisted out of recurrence).
    gi = jnp.dot(x2d, w_ih, preferred_element_type=jnp.float32) + b_gi   # (T*B, 3H)
    # Gate slicing done once (not per step).
    gi_r, gi_z, gi_n = gi[:, 0:H], gi[:, H:2 * H], gi[:, 2 * H:3 * H]
    whh_r, whh_z, whh_n = w_hh[:, 0:H], w_hh[:, H:2 * H], w_hh[:, 2 * H:3 * H]

    h = jnp.zeros((B, H), jnp.float32)           # h_0 = 0 (PyTorch default)
    outs = [None] * T
    order = range(T - 1, -1, -1) if reverse else range(T)
    for t in order:                              # static, fully unrolled (T small)
        lo = t * B
        gh_r = jnp.dot(h, whh_r, preferred_element_type=jnp.float32)
        gh_z = jnp.dot(h, whh_z, preferred_element_type=jnp.float32)
        gh_n = jnp.dot(h, whh_n, preferred_element_type=jnp.float32)
        r = jax.nn.sigmoid(gi_r[lo:lo + B, :] + gh_r)
        z = jax.nn.sigmoid(gi_z[lo:lo + B, :] + gh_z)
        n = jnp.tanh(gi_n[lo:lo + B, :] + r * (gh_n + b_hn))
        h = (1.0 - z) * n + z * h
        if collect:
            outs[t] = h
    return h, outs


# ---------------- fused Pallas kernel: 2 layers x 2 directions + Linear ----------------

def _fused_bert_gru_kernel(
        x_ref,
        w00i_ref, w00h_ref, b00g_ref, b00n_ref,   # layer 0, forward
        w01i_ref, w01h_ref, b01g_ref, b01n_ref,   # layer 0, backward
        w10i_ref, w10h_ref, b10g_ref, b10n_ref,   # layer 1, forward
        w11i_ref, w11h_ref, b11g_ref, b11n_ref,   # layer 1, backward
        wout_ref, bout_ref,
        o_ref):
    B = o_ref.shape[0]
    T = x_ref.shape[0] // B

    x0 = x_ref[...]                                                   # (T*B, E)

    # ---- layer 0: need every time step's output (input to layer 1) ----
    _, outs_f = _gru_direction(x0, w00i_ref[...], w00h_ref[...],
                               b00g_ref[...], b00n_ref[...],
                               T, B, reverse=False, collect=True)
    _, outs_b = _gru_direction(x0, w01i_ref[...], w01h_ref[...],
                               b01g_ref[...], b01n_ref[...],
                               T, B, reverse=True, collect=True)
    # layer-1 input: per-time-step concat of fwd/bwd hidden, kept time-major 2D
    x1 = jnp.concatenate(
        [jnp.concatenate([outs_f[t], outs_b[t]], axis=-1) for t in range(T)],
        axis=0)                                                       # (T*B, 2H)

    # ---- layer 1 (last): only the final hidden state of each direction ----
    h_f, _ = _gru_direction(x1, w10i_ref[...], w10h_ref[...],
                            b10g_ref[...], b10n_ref[...],
                            T, B, reverse=False, collect=False)       # hidden[-2]
    h_b, _ = _gru_direction(x1, w11i_ref[...], w11h_ref[...],
                            b11g_ref[...], b11n_ref[...],
                            T, B, reverse=True, collect=False)        # hidden[-1]

    hidden = jnp.concatenate([h_f, h_b], axis=-1)                     # (B, 2H)
    # nn.Dropout is the identity in eval / deterministic inference.
    o_ref[...] = (jnp.dot(hidden, wout_ref[...],
                          preferred_element_type=jnp.float32)
                  + bout_ref[...])                                    # (B, O)


# ---------------- wrapper (plain-JAX glue around the single pallas_call) ----------------

def bert_gru_sentiment(text, emb_table, params):
    # TODO(synk): the full frozen bert-base-uncased encoder stack is not
    # reproduced; a deterministic synthetic token-embedding table stands in
    # for `self.bert(text)[0]`, producing the same [B, T, E] feature shape.
    B, T = text.shape
    embedded = jnp.take(emb_table, text, axis=0)                      # (B, T, E)
    # time-major, flattened to 2D rows (rows [t*B:(t+1)*B] = time step t)
    x2d = jnp.transpose(embedded, (1, 0, 2)).reshape(T * B, EMB_DIM)

    flat_gru = []
    for layer_dirs in params["gru"]:
        for d in layer_dirs:
            flat_gru += list(d)                                       # 4 arrays each
    w_out_t, b_out = params["out"]

    n_inputs = 1 + len(flat_gru) + 2
    vmem = pltpu.MemorySpace.VMEM
    return pl.pallas_call(
        _fused_bert_gru_kernel,
        out_shape=jax.ShapeDtypeStruct((B, OUTPUT_DIM), jnp.float32),
        in_specs=[pl.BlockSpec(memory_space=vmem)] * n_inputs,
        out_specs=pl.BlockSpec(memory_space=vmem),
    )(x2d, *flat_gru, w_out_t, b_out)


# ---------------- deterministic parameter init (PyTorch layout -> kernel layout) ----------------

def _prep_gru_direction(w_ih, w_hh, b_ih, b_hh):
    """Pre-transpose weights and fold r/z hidden biases (host-side, once)."""
    H = HIDDEN_DIM
    w_ih_t = jnp.transpose(w_ih)                                      # (In, 3H)
    w_hh_t = jnp.transpose(w_hh)                                      # (H, 3H)
    b_gi = b_ih + jnp.concatenate(
        [b_hh[:, :2 * H], jnp.zeros((1, H), jnp.float32)], axis=-1)   # (1, 3H)
    b_hn = b_hh[:, 2 * H:]                                            # (1, H)
    return (w_ih_t, w_hh_t, b_gi, b_hn)


def init_params(key):
    keys = iter(jax.random.split(key, 64))
    scale = 1.0 / float(HIDDEN_DIM) ** 0.5

    emb_table = jax.random.normal(next(keys), (VOCAB, EMB_DIM), jnp.float32) * 0.02

    num_dirs = 2 if BIDIRECTIONAL else 1
    gru = []
    for layer in range(N_LAYERS):
        in_dim = EMB_DIM if layer == 0 else HIDDEN_DIM * num_dirs
        dirs = []
        for _ in range(num_dirs):
            w_ih = jax.random.uniform(next(keys), (3 * HIDDEN_DIM, in_dim),
                                      jnp.float32, -scale, scale)
            w_hh = jax.random.uniform(next(keys), (3 * HIDDEN_DIM, HIDDEN_DIM),
                                      jnp.float32, -scale, scale)
            b_ih = jax.random.uniform(next(keys), (1, 3 * HIDDEN_DIM),
                                      jnp.float32, -scale, scale)
            b_hh = jax.random.uniform(next(keys), (1, 3 * HIDDEN_DIM),
                                      jnp.float32, -scale, scale)
            dirs.append(_prep_gru_direction(w_ih, w_hh, b_ih, b_hh))
        gru.append(dirs)

    fc_in = HIDDEN_DIM * num_dirs
    w_out = jax.random.uniform(next(keys), (OUTPUT_DIM, fc_in), jnp.float32, -scale, scale)
    b_out = jax.random.uniform(next(keys), (1, OUTPUT_DIM), jnp.float32, -scale, scale)
    return emb_table, {"gru": gru, "out": (jnp.transpose(w_out), b_out)}


# ---------------- main ----------------

if __name__ == "__main__":
    key = jax.random.PRNGKey(0)
    k_param, k_text = jax.random.split(key)

    emb_table, params = init_params(k_param)
    text = jax.random.randint(k_text, (BATCH, SEQ), 0, VOCAB, dtype=jnp.int32)

    fwd = jax.jit(lambda t: bert_gru_sentiment(t, emb_table, params))
    logits = fwd(text)
    jax.block_until_ready(logits)

    assert logits.shape == (BATCH, OUTPUT_DIM)
    print("KERNEL_OK")
</pallas_src>

<mosaic_0001>
module attributes {stable_mosaic.version = 11 : i64} {
  func.func @_fused_bert_gru_kernel(%arg0: memref<16x32xf32, #tpu.memory_space<vmem>>, %arg1: memref<32x48xf32, #tpu.memory_space<vmem>>, %arg2: memref<16x48xf32, #tpu.memory_space<vmem>>, %arg3: memref<1x48xf32, #tpu.memory_space<vmem>>, %arg4: memref<1x16xf32, #tpu.memory_space<vmem>>, %arg5: memref<32x48xf32, #tpu.memory_space<vmem>>, %arg6: memref<16x48xf32, #tpu.memory_space<vmem>>, %arg7: memref<1x48xf32, #tpu.memory_space<vmem>>, %arg8: memref<1x16xf32, #tpu.memory_space<vmem>>, %arg9: memref<32x48xf32, #tpu.memory_space<vmem>>, %arg10: memref<16x48xf32, #tpu.memory_space<vmem>>, %arg11: memref<1x48xf32, #tpu.memory_space<vmem>>, %arg12: memref<1x16xf32, #tpu.memory_space<vmem>>, %arg13: memref<32x48xf32, #tpu.memory_space<vmem>>, %arg14: memref<16x48xf32, #tpu.memory_space<vmem>>, %arg15: memref<1x48xf32, #tpu.memory_space<vmem>>, %arg16: memref<1x16xf32, #tpu.memory_space<vmem>>, %arg17: memref<32x2xf32, #tpu.memory_space<vmem>>, %arg18: memref<1x2xf32, #tpu.memory_space<vmem>>, %arg19: memref<2x2xf32, #tpu.memory_space<vmem>>) attributes {dimension_semantics = [], scalar_prefetch = 0 : i64, scratch_operands = 0 : i64, tpu.core_type = #tpu.core_type<tc>} {
    %c0 = arith.constant 0 : index
    %c0_0 = arith.constant 0 : index
    %0 = vector.load %arg0[%c0, %c0_0] : memref<16x32xf32, #tpu.memory_space<vmem>>, vector<16x32xf32>
    %c0_1 = arith.constant 0 : index
    %c0_2 = arith.constant 0 : index
    %1 = vector.load %arg1[%c0_1, %c0_2] : memref<32x48xf32, #tpu.memory_space<vmem>>, vector<32x48xf32>
    %c0_3 = arith.constant 0 : index
    %c0_4 = arith.constant 0 : index
    %2 = vector.load %arg2[%c0_3, %c0_4] : memref<16x48xf32, #tpu.memory_space<vmem>>, vector<16x48xf32>
    %c0_5 = arith.constant 0 : index
    %c0_6 = arith.constant 0 : index
    %3 = vector.load %arg3[%c0_5, %c0_6] : memref<1x48xf32, #tpu.memory_space<vmem>>, vector<1x48xf32>
    %c0_7 = arith.constant 0 : index
    %c0_8 = arith.constant 0 : index
    %4 = vector.load %arg4[%c0_7, %c0_8] : memref<1x16xf32, #tpu.memory_space<vmem>>, vector<1x16xf32>
    %cst = arith.constant dense<0.000000e+00> : vector<16x48xf32>
    %5 = tpu.matmul %0, %1, %cst {dimension_numbers = #tpu.dot_dimension_numbers<[1], [0], [0], [1], [0, 0, 1, 1], [], []>} : vector<16x32xf32>, vector<32x48xf32>, vector<16x48xf32> -> vector<16x48xf32>
    %6 = vector.broadcast %3 : vector<1x48xf32> to vector<16x48xf32>
    %7 = arith.addf %5, %6 : vector<16x48xf32>
    %8 = vector.extract_strided_slice %7 {offsets = [0, 0], sizes = [16, 16], strides = [1, 1]} : vector<16x48xf32> to vector<16x16xf32>
    %9 = vector.extract_strided_slice %7 {offsets = [0, 16], sizes = [16, 16], strides = [1, 1]} : vector<16x48xf32> to vector<16x16xf32>
    %10 = vector.extract_strided_slice %7 {offsets = [0, 32], sizes = [16, 16], strides = [1, 1]} : vector<16x48xf32> to vector<16x16xf32>
    %11 = vector.extract_strided_slice %2 {offsets = [0, 0], sizes = [16, 16], strides = [1, 1]} : vector<16x48xf32> to vector<16x16xf32>
    %12 = vector.extract_strided_slice %2 {offsets = [0, 16], sizes = [16, 16], strides = [1, 1]} : vector<16x48xf32> to vector<16x16xf32>
    %13 = vector.extract_strided_slice %2 {offsets = [0, 32], sizes = [16, 16], strides = [1, 1]} : vector<16x48xf32> to vector<16x16xf32>
    %cst_9 = arith.constant 0.000000e+00 : f32
    %14 = vector.broadcast %cst_9 : f32 to vector<2x16xf32>
    %cst_10 = arith.constant dense<0.000000e+00> : vector<2x16xf32>
    %15 = tpu.matmul %14, %11, %cst_10 {dimension_numbers = #tpu.dot_dimension_numbers<[1], [0], [0], [1], [0, 0, 1, 1], [], []>} : vector<2x16xf32>, vector<16x16xf32>, vector<2x16xf32> -> vector<2x16xf32>
    %cst_11 = arith.constant dense<0.000000e+00> : vector<2x16xf32>
    %16 = tpu.matmul %14, %12, %cst_11 {dimension_numbers = #tpu.dot_dimension_numbers<[1], [0], [0], [1], [0, 0, 1, 1], [], []>} : vector<2x16xf32>, vector<16x16xf32>, vector<2x16xf32> -> vector<2x16xf32>
    %cst_12 = arith.constant dense<0.000000e+00> : vector<2x16xf32>
    %17 = tpu.matmul %14, %13, %cst_12 {dimension_numbers = #tpu.dot_dimension_numbers<[1], [0], [0], [1], [0, 0, 1, 1], [], []>} : vector<2x16xf32>, vector<16x16xf32>, vector<2x16xf32> -> vector<2x16xf32>
    %18 = vector.extract_strided_slice %8 {offsets = [0, 0], sizes = [2, 16], strides = [1, 1]} : vector<16x16xf32> to vector<2x16xf32>
    %19 = arith.addf %18, %15 : vector<2x16xf32>
    %20 = arith.negf %19 : vector<2x16xf32>
    %21 = math.exp %20 : vector<2x16xf32>
    %cst_13 = arith.constant 1.000000e+00 : f32
    %22 = vector.broadcast %cst_13 : f32 to vector<2x16xf32>
    %23 = arith.addf %22, %21 : vector<2x16xf32>
    %24 = arith.divf %22, %23 : vector<2x16xf32>
    %25 = vector.extract_strided_slice %9 {offsets = [0, 0], sizes = [2, 16], strides = [1, 1]} : vector<16x16xf32> to vector<2x16xf32>
    %26 = arith.addf %25, %16 : vector<2x16xf32>
    %27 = arith.negf %26 : vector<2x16xf32>
    %28 = math.exp %27 : vector<2x16xf32>
    %cst_14 = arith.constant 1.000000e+00 : f32
    %29 = vector.broadcast %cst_14 : f32 to vector<2x16xf32>
    %30 = arith.addf %29, %28 : vector<2x16xf32>
    %31 = arith.divf %29, %30 : vector<2x16xf32>
    %32 = vector.extract_strided_slice %10 {offsets = [0, 0], sizes = [2, 16], strides = [1, 1]} : vector<16x16xf32> to vector<2x16xf32>
    %33 = vector.broadcast %4 : vector<1x16xf32> to vector<2x16xf32>
    %34 = arith.addf %17, %33 : vector<2x16xf32>
    %35 = arith.mulf %24, %34 : vector<2x16xf32>
    %36 = arith.addf %32, %35 : vector<2x16xf32>
    %37 = math.tanh %36 : vector<2x16xf32>
    %cst_15 = arith.constant 1.000000e+00 : f32
    %38 = vector.broadcast %cst_15 : f32 to vector<2x16xf32>
    %39 = arith.subf %38, %31 : vector<2x16xf32>
    %40 = arith.mulf %39, %37 : vector<2x16xf32>
    %41 = arith.mulf %31, %14 : vector<2x16xf32>
    %42 = arith.addf %40, %41 : vector<2x16xf32>
    %cst_16 = arith.constant dense<0.000000e+00> : vector<2x16xf32>
    %43 = tpu.matmul %42, %11, %cst_16 {dimension_numbers = #tpu.dot_dimension_numbers<[1], [0], [0], [1], [0, 0, 1, 1], [], []>} : vector<2x16xf32>, vector<16x16xf32>, vector<2x16xf32> -> vector<2x16xf32>
    %cst_17 = arith.constant dense<0.000000e+00> : vector<2x16xf32>
    %44 = tpu.matmul %42, %12, %cst_17 {dimension_numbers = #tpu.dot_dimension_numbers<[1], [0], [0], [1], [0, 0, 1, 1], [], []>} : vector<2x16xf32>, vector<16x16xf32>, vector<2x16xf32> -> vector<2x16xf32>
    %cst_18 = arith.constant dense<0.000000e+00> : vector<2x16xf32>
    %45 = tpu.matmul %42, %13, %cst_18 {dimension_numbers = #tpu.dot_dimension_numbers<[1], [0], [0], [1], [0, 0, 1, 1], [], []>} : vector<2x16xf32>, vector<16x16xf32>, vector<2x16xf32> -> vector<2x16xf32>
    %46 = vector.extract_strided_slice %8 {offsets = [2, 0], sizes = [2, 16], strides = [1, 1]} : vector<16x16xf32> to vector<2x16xf32>
    %47 = arith.addf %46, %43 : vector<2x16xf32>
    %48 = arith.negf %47 : vector<2x16xf32>
    %49 = math.exp %48 : vector<2x16xf32>
    %cst_19 = arith.constant 1.000000e+00 : f32
    %50 = vector.broadcast %cst_19 : f32 to vector<2x16xf32>
    %51 = arith.addf %50, %49 : vector<2x16xf32>
    %52 = arith.divf %50, %51 : vector<2x16xf32>
    %53 = vector.extract_strided_slice %9 {offsets = [2, 0], sizes = [2, 16], strides = [1, 1]} : vector<16x16xf32> to vector<2x16xf32>
    %54 = arith.addf %53, %44 : vector<2x16xf32>
    %55 = arith.negf %54 : vector<2x16xf32>
    %56 = math.exp %55 : vector<2x16xf32>
    %cst_20 = arith.constant 1.000000e+00 : f32
    %57 = vector.broadcast %cst_20 : f32 to vector<2x16xf32>
    %58 = arith.addf %57, %56 : vector<2x16xf32>
    %59 = arith.divf %57, %58 : vector<2x16xf32>
    %60 = vector.extract_strided_slice %10 {offsets = [2, 0], sizes = [2, 16], strides = [1, 1]} : vector<16x16xf32> to vector<2x16xf32>
    %61 = vector.broadcast %4 : vector<1x16xf32> to vector<2x16xf32>
    %62 = arith.addf %45, %61 : vector<2x16xf32>
    %63 = arith.mulf %52, %62 : vector<2x16xf32>
    %64 = arith.addf %60, %63 : vector<2x16xf32>
    %65 = math.tanh %64 : vector<2x16xf32>
    %cst_21 = arith.constant 1.000000e+00 : f32
    %66 = vector.broadcast %cst_21 : f32 to vector<2x16xf32>
    %67 = arith.subf %66, %59 : vector<2x16xf32>
    %68 = arith.mulf %67, %65 : vector<2x16xf32>
    %69 = arith.mulf %59, %42 : vector<2x16xf32>
    %70 = arith.addf %68, %69 : vector<2x16xf32>
    %cst_22 = arith.constant dense<0.000000e+00> : vector<2x16xf32>
    %71 = tpu.matmul %70, %11, %cst_22 {dimension_numbers = #tpu.dot_dimension_numbers<[1], [0], [0], [1], [0, 0, 1, 1], [], []>} : vector<2x16xf32>, vector<16x16xf32>, vector<2x16xf32> -> vector<2x16xf32>
    %cst_23 = arith.constant dense<0.000000e+00> : vector<2x16xf32>
    %72 = tpu.matmul %70, %12, %cst_23 {dimension_numbers = #tpu.dot_dimension_numbers<[1], [0], [0], [1], [0, 0, 1, 1], [], []>} : vector<2x16xf32>, vector<16x16xf32>, vector<2x16xf32> -> vector<2x16xf32>
    %cst_24 = arith.constant dense<0.000000e+00> : vector<2x16xf32>
    %73 = tpu.matmul %70, %13, %cst_24 {dimension_numbers = #tpu.dot_dimension_numbers<[1], [0], [0], [1], [0, 0, 1, 1], [], []>} : vector<2x16xf32>, vector<16x16xf32>, vector<2x16xf32> -> vector<2x16xf32>
    %74 = vector.extract_strided_slice %8 {offsets = [4, 0], sizes = [2, 16], strides = [1, 1]} : vector<16x16xf32> to vector<2x16xf32>
    %75 = arith.addf %74, %71 : vector<2x16xf32>
    %76 = arith.negf %75 : vector<2x16xf32>
    %77 = math.exp %76 : vector<2x16xf32>
    %cst_25 = arith.constant 1.000000e+00 : f32
    %78 = vector.broadcast %cst_25 : f32 to vector<2x16xf32>
    %79 = arith.addf %78, %77 : vector<2x16xf32>
    %80 = arith.divf %78, %79 : vector<2x16xf32>
    %81 = vector.extract_strided_slice %9 {offsets = [4, 0], sizes = [2, 16], strides = [1, 1]} : vector<16x16xf32> to vector<2x16xf32>
    %82 = arith.addf %81, %72 : vector<2x16xf32>
    %83 = arith.negf %82 : vector<2x16xf32>
    %84 = math.exp %83 : vector<2x16xf32>
    %cst_26 = arith.constant 1.000000e+00 : f32
    %85 = vector.broadcast %cst_26 : f32 to vector<2x16xf32>
    %86 = arith.addf %85, %84 : vector<2x16xf32>
    %87 = arith.divf %85, %86 : vector<2x16xf32>
    %88 = vector.extract_strided_slice %10 {offsets = [4, 0], sizes = [2, 16], strides = [1, 1]} : vector<16x16xf32> to vector<2x16xf32>
    %89 = vector.broadcast %4 : vector<1x16xf32> to vector<2x16xf32>
    %90 = arith.addf %73, %89 : vector<2x16xf32>
    %91 = arith.mulf %80, %90 : vector<2x16xf32>
    %92 = arith.addf %88, %91 : vector<2x16xf32>
    %93 = math.tanh %92 : vector<2x16xf32>
    %cst_27 = arith.constant 1.000000e+00 : f32
    %94 = vector.broadcast %cst_27 : f32 to vector<2x16xf32>
    %95 = arith.subf %94, %87 : vector<2x16xf32>
    %96 = arith.mulf %95, %93 : vector<2x16xf32>
    %97 = arith.mulf %87, %70 : vector<2x16xf32>
    %98 = arith.addf %96, %97 : vector<2x16xf32>
    %cst_28 = arith.constant dense<0.000000e+00> : vector<2x16xf32>
    %99 = tpu.matmul %98, %11, %cst_28 {dimension_numbers = #tpu.dot_dimension_numbers<[1], [0], [0], [1], [0, 0, 1, 1], [], []>} : vector<2x16xf32>, vector<16x16xf32>, vector<2x16xf32> -> vector<2x16xf32>
    %cst_29 = arith.constant dense<0.000000e+00> : vector<2x16xf32>
    %100 = tpu.matmul %98, %12, %cst_29 {dimension_numbers = #tpu.dot_dimension_numbers<[1], [0], [0], [1], [0, 0, 1, 1], [], []>} : vector<2x16xf32>, vector<16x16xf32>, vector<2x16xf32> -> vector<2x16xf32>
    %cst_30 = arith.constant dense<0.000000e+00> : vector<2x16xf32>
    %101 = tpu.matmul %98, %13, %cst_30 {dimension_numbers = #tpu.dot_dimension_numbers<[1], [0], [0], [1], [0, 0, 1, 1], [], []>} : vector<2x16xf32>, vector<16x16xf32>, vector<2x16xf32> -> vector<2x16xf32>
    %102 = vector.extract_strided_slice %8 {offsets = [6, 0], sizes = [2, 16], strides = [1, 1]} : vector<16x16xf32> to vector<2x16xf32>
    %103 = arith.addf %102, %99 : vector<2x16xf32>
    %104 = arith.negf %103 : vector<2x16xf32>
    %105 = math.exp %104 : vector<2x16xf32>
    %cst_31 = arith.constant 1.000000e+00 : f32
    %106 = vector.broadcast %cst_31 : f32 to vector<2x16xf32>
    %107 = arith.addf %106, %105 : vector<2x16xf32>
    %108 = arith.divf %106, %107 : vector<2x16xf32>
    %109 = vector.extract_strided_slice %9 {offsets = [6, 0], sizes = [2, 16], strides = [1, 1]} : vector<16x16xf32> to vector<2x16xf32>
    %110 = arith.addf %109, %100 : vector<2x16xf32>
    %111 = arith.negf %110 : vector<2x16xf32>
    %112 = math.exp %111 : vector<2x16xf32>
    %cst_32 = arith.constant 1.000000e+00 : f32
    %113 = vector.broadcast %cst_32 : f32 to vector<2x16xf32>
    %114 = arith.addf %113, %112 : vector<2x16xf32>
    %115 = arith.divf %113, %114 : vector<2x16xf32>
    %116 = vector.extract_strided_slice %10 {offsets = [6, 0], sizes = [2, 16], strides = [1, 1]} : vector<16x16xf32> to vector<2x16xf32>
    %117 = vector.broadcast %4 : vector<1x16xf32> to vector<2x16xf32>
    %118 = arith.addf %101, %117 : vector<2x16xf32>
    %119 = arith.mulf %108, %118 : vector<2x16xf32>
    %120 = arith.addf %116, %119 : vector<2x16xf32>
    %121 = math.tanh %120 : vector<2x16xf32>
    %cst_33 = arith.constant 1.000000e+00 : f32
    %122 = vector.broadcast %cst_33 : f32 to vector<2x16xf32>
    %123 = arith.subf %122, %115 : vector<2x16xf32>
    %124 = arith.mulf %123, %121 : vector<2x16xf32>
    %125 = arith.mulf %115, %98 : vector<2x16xf32>
    %126 = arith.addf %124, %125 : vector<2x16xf32>
    %cst_34 = arith.constant dense<0.000000e+00> : vector<2x16xf32>
    %127 = tpu.matmul %126, %11, %cst_34 {dimension_numbers = #tpu.dot_dimension_numbers<[1], [0], [0], [1], [0, 0, 1, 1], [], []>} : vector<2x16xf32>, vector<16x16xf32>, vector<2x16xf32> -> vector<2x16xf32>
    %cst_35 = arith.constant dense<0.000000e+00> : vector<2x16xf32>
    %128 = tpu.matmul %126, %12, %cst_35 {dimension_numbers = #tpu.dot_dimension_numbers<[1], [0], [0], [1], [0, 0, 1, 1], [], []>} : vector<2x16xf32>, vector<16x16xf32>, vector<2x16xf32> -> vector<2x16xf32>
    %cst_36 = arith.constant dense<0.000000e+00> : vector<2x16xf32>
    %129 = tpu.matmul %126, %13, %cst_36 {dimension_numbers = #tpu.dot_dimension_numbers<[1], [0], [0], [1], [0, 0, 1, 1], [], []>} : vector<2x16xf32>, vector<16x16xf32>, vector<2x16xf32> -> vector<2x16xf32>
    %130 = vector.extract_strided_slice %8 {offsets = [8, 0], sizes = [2, 16], strides = [1, 1]} : vector<16x16xf32> to vector<2x16xf32>
    %131 = arith.addf %130, %127 : vector<2x16xf32>
    %132 = arith.negf %131 : vector<2x16xf32>
    %133 = math.exp %132 : vector<2x16xf32>
    %cst_37 = arith.constant 1.000000e+00 : f32
    %134 = vector.broadcast %cst_37 : f32 to vector<2x16xf32>
    %135 = arith.addf %134, %133 : vector<2x16xf32>
    %136 = arith.divf %134, %135 : vector<2x16xf32>
    %137 = vector.extract_strided_slice %9 {offsets = [8, 0], sizes = [2, 16], strides = [1, 1]} : vector<16x16xf32> to vector<2x16xf32>
    %138 = arith.addf %137, %128 : vector<2x16xf32>
    %139 = arith.negf %138 : vector<2x16xf32>
    %140 = math.exp %139 : vector<2x16xf32>
    %cst_38 = arith.constant 1.000000e+00 : f32
    %141 = vector.broadcast %cst_38 : f32 to vector<2x16xf32>
    %142 = arith.addf %141, %140 : vector<2x16xf32>
    %143 = arith.divf %141, %142 : vector<2x16xf32>
    %144 = vector.extract_strided_slice %10 {offsets = [8, 0], sizes = [2, 16], strides = [1, 1]} : vector<16x16xf32> to vector<2x16xf32>
    %145 = vector.broadcast %4 : vector<1x16xf32> to vector<2x16xf32>
    %146 = arith.addf %129, %145 : vector<2x16xf32>
    %147 = arith.mulf %136, %146 : vector<2x16xf32>
    %148 = arith.addf %144, %147 : vector<2x16xf32>
    %149 = math.tanh %148 : vector<2x16xf32>
    %cst_39 = arith.constant 1.000000e+00 : f32
    %150 = vector.broadcast %cst_39 : f32 to vector<2x16xf32>
    %151 = arith.subf %150, %143 : vector<2x16xf32>
    %152 = arith.mulf %151, %149 : vector<2x16xf32>
    %153 = arith.mulf %143, %126 : vector<2x16xf32>
    %154 = arith.addf %152, %153 : vector<2x16xf32>
    %cst_40 = arith.constant dense<0.000000e+00> : vector<2x16xf32>
    %155 = tpu.matmul %154, %11, %cst_40 {dimension_numbers = #tpu.dot_dimension_numbers<[1], [0], [0], [1], [0, 0, 1, 1], [], []>} : vector<2x16xf32>, vector<16x16xf32>, vector<2x16xf32> -> vector<2x16xf32>
    %cst_41 = arith.constant dense<0.000000e+00> : vector<2x16xf32>
    %156 = tpu.matmul %154, %12, %cst_41 {dimension_numbers = #tpu.dot_dimension_numbers<[1], [0], [0], [1], [0, 0, 1, 1], [], []>} : vector<2x16xf32>, vector<16x16xf32>, vector<2x16xf32> -> vector<2x16xf32>
    %cst_42 = arith.constant dense<0.000000e+00> : vector<2x16xf32>
    %157 = tpu.matmul %154, %13, %cst_42 {dimension_numbers = #tpu.dot_dimension_numbers<[1], [0], [0], [1], [0, 0, 1, 1], [], []>} : vector<2x16xf32>, vector<16x16xf32>, vector<2x16xf32> -> vector<2x16xf32>
    %158 = vector.extract_strided_slice %8 {offsets = [10, 0], sizes = [2, 16], strides = [1, 1]} : vector<16x16xf32> to vector<2x16xf32>
    %159 = arith.addf %158, %155 : vector<2x16xf32>
    %160 = arith.negf %159 : vector<2x16xf32>
    %161 = math.exp %160 : vector<2x16xf32>
    %cst_43 = arith.constant 1.000000e+00 : f32
    %162 = vector.broadcast %cst_43 : f32 to vector<2x16xf32>
    %163 = arith.addf %162, %161 : vector<2x16xf32>
    %164 = arith.divf %162, %163 : vector<2x16xf32>
    %165 = vector.extract_strided_slice %9 {offsets = [10, 0], sizes = [2, 16], strides = [1, 1]} : vector<16x16xf32> to vector<2x16xf32>
    %166 = arith.addf %165, %156 : vector<2x16xf32>
    %167 = arith.negf %166 : vector<2x16xf32>
    %168 = math.exp %167 : vector<2x16xf32>
    %cst_44 = arith.constant 1.000000e+00 : f32
    %169 = vector.broadcast %cst_44 : f32 to vector<2x16xf32>
    %170 = arith.addf %169, %168 : vector<2x16xf32>
    %171 = arith.divf %169, %170 : vector<2x16xf32>
    %172 = vector.extract_strided_slice %10 {offsets = [10, 0], sizes = [2, 16], strides = [1, 1]} : vector<16x16xf32> to vector<2x16xf32>
    %173 = vector.broadcast %4 : vector<1x16xf32> to vector<2x16xf32>
    %174 = arith.addf %157, %173 : vector<2x16xf32>
    %175 = arith.mulf %164, %174 : vector<2x16xf32>
    %176 = arith.addf %172, %175 : vector<2x16xf32>
    %177 = math.tanh %176 : vector<2x16xf32>
    %cst_45 = arith.constant 1.000000e+00 : f32
    %178 = vector.broadcast %cst_45 : f32 to vector<2x16xf32>
    %179 = arith.subf %178, %171 : vector<2x16xf32>
    %180 = arith.mulf %179, %177 : vector<2x16xf32>
    %181 = arith.mulf %171, %154 : vector<2x16xf32>
    %182 = arith.addf %180, %181 : vector<2x16xf32>
    %cst_46 = arith.constant dense<0.000000e+00> : vector<2x16xf32>
    %183 = tpu.matmul %182, %11, %cst_46 {dimension_numbers = #tpu.dot_dimension_numbers<[1], [0], [0], [1], [0, 0, 1, 1], [], []>} : vector<2x16xf32>, vector<16x16xf32>, vector<2x16xf32> -> vector<2x16xf32>
    %cst_47 = arith.constant dense<0.000000e+00> : vector<2x16xf32>
    %184 = tpu.matmul %182, %12, %cst_47 {dimension_numbers = #tpu.dot_dimension_numbers<[1], [0], [0], [1], [0, 0, 1, 1], [], []>} : vector<2x16xf32>, vector<16x16xf32>, vector<2x16xf32> -> vector<2x16xf32>
    %cst_48 = arith.constant dense<0.000000e+00> : vector<2x16xf32>
    %185 = tpu.matmul %182, %13, %cst_48 {dimension_numbers = #tpu.dot_dimension_numbers<[1], [0], [0], [1], [0, 0, 1, 1], [], []>} : vector<2x16xf32>, vector<16x16xf32>, vector<2x16xf32> -> vector<2x16xf32>
    %186 = vector.extract_strided_slice %8 {offsets = [12, 0], sizes = [2, 16], strides = [1, 1]} : vector<16x16xf32> to vector<2x16xf32>
    %187 = arith.addf %186, %183 : vector<2x16xf32>
    %188 = arith.negf %187 : vector<2x16xf32>
    %189 = math.exp %188 : vector<2x16xf32>
    %cst_49 = arith.constant 1.000000e+00 : f32
    %190 = vector.broadcast %cst_49 : f32 to vector<2x16xf32>
    %191 = arith.addf %190, %189 : vector<2x16xf32>
    %192 = arith.divf %190, %191 : vector<2x16xf32>
    %193 = vector.extract_strided_slice %9 {offsets = [12, 0], sizes = [2, 16], strides = [1, 1]} : vector<16x16xf32> to vector<2x16xf32>
    %194 = arith.addf %193, %184 : vector<2x16xf32>
    %195 = arith.negf %194 : vector<2x16xf32>
    %196 = math.exp %195 : vector<2x16xf32>
    %cst_50 = arith.constant 1.000000e+00 : f32
    %197 = vector.broadcast %cst_50 : f32 to vector<2x16xf32>
    %198 = arith.addf %197, %196 : vector<2x16xf32>
    %199 = arith.divf %197, %198 : vector<2x16xf32>
    %200 = vector.extract_strided_slice %10 {offsets = [12, 0], sizes = [2, 16], strides = [1, 1]} : vector<16x16xf32> to vector<2x16xf32>
    %201 = vector.broadcast %4 : vector<1x16xf32> to vector<2x16xf32>
    %202 = arith.addf %185, %201 : vector<2x16xf32>
    %203 = arith.mulf %192, %202 : vector<2x16xf32>
    %204 = arith.addf %200, %203 : vector<2x16xf32>
    %205 = math.tanh %204 : vector<2x16xf32>
    %cst_51 = arith.constant 1.000000e+00 : f32
    %206 = vector.broadcast %cst_51 : f32 to vector<2x16xf32>
    %207 = arith.subf %206, %199 : vector<2x16xf32>
    %208 = arith.mulf %207, %205 : vector<2x16xf32>
    %209 = arith.mulf %199, %182 : vector<2x16xf32>
    %210 = arith.addf %208, %209 : vector<2x16xf32>
    %cst_52 = arith.constant dense<0.000000e+00> : vector<2x16xf32>
    %211 = tpu.matmul %210, %11, %cst_52 {dimension_numbers = #tpu.dot_dimension_numbers<[1], [0], [0], [1], [0, 0, 1, 1], [], []>} : vector<2x16xf32>, vector<16x16xf32>, vector<2x16xf32> -> vector<2x16xf32>
    %cst_53 = arith.constant dense<0.000000e+00> : vector<2x16xf32>
    %212 = tpu.matmul %210, %12, %cst_53 {dimension_numbers = #tpu.dot_dimension_numbers<[1], [0], [0], [1], [0, 0, 1, 1], [], []>} : vector<2x16xf32>, vector<16x16xf32>, vector<2x16xf32> -> vector<2x16xf32>
    %cst_54 = arith.constant dense<0.000000e+00> : vector<2x16xf32>
    %213 = tpu.matmul %210, %13, %cst_54 {dimension_numbers = #tpu.dot_dimension_numbers<[1], [0], [0], [1], [0, 0, 1, 1], [], []>} : vector<2x16xf32>, vector<16x16xf32>, vector<2x16xf32> -> vector<2x16xf32>
    %214 = vector.extract_strided_slice %8 {offsets = [14, 0], sizes = [2, 16], strides = [1, 1]} : vector<16x16xf32> to vector<2x16xf32>
    %215 = arith.addf %214, %211 : vector<2x16xf32>
    %216 = arith.negf %215 : vector<2x16xf32>
    %217 = math.exp %216 : vector<2x16xf32>
    %cst_55 = arith.constant 1.000000e+00 : f32
    %218 = vector.broadcast %cst_55 : f32 to vector<2x16xf32>
    %219 = arith.addf %218, %217 : vector<2x16xf32>
    %220 = arith.divf %218, %219 : vector<2x16xf32>
    %221 = vector.extract_strided_slice %9 {offsets = [14, 0], sizes = [2, 16], strides = [1, 1]} : vector<16x16xf32> to vector<2x16xf32>
    %222 = arith.addf %221, %212 : vector<2x16xf32>
    %223 = arith.negf %222 : vector<2x16xf32>
    %224 = math.exp %223 : vector<2x16xf32>
    %cst_56 = arith.constant 1.000000e+00 : f32
    %225 = vector.broadcast %cst_56 : f32 to vector<2x16xf32>
    %226 = arith.addf %225, %224 : vector<2x16xf32>
    %227 = arith.divf %225, %226 : vector<2x16xf32>
    %228 = vector.extract_strided_slice %10 {offsets = [14, 0], sizes = [2, 16], strides = [1, 1]} : vector<16x16xf32> to vector<2x16xf32>
    %229 = vector.broadcast %4 : vector<1x16xf32> to vector<2x16xf32>
    %230 = arith.addf %213, %229 : vector<2x16xf32>
    %231 = arith.mulf %220, %230 : vector<2x16xf32>
    %232 = arith.addf %228, %231 : vector<2x16xf32>
    %233 = math.tanh %232 : vector<2x16xf32>
    %cst_57 = arith.constant 1.000000e+00 : f32
    %234 = vector.broadcast %cst_57 : f32 to vector<2x16xf32>
    %235 = arith.subf %234, %227 : vector<2x16xf32>
    %236 = arith.mulf %235, %233 : vector<2x16xf32>
    %237 = arith.mulf %227, %210 : vector<2x16xf32>
    %238 = arith.addf %236, %237 : vector<2x16xf32>
    %c0_58 = arith.constant 0 : index
    %c0_59 = arith.constant 0 : index
    %239 = vector.load %arg5[%c0_58, %c0_59] : memref<32x48xf32, #tpu.memory_space<vmem>>, vector<32x48xf32>
    %c0_60 = arith.constant 0 : index
    %c0_61 = arith.constant 0 : index
    %240 = vector.load %arg6[%c0_60, %c0_61] : memref<16x48xf32, #tpu.memory_space<vmem>>, vector<16x48xf32>
    %c0_62 = arith.constant 0 : index
    %c0_63 = arith.constant 0 : index
    %241 = vector.load %arg7[%c0_62, %c0_63] : memref<1x48xf32, #tpu.memory_space<vmem>>, vector<1x48xf32>
    %c0_64 = arith.constant 0 : index
    %c0_65 = arith.constant 0 : index
    %242 = vector.load %arg8[%c0_64, %c0_65] : memref<1x16xf32, #tpu.memory_space<vmem>>, vector<1x16xf32>
    %cst_66 = arith.constant dense<0.000000e+00> : vector<16x48xf32>
    %243 = tpu.matmul %0, %239, %cst_66 {dimension_numbers = #tpu.dot_dimension_numbers<[1], [0], [0], [1], [0, 0, 1, 1], [], []>} : vector<16x32xf32>, vector<32x48xf32>, vector<16x48xf32> -> vector<16x48xf32>
    %244 = vector.broadcast %241 : vector<1x48xf32> to vector<16x48xf32>
    %245 = arith.addf %243, %244 : vector<16x48xf32>
    %246 = vector.extract_strided_slice %245 {offsets = [0, 0], sizes = [16, 16], strides = [1, 1]} : vector<16x48xf32> to vector<16x16xf32>
    %247 = vector.extract_strided_slice %245 {offsets = [0, 16], sizes = [16, 16], strides = [1, 1]} : vector<16x48xf32> to vector<16x16xf32>
    %248 = vector.extract_strided_slice %245 {offsets = [0, 32], sizes = [16, 16], strides = [1, 1]} : vector<16x48xf32> to vector<16x16xf32>
    %249 = vector.extract_strided_slice %240 {offsets = [0, 0], sizes = [16, 16], strides = [1, 1]} : vector<16x48xf32> to vector<16x16xf32>
    %250 = vector.extract_strided_slice %240 {offsets = [0, 16], sizes = [16, 16], strides = [1, 1]} : vector<16x48xf32> to vector<16x16xf32>
    %251 = vector.extract_strided_slice %240 {offsets = [0, 32], sizes = [16, 16], strides = [1, 1]} : vector<16x48xf32> to vector<16x16xf32>
    %cst_67 = arith.constant 0.000000e+00 : f32
    %252 = vector.broadcast %cst_67 : f32 to vector<2x16xf32>
    %cst_68 = arith.constant dense<0.000000e+00> : vector<2x16xf32>
    %253 = tpu.matmul %252, %249, %cst_68 {dimension_numbers = #tpu.dot_dimension_numbers<[1], [0], [0], [1], [0, 0, 1, 1], [], []>} : vector<2x16xf32>, vector<16x16xf32>, vector<2x16xf32> -> vector<2x16xf32>
    %cst_69 = arith.constant dense<0.000000e+00> : vector<2x16xf32>
    %254 = tpu.matmul %252, %250, %cst_69 {dimension_numbers = #tpu.dot_dimension_numbers<[1], [0], [0], [1], [0, 0, 1, 1], [], []>} : vector<2x16xf32>, vector<16x16xf32>, vector<2x16xf32> -> vector<2x16xf32>
    %cst_70 = arith.constant dense<0.000000e+00> : vector<2x16xf32>
    %255 = tpu.matmul %252, %251, %cst_70 {dimension_numbers = #tpu.dot_dimension_numbers<[1], [0], [0], [1], [0, 0, 1, 1], [], []>} : vector<2x16xf32>, vector<16x16xf32>, vector<2x16xf32> -> vector<2x16xf32>
    %256 = vector.extract_strided_slice %246 {offsets = [14, 0], sizes = [2, 16], strides = [1, 1]} : vector<16x16xf32> to vector<2x16xf32>
    %257 = arith.addf %256, %253 : vector<2x16xf32>
    %258 = arith.negf %257 : vector<2x16xf32>
    %259 = math.exp %258 : vector<2x16xf32>
    %cst_71 = arith.constant 1.000000e+00 : f32
    %260 = vector.broadcast %cst_71 : f32 to vector<2x16xf32>
    %261 = arith.addf %260, %259 : vector<2x16xf32>
    %262 = arith.divf %260, %261 : vector<2x16xf32>
    %263 = vector.extract_strided_slice %247 {offsets = [14, 0], sizes = [2, 16], strides = [1, 1]} : vector<16x16xf32> to vector<2x16xf32>
    %264 = arith.addf %263, %254 : vector<2x16xf32>
    %265 = arith.negf %264 : vector<2x16xf32>
    %266 = math.exp %265 : vector<2x16xf32>
    %cst_72 = arith.constant 1.000000e+00 : f32
    %267 = vector.broadcast %cst_72 : f32 to vector<2x16xf32>
    %268 = arith.addf %267, %266 : vector<2x16xf32>
    %269 = arith.divf %267, %268 : vector<2x16xf32>
    %270 = vector.extract_strided_slice %248 {offsets = [14, 0], sizes = [2, 16], strides = [1, 1]} : vector<16x16xf32> to vector<2x16xf32>
    %271 = vector.broadcast %242 : vector<1x16xf32> to vector<2x16xf32>
    %272 = arith.addf %255, %271 : vector<2x16xf32>
    %273 = arith.mulf %262, %272 : vector<2x16xf32>
    %274 = arith.addf %270, %273 : vector<2x16xf32>
    %275 = math.tanh %274 : vector<2x16xf32>
    %cst_73 = arith.constant 1.000000e+00 : f32
    %276 = vector.broadcast %cst_73 : f32 to vector<2x16xf32>
    %277 = arith.subf %276, %269 : vector<2x16xf32>
    %278 = arith.mulf %277, %275 : vector<2x16xf32>
    %279 = arith.mulf %269, %252 : vector<2x16xf32>
    %280 = arith.addf %278, %279 : vector<2x16xf32>
    %cst_74 = arith.constant dense<0.000000e+00> : vector<2x16xf32>
    %281 = tpu.matmul %280, %249, %cst_74 {dimension_numbers = #tpu.dot_dimension_numbers<[1], [0], [0], [1], [0, 0, 1, 1], [], []>} : vector<2x16xf32>, vector<16x16xf32>, vector<2x16xf32> -> vector<2x16xf32>
    %cst_75 = arith.constant dense<0.000000e+00> : vector<2x16xf32>
    %282 = tpu.matmul %280, %250, %cst_75 {dimension_numbers = #tpu.dot_dimension_numbers<[1], [0], [0], [1], [0, 0, 1, 1], [], []>} : vector<2x16xf32>, vector<16x16xf32>, vector<2x16xf32> -> vector<2x16xf32>
    %cst_76 = arith.constant dense<0.000000e+00> : vector<2x16xf32>
    %283 = tpu.matmul %280, %251, %cst_76 {dimension_numbers = #tpu.dot_dimension_numbers<[1], [0], [0], [1], [0, 0, 1, 1], [], []>} : vector<2x16xf32>, vector<16x16xf32>, vector<2x16xf32> -> vector<2x16xf32>
    %284 = vector.extract_strided_slice %246 {offsets = [12, 0], sizes = [2, 16], strides = [1, 1]} : vector<16x16xf32> to vector<2x16xf32>
    %285 = arith.addf %284, %281 : vector<2x16xf32>
    %286 = arith.negf %285 : vector<2x16xf32>
    %287 = math.exp %286 : vector<2x16xf32>
    %cst_77 = arith.constant 1.000000e+00 : f32
    %288 = vector.broadcast %cst_77 : f32 to vector<2x16xf32>
    %289 = arith.addf %288, %287 : vector<2x16xf32>
    %290 = arith.divf %288, %289 : vector<2x16xf32>
    %291 = vector.extract_strided_slice %247 {offsets = [12, 0], sizes = [2, 16], strides = [1, 1]} : vector<16x16xf32> to vector<2x16xf32>
    %292 = arith.addf %291, %282 : vector<2x16xf32>
    %293 = arith.negf %292 : vector<2x16xf32>
    %294 = math.exp %293 : vector<2x16xf32>
    %cst_78 = arith.constant 1.000000e+00 : f32
    %295 = vector.broadcast %cst_78 : f32 to vector<2x16xf32>
    %296 = arith.addf %295, %294 : vector<2x16xf32>
    %297 = arith.divf %295, %296 : vector<2x16xf32>
    %298 = vector.extract_strided_slice %248 {offsets = [12, 0], sizes = [2, 16], strides = [1, 1]} : vector<16x16xf32> to vector<2x16xf32>
    %299 = vector.broadcast %242 : vector<1x16xf32> to vector<2x16xf32>
    %300 = arith.addf %283, %299 : vector<2x16xf32>
    %301 = arith.mulf %290, %300 : vector<2x16xf32>
    %302 = arith.addf %298, %301 : vector<2x16xf32>
    %303 = math.tanh %302 : vector<2x16xf32>
    %cst_79 = arith.constant 1.000000e+00 : f32
    %304 = vector.broadcast %cst_79 : f32 to vector<2x16xf32>
    %305 = arith.subf %304, %297 : vector<2x16xf32>
    %306 = arith.mulf %305, %303 : vector<2x16xf32>
    %307 = arith.mulf %297, %280 : vector<2x16xf32>
    %308 = arith.addf %306, %307 : vector<2x16xf32>
    %cst_80 = arith.constant dense<0.000000e+00> : vector<2x16xf32>
    %309 = tpu.matmul %308, %249, %cst_80 {dimension_numbers = #tpu.dot_dimension_numbers<[1], [0], [0], [1], [0, 0, 1, 1], [], []>} : vector<2x16xf32>, vector<16x16xf32>, vector<2x16xf32> -> vector<2x16xf32>
    %cst_81 = arith.constant dense<0.000000e+00> : vector<2x16xf32>
    %310 = tpu.matmul %308, %250, %cst_81 {dimension_numbers = #tpu.dot_dimension_numbers<[1], [0], [0], [1], [0, 0, 1, 1], [], []>} : vector<2x16xf32>, vector<16x16xf32>, vector<2x16xf32> -> vector<2x16xf32>
    %cst_82 = arith.constant dense<0.000000e+00> : vector<2x16xf32>
    %311 = tpu.matmul %308, %251, %cst_82 {dimension_numbers = #tpu.dot_dimension_numbers<[1], [0], [0], [1], [0, 0, 1, 1], [], []>} : vector<2x16xf32>, vector<16x16xf32>, vector<2x16xf32> -> vector<2x16xf32>
    %312 = vector.extract_strided_slice %246 {offsets = [10, 0], sizes = [2, 16], strides = [1, 1]} : vector<16x16xf32> to vector<2x16xf32>
    %313 = arith.addf %312, %309 : vector<2x16xf32>
    %314 = arith.negf %313 : vector<2x16xf32>
    %315 = math.exp %314 : vector<2x16xf32>
    %cst_83 = arith.constant 1.000000e+00 : f32
    %316 = vector.broadcast %cst_83 : f32 to vector<2x16xf32>
    %317 = arith.addf %316, %315 : vector<2x16xf32>
    %318 = arith.divf %316, %317 : vector<2x16xf32>
    %319 = vector.extract_strided_slice %247 {offsets = [10, 0], sizes = [2, 16], strides = [1, 1]} : vector<16x16xf32> to vector<2x16xf32>
    %320 = arith.addf %319, %310 : vector<2x16xf32>
    %321 = arith.negf %320 : vector<2x16xf32>
    %322 = math.exp %321 : vector<2x16xf32>
    %cst_84 = arith.constant 1.000000e+00 : f32
    %323 = vector.broadcast %cst_84 : f32 to vector<2x16xf32>
    %324 = arith.addf %323, %322 : vector<2x16xf32>
    %325 = arith.divf %323, %324 : vector<2x16xf32>
    %326 = vector.extract_strided_slice %248 {offsets = [10, 0], sizes = [2, 16], strides = [1, 1]} : vector<16x16xf32> to vector<2x16xf32>
    %327 = vector.broadcast %242 : vector<1x16xf32> to vector<2x16xf32>
    %328 = arith.addf %311, %327 : vector<2x16xf32>
    %329 = arith.mulf %318, %328 : vector<2x16xf32>
    %330 = arith.addf %326, %329 : vector<2x16xf32>
    %331 = math.tanh %330 : vector<2x16xf32>
    %cst_85 = arith.constant 1.000000e+00 : f32
    %332 = vector.broadcast %cst_85 : f32 to vector<2x16xf32>
    %333 = arith.subf %332, %325 : vector<2x16xf32>
    %334 = arith.mulf %333, %331 : vector<2x16xf32>
    %335 = arith.mulf %325, %308 : vector<2x16xf32>
    %336 = arith.addf %334, %335 : vector<2x16xf32>
    %cst_86 = arith.constant dense<0.000000e+00> : vector<2x16xf32>
    %337 = tpu.matmul %336, %249, %cst_86 {dimension_numbers = #tpu.dot_dimension_numbers<[1], [0], [0], [1], [0, 0, 1, 1], [], []>} : vector<2x16xf32>, vector<16x16xf32>, vector<2x16xf32> -> vector<2x16xf32>
    %cst_87 = arith.constant dense<0.000000e+00> : vector<2x16xf32>
    %338 = tpu.matmul %336, %250, %cst_87 {dimension_numbers = #tpu.dot_dimension_numbers<[1], [0], [0], [1], [0, 0, 1, 1], [], []>} : vector<2x16xf32>, vector<16x16xf32>, vector<2x16xf32> -> vector<2x16xf32>
    %cst_88 = arith.constant dense<0.000000e+00> : vector<2x16xf32>
    %339 = tpu.matmul %336, %251, %cst_88 {dimension_numbers = #tpu.dot_dimension_numbers<[1], [0], [0], [1], [0, 0, 1, 1], [], []>} : vector<2x16xf32>, vector<16x16xf32>, vector<2x16xf32> -> vector<2x16xf32>
    %340 = vector.extract_strided_slice %246 {offsets = [8, 0], sizes = [2, 16], strides = [1, 1]} : vector<16x16xf32> to vector<2x16xf32>
    %341 = arith.addf %340, %337 : vector<2x16xf32>
    %342 = arith.negf %341 : vector<2x16xf32>
    %343 = math.exp %342 : vector<2x16xf32>
    %cst_89 = arith.constant 1.000000e+00 : f32
    %344 = vector.broadcast %cst_89 : f32 to vector<2x16xf32>
    %345 = arith.addf %344, %343 : vector<2x16xf32>
    %346 = arith.divf %344, %345 : vector<2x16xf32>
    %347 = vector.extract_strided_slice %247 {offsets = [8, 0], sizes = [2, 16], strides = [1, 1]} : vector<16x16xf32> to vector<2x16xf32>
    %348 = arith.addf %347, %338 : vector<2x16xf32>
    %349 = arith.negf %348 : vector<2x16xf32>
    %350 = math.exp %349 : vector<2x16xf32>
    %cst_90 = arith.constant 1.000000e+00 : f32
    %351 = vector.broadcast %cst_90 : f32 to vector<2x16xf32>
    %352 = arith.addf %351, %350 : vector<2x16xf32>
    %353 = arith.divf %351, %352 : vector<2x16xf32>
    %354 = vector.extract_strided_slice %248 {offsets = [8, 0], sizes = [2, 16], strides = [1, 1]} : vector<16x16xf32> to vector<2x16xf32>
    %355 = vector.broadcast %242 : vector<1x16xf32> to vector<2x16xf32>
    %356 = arith.addf %339, %355 : vector<2x16xf32>
    %357 = arith.mulf %346, %356 : vector<2x16xf32>
    %358 = arith.addf %354, %357 : vector<2x16xf32>
    %359 = math.tanh %358 : vector<2x16xf32>
    %cst_91 = arith.constant 1.000000e+00 : f32
    %360 = vector.broadcast %cst_91 : f32 to vector<2x16xf32>
    %361 = arith.subf %360, %353 : vector<2x16xf32>
    %362 = arith.mulf %361, %359 : vector<2x16xf32>
    %363 = arith.mulf %353, %336 : vector<2x16xf32>
    %364 = arith.addf %362, %363 : vector<2x16xf32>
    %cst_92 = arith.constant dense<0.000000e+00> : vector<2x16xf32>
    %365 = tpu.matmul %364, %249, %cst_92 {dimension_numbers = #tpu.dot_dimension_numbers<[1], [0], [0], [1], [0, 0, 1, 1], [], []>} : vector<2x16xf32>, vector<16x16xf32>, vector<2x16xf32> -> vector<2x16xf32>
    %cst_93 = arith.constant dense<0.000000e+00> : vector<2x16xf32>
    %366 = tpu.matmul %364, %250, %cst_93 {dimension_numbers = #tpu.dot_dimension_numbers<[1], [0], [0], [1], [0, 0, 1, 1], [], []>} : vector<2x16xf32>, vector<16x16xf32>, vector<2x16xf32> -> vector<2x16xf32>
    %cst_94 = arith.constant dense<0.000000e+00> : vector<2x16xf32>
    %367 = tpu.matmul %364, %251, %cst_94 {dimension_numbers = #tpu.dot_dimension_numbers<[1], [0], [0], [1], [0, 0, 1, 1], [], []>} : vector<2x16xf32>, vector<16x16xf32>, vector<2x16xf32> -> vector<2x16xf32>
    %368 = vector.extract_strided_slice %246 {offsets = [6, 0], sizes = [2, 16], strides = [1, 1]} : vector<16x16xf32> to vector<2x16xf32>
    %369 = arith.addf %368, %365 : vector<2x16xf32>
    %370 = arith.negf %369 : vector<2x16xf32>
    %371 = math.exp %370 : vector<2x16xf32>
    %cst_95 = arith.constant 1.000000e+00 : f32
    %372 = vector.broadcast %cst_95 : f32 to vector<2x16xf32>
    %373 = arith.addf %372, %371 : vector<2x16xf32>
    %374 = arith.divf %372, %373 : vector<2x16xf32>
    %375 = vector.extract_strided_slice %247 {offsets = [6, 0], sizes = [2, 16], strides = [1, 1]} : vector<16x16xf32> to vector<2x16xf32>
    %376 = arith.addf %375, %366 : vector<2x16xf32>
    %377 = arith.negf %376 : vector<2x16xf32>
    %378 = math.exp %377 : vector<2x16xf32>
    %cst_96 = arith.constant 1.000000e+00 : f32
    %379 = vector.broadcast %cst_96 : f32 to vector<2x16xf32>
    %380 = arith.addf %379, %378 : vector<2x16xf32>
    %381 = arith.divf %379, %380 : vector<2x16xf32>
    %382 = vector.extract_strided_slice %248 {offsets = [6, 0], sizes = [2, 16], strides = [1, 1]} : vector<16x16xf32> to vector<2x16xf32>
    %383 = vector.broadcast %242 : vector<1x16xf32> to vector<2x16xf32>
    %384 = arith.addf %367, %383 : vector<2x16xf32>
    %385 = arith.mulf %374, %384 : vector<2x16xf32>
    %386 = arith.addf %382, %385 : vector<2x16xf32>
    %387 = math.tanh %386 : vector<2x16xf32>
    %cst_97 = arith.constant 1.000000e+00 : f32
    %388 = vector.broadcast %cst_97 : f32 to vector<2x16xf32>
    %389 = arith.subf %388, %381 : vector<2x16xf32>
    %390 = arith.mulf %389, %387 : vector<2x16xf32>
    %391 = arith.mulf %381, %364 : vector<2x16xf32>
    %392 = arith.addf %390, %391 : vector<2x16xf32>
    %cst_98 = arith.constant dense<0.000000e+00> : vector<2x16xf32>
    %393 = tpu.matmul %392, %249, %cst_98 {dimension_numbers = #tpu.dot_dimension_numbers<[1], [0], [0], [1], [0, 0, 1, 1], [], []>} : vector<2x16xf32>, vector<16x16xf32>, vector<2x16xf32> -> vector<2x16xf32>
    %cst_99 = arith.constant dense<0.000000e+00> : vector<2x16xf32>
    %394 = tpu.matmul %392, %250, %cst_99 {dimension_numbers = #tpu.dot_dimension_numbers<[1], [0], [0], [1], [0, 0, 1, 1], [], []>} : vector<2x16xf32>, vector<16x16xf32>, vector<2x16xf32> -> vector<2x16xf32>
    %cst_100 = arith.constant dense<0.000000e+00> : vector<2x16xf32>
    %395 = tpu.matmul %392, %251, %cst_100 {dimension_numbers = #tpu.dot_dimension_numbers<[1], [0], [0], [1], [0, 0, 1, 1], [], []>} : vector<2x16xf32>, vector<16x16xf32>, vector<2x16xf32> -> vector<2x16xf32>
    %396 = vector.extract_strided_slice %246 {offsets = [4, 0], sizes = [2, 16], strides = [1, 1]} : vector<16x16xf32> to vector<2x16xf32>
    %397 = arith.addf %396, %393 : vector<2x16xf32>
    %398 = arith.negf %397 : vector<2x16xf32>
    %399 = math.exp %398 : vector<2x16xf32>
    %cst_101 = arith.constant 1.000000e+00 : f32
    %400 = vector.broadcast %cst_101 : f32 to vector<2x16xf32>
    %401 = arith.addf %400, %399 : vector<2x16xf32>
    %402 = arith.divf %400, %401 : vector<2x16xf32>
    %403 = vector.extract_strided_slice %247 {offsets = [4, 0], sizes = [2, 16], strides = [1, 1]} : vector<16x16xf32> to vector<2x16xf32>
    %404 = arith.addf %403, %394 : vector<2x16xf32>
    %405 = arith.negf %404 : vector<2x16xf32>
    %406 = math.exp %405 : vector<2x16xf32>
    %cst_102 = arith.constant 1.000000e+00 : f32
    %407 = vector.broadcast %cst_102 : f32 to vector<2x16xf32>
    %408 = arith.addf %407, %406 : vector<2x16xf32>
    %409 = arith.divf %407, %408 : vector<2x16xf32>
    %410 = vector.extract_strided_slice %248 {offsets = [4, 0], sizes = [2, 16], strides = [1, 1]} : vector<16x16xf32> to vector<2x16xf32>
    %411 = vector.broadcast %242 : vector<1x16xf32> to vector<2x16xf32>
    %412 = arith.addf %395, %411 : vector<2x16xf32>
    %413 = arith.mulf %402, %412 : vector<2x16xf32>
    %414 = arith.addf %410, %413 : vector<2x16xf32>
    %415 = math.tanh %414 : vector<2x16xf32>
    %cst_103 = arith.constant 1.000000e+00 : f32
    %416 = vector.broadcast %cst_103 : f32 to vector<2x16xf32>
    %417 = arith.subf %416, %409 : vector<2x16xf32>
    %418 = arith.mulf %417, %415 : vector<2x16xf32>
    %419 = arith.mulf %409, %392 : vector<2x16xf32>
    %420 = arith.addf %418, %419 : vector<2x16xf32>
    %cst_104 = arith.constant dense<0.000000e+00> : vector<2x16xf32>
    %421 = tpu.matmul %420, %249, %cst_104 {dimension_numbers = #tpu.dot_dimension_numbers<[1], [0], [0], [1], [0, 0, 1, 1], [], []>} : vector<2x16xf32>, vector<16x16xf32>, vector<2x16xf32> -> vector<2x16xf32>
    %cst_105 = arith.constant dense<0.000000e+00> : vector<2x16xf32>
    %422 = tpu.matmul %420, %250, %cst_105 {dimension_numbers = #tpu.dot_dimension_numbers<[1], [0], [0], [1], [0, 0, 1, 1], [], []>} : vector<2x16xf32>, vector<16x16xf32>, vector<2x16xf32> -> vector<2x16xf32>
    %cst_106 = arith.constant dense<0.000000e+00> : vector<2x16xf32>
    %423 = tpu.matmul %420, %251, %cst_106 {dimension_numbers = #tpu.dot_dimension_numbers<[1], [0], [0], [1], [0, 0, 1, 1], [], []>} : vector<2x16xf32>, vector<16x16xf32>, vector<2x16xf32> -> vector<2x16xf32>
    %424 = vector.extract_strided_slice %246 {offsets = [2, 0], sizes = [2, 16], strides = [1, 1]} : vector<16x16xf32> to vector<2x16xf32>
    %425 = arith.addf %424, %421 : vector<2x16xf32>
    %426 = arith.negf %425 : vector<2x16xf32>
    %427 = math.exp %426 : vector<2x16xf32>
    %cst_107 = arith.constant 1.000000e+00 : f32
    %428 = vector.broadcast %cst_107 : f32 to vector<2x16xf32>
    %429 = arith.addf %428, %427 : vector<2x16xf32>
    %430 = arith.divf %428, %429 : vector<2x16xf32>
    %431 = vector.extract_strided_slice %247 {offsets = [2, 0], sizes = [2, 16], strides = [1, 1]} : vector<16x16xf32> to vector<2x16xf32>
    %432 = arith.addf %431, %422 : vector<2x16xf32>
    %433 = arith.negf %432 : vector<2x16xf32>
    %434 = math.exp %433 : vector<2x16xf32>
    %cst_108 = arith.constant 1.000000e+00 : f32
    %435 = vector.broadcast %cst_108 : f32 to vector<2x16xf32>
    %436 = arith.addf %435, %434 : vector<2x16xf32>
    %437 = arith.divf %435, %436 : vector<2x16xf32>
    %438 = vector.extract_strided_slice %248 {offsets = [2, 0], sizes = [2, 16], strides = [1, 1]} : vector<16x16xf32> to vector<2x16xf32>
    %439 = vector.broadcast %242 : vector<1x16xf32> to vector<2x16xf32>
    %440 = arith.addf %423, %439 : vector<2x16xf32>
    %441 = arith.mulf %430, %440 : vector<2x16xf32>
    %442 = arith.addf %438, %441 : vector<2x16xf32>
    %443 = math.tanh %442 : vector<2x16xf32>
    %cst_109 = arith.constant 1.000000e+00 : f32
    %444 = vector.broadcast %cst_109 : f32 to vector<2x16xf32>
    %445 = arith.subf %444, %437 : vector<2x16xf32>
    %446 = arith.mulf %445, %443 : vector<2x16xf32>
    %447 = arith.mulf %437, %420 : vector<2x16xf32>
    %448 = arith.addf %446, %447 : vector<2x16xf32>
    %cst_110 = arith.constant dense<0.000000e+00> : vector<2x16xf32>
    %449 = tpu.matmul %448, %249, %cst_110 {dimension_numbers = #tpu.dot_dimension_numbers<[1], [0], [0], [1], [0, 0, 1, 1], [], []>} : vector<2x16xf32>, vector<16x16xf32>, vector<2x16xf32> -> vector<2x16xf32>
    %cst_111 = arith.constant dense<0.000000e+00> : vector<2x16xf32>
    %450 = tpu.matmul %448, %250, %cst_111 {dimension_numbers = #tpu.dot_dimension_numbers<[1], [0], [0], [1], [0, 0, 1, 1], [], []>} : vector<2x16xf32>, vector<16x16xf32>, vector<2x16xf32> -> vector<2x16xf32>
    %cst_112 = arith.constant dense<0.000000e+00> : vector<2x16xf32>
    %451 = tpu.matmul %448, %251, %cst_112 {dimension_numbers = #tpu.dot_dimension_numbers<[1], [0], [0], [1], [0, 0, 1, 1], [], []>} : vector<2x16xf32>, vector<16x16xf32>, vector<2x16xf32> -> vector<2x16xf32>
    %452 = vector.extract_strided_slice %246 {offsets = [0, 0], sizes = [2, 16], strides = [1, 1]} : vector<16x16xf32> to vector<2x16xf32>
    %453 = arith.addf %452, %449 : vector<2x16xf32>
    %454 = arith.negf %453 : vector<2x16xf32>
    %455 = math.exp %454 : vector<2x16xf32>
    %cst_113 = arith.constant 1.000000e+00 : f32
    %456 = vector.broadcast %cst_113 : f32 to vector<2x16xf32>
    %457 = arith.addf %456, %455 : vector<2x16xf32>
    %458 = arith.divf %456, %457 : vector<2x16xf32>
    %459 = vector.extract_strided_slice %247 {offsets = [0, 0], sizes = [2, 16], strides = [1, 1]} : vector<16x16xf32> to vector<2x16xf32>
    %460 = arith.addf %459, %450 : vector<2x16xf32>
    %461 = arith.negf %460 : vector<2x16xf32>
    %462 = math.exp %461 : vector<2x16xf32>
    %cst_114 = arith.constant 1.000000e+00 : f32
    %463 = vector.broadcast %cst_114 : f32 to vector<2x16xf32>
    %464 = arith.addf %463, %462 : vector<2x16xf32>
    %465 = arith.divf %463, %464 : vector<2x16xf32>
    %466 = vector.extract_strided_slice %248 {offsets = [0, 0], sizes = [2, 16], strides = [1, 1]} : vector<16x16xf32> to vector<2x16xf32>
    %467 = vector.broadcast %242 : vector<1x16xf32> to vector<2x16xf32>
    %468 = arith.addf %451, %467 : vector<2x16xf32>
    %469 = arith.mulf %458, %468 : vector<2x16xf32>
    %470 = arith.addf %466, %469 : vector<2x16xf32>
    %471 = math.tanh %470 : vector<2x16xf32>
    %cst_115 = arith.constant 1.000000e+00 : f32
    %472 = vector.broadcast %cst_115 : f32 to vector<2x16xf32>
    %473 = arith.subf %472, %465 : vector<2x16xf32>
    %474 = arith.mulf %473, %471 : vector<2x16xf32>
    %475 = arith.mulf %465, %448 : vector<2x16xf32>
    %476 = arith.addf %474, %475 : vector<2x16xf32>
    %477 = tpu.concatenate %42, %476 in 1 : vector<2x16xf32>, vector<2x16xf32> -> vector<2x32xf32>
    %478 = tpu.concatenate %70, %448 in 1 : vector<2x16xf32>, vector<2x16xf32> -> vector<2x32xf32>
    %479 = tpu.concatenate %98, %420 in 1 : vector<2x16xf32>, vector<2x16xf32> -> vector<2x32xf32>
    %480 = tpu.concatenate %126, %392 in 1 : vector<2x16xf32>, vector<2x16xf32> -> vector<2x32xf32>
    %481 = tpu.concatenate %154, %364 in 1 : vector<2x16xf32>, vector<2x16xf32> -> vector<2x32xf32>
    %482 = tpu.concatenate %182, %336 in 1 : vector<2x16xf32>, vector<2x16xf32> -> vector<2x32xf32>
    %483 = tpu.concatenate %210, %308 in 1 : vector<2x16xf32>, vector<2x16xf32> -> vector<2x32xf32>
    %484 = tpu.concatenate %238, %280 in 1 : vector<2x16xf32>, vector<2x16xf32> -> vector<2x32xf32>
    %485 = tpu.concatenate %477, %478, %479, %480, %481, %482, %483, %484 in 0 : vector<2x32xf32>, vector<2x32xf32>, vector<2x32xf32>, vector<2x32xf32>, vector<2x32xf32>, vector<2x32xf32>, vector<2x32xf32>, vector<2x32xf32> -> vector<16x32xf32>
    %c0_116 = arith.constant 0 : index
    %c0_117 = arith.constant 0 : index
    %486 = vector.load %arg9[%c0_116, %c0_117] : memref<32x48xf32, #tpu.memory_space<vmem>>, vector<32x48xf32>
    %c0_118 = arith.constant 0 : index
    %c0_119 = arith.constant 0 : index
    %487 = vector.load %arg10[%c0_118, %c0_119] : memref<16x48xf32, #tpu.memory_space<vmem>>, vector<16x48xf32>
    %c0_120 = arith.constant 0 : index
    %c0_121 = arith.constant 0 : index
    %488 = vector.load %arg11[%c0_120, %c0_121] : memref<1x48xf32, #tpu.memory_space<vmem>>, vector<1x48xf32>
    %c0_122 = arith.constant 0 : index
    %c0_123 = arith.constant 0 : index
    %489 = vector.load %arg12[%c0_122, %c0_123] : memref<1x16xf32, #tpu.memory_space<vmem>>, vector<1x16xf32>
    %cst_124 = arith.constant dense<0.000000e+00> : vector<16x48xf32>
    %490 = tpu.matmul %485, %486, %cst_124 {dimension_numbers = #tpu.dot_dimension_numbers<[1], [0], [0], [1], [0, 0, 1, 1], [], []>} : vector<16x32xf32>, vector<32x48xf32>, vector<16x48xf32> -> vector<16x48xf32>
    %491 = vector.broadcast %488 : vector<1x48xf32> to vector<16x48xf32>
    %492 = arith.addf %490, %491 : vector<16x48xf32>
    %493 = vector.extract_strided_slice %492 {offsets = [0, 0], sizes = [16, 16], strides = [1, 1]} : vector<16x48xf32> to vector<16x16xf32>
    %494 = vector.extract_strided_slice %492 {offsets = [0, 16], sizes = [16, 16], strides = [1, 1]} : vector<16x48xf32> to vector<16x16xf32>
    %495 = vector.extract_strided_slice %492 {offsets = [0, 32], sizes = [16, 16], strides = [1, 1]} : vector<16x48xf32> to vector<16x16xf32>
    %496 = vector.extract_strided_slice %487 {offsets = [0, 0], sizes = [16, 16], strides = [1, 1]} : vector<16x48xf32> to vector<16x16xf32>
    %497 = vector.extract_strided_slice %487 {offsets = [0, 16], sizes = [16, 16], strides = [1, 1]} : vector<16x48xf32> to vector<16x16xf32>
    %498 = vector.extract_strided_slice %487 {offsets = [0, 32], sizes = [16, 16], strides = [1, 1]} : vector<16x48xf32> to vector<16x16xf32>
    %cst_125 = arith.constant 0.000000e+00 : f32
    %499 = vector.broadcast %cst_125 : f32 to vector<2x16xf32>
    %cst_126 = arith.constant dense<0.000000e+00> : vector<2x16xf32>
    %500 = tpu.matmul %499, %496, %cst_126 {dimension_numbers = #tpu.dot_dimension_numbers<[1], [0], [0], [1], [0, 0, 1, 1], [], []>} : vector<2x16xf32>, vector<16x16xf32>, vector<2x16xf32> -> vector<2x16xf32>
    %cst_127 = arith.constant dense<0.000000e+00> : vector<2x16xf32>
    %501 = tpu.matmul %499, %497, %cst_127 {dimension_numbers = #tpu.dot_dimension_numbers<[1], [0], [0], [1], [0, 0, 1, 1], [], []>} : vector<2x16xf32>, vector<16x16xf32>, vector<2x16xf32> -> vector<2x16xf32>
    %cst_128 = arith.constant dense<0.000000e+00> : vector<2x16xf32>
    %502 = tpu.matmul %499, %498, %cst_128 {dimension_numbers = #tpu.dot_dimension_numbers<[1], [0], [0], [1], [0, 0, 1, 1], [], []>} : vector<2x16xf32>, vector<16x16xf32>, vector<2x16xf32> -> vector<2x16xf32>
    %503 = vector.extract_strided_slice %493 {offsets = [0, 0], sizes = [2, 16], strides = [1, 1]} : vector<16x16xf32> to vector<2x16xf32>
    %504 = arith.addf %503, %500 : vector<2x16xf32>
    %505 = arith.negf %504 : vector<2x16xf32>
    %506 = math.exp %505 : vector<2x16xf32>
    %cst_129 = arith.constant 1.000000e+00 : f32
    %507 = vector.broadcast %cst_129 : f32 to vector<2x16xf32>
    %508 = arith.addf %507, %506 : vector<2x16xf32>
    %509 = arith.divf %507, %508 : vector<2x16xf32>
    %510 = vector.extract_strided_slice %494 {offsets = [0, 0], sizes = [2, 16], strides = [1, 1]} : vector<16x16xf32> to vector<2x16xf32>
    %511 = arith.addf %510, %501 : vector<2x16xf32>
    %512 = arith.negf %511 : vector<2x16xf32>
    %513 = math.exp %512 : vector<2x16xf32>
    %cst_130 = arith.constant 1.000000e+00 : f32
    %514 = vector.broadcast %cst_130 : f32 to vector<2x16xf32>
    %515 = arith.addf %514, %513 : vector<2x16xf32>
    %516 = arith.divf %514, %515 : vector<2x16xf32>
    %517 = vector.extract_strided_slice %495 {offsets = [0, 0], sizes = [2, 16], strides = [1, 1]} : vector<16x16xf32> to vector<2x16xf32>
    %518 = vector.broadcast %489 : vector<1x16xf32> to vector<2x16xf32>
    %519 = arith.addf %502, %518 : vector<2x16xf32>
    %520 = arith.mulf %509, %519 : vector<2x16xf32>
    %521 = arith.addf %517, %520 : vector<2x16xf32>
    %522 = math.tanh %521 : vector<2x16xf32>
    %cst_131 = arith.constant 1.000000e+00 : f32
    %523 = vector.broadcast %cst_131 : f32 to vector<2x16xf32>
    %524 = arith.subf %523, %516 : vector<2x16xf32>
    %525 = arith.mulf %524, %522 : vector<2x16xf32>
    %526 = arith.mulf %516, %499 : vector<2x16xf32>
    %527 = arith.addf %525, %526 : vector<2x16xf32>
    %cst_132 = arith.constant dense<0.000000e+00> : vector<2x16xf32>
    %528 = tpu.matmul %527, %496, %cst_132 {dimension_numbers = #tpu.dot_dimension_numbers<[1], [0], [0], [1], [0, 0, 1, 1], [], []>} : vector<2x16xf32>, vector<16x16xf32>, vector<2x16xf32> -> vector<2x16xf32>
    %cst_133 = arith.constant dense<0.000000e+00> : vector<2x16xf32>
    %529 = tpu.matmul %527, %497, %cst_133 {dimension_numbers = #tpu.dot_dimension_numbers<[1], [0], [0], [1], [0, 0, 1, 1], [], []>} : vector<2x16xf32>, vector<16x16xf32>, vector<2x16xf32> -> vector<2x16xf32>
    %cst_134 = arith.constant dense<0.000000e+00> : vector<2x16xf32>
    %530 = tpu.matmul %527, %498, %cst_134 {dimension_numbers = #tpu.dot_dimension_numbers<[1], [0], [0], [1], [0, 0, 1, 1], [], []>} : vector<2x16xf32>, vector<16x16xf32>, vector<2x16xf32> -> vector<2x16xf32>
    %531 = vector.extract_strided_slice %493 {offsets = [2, 0], sizes = [2, 16], strides = [1, 1]} : vector<16x16xf32> to vector<2x16xf32>
    %532 = arith.addf %531, %528 : vector<2x16xf32>
    %533 = arith.negf %532 : vector<2x16xf32>
    %534 = math.exp %533 : vector<2x16xf32>
    %cst_135 = arith.constant 1.000000e+00 : f32
    %535 = vector.broadcast %cst_135 : f32 to vector<2x16xf32>
    %536 = arith.addf %535, %534 : vector<2x16xf32>
    %537 = arith.divf %535, %536 : vector<2x16xf32>
    %538 = vector.extract_strided_slice %494 {offsets = [2, 0], sizes = [2, 16], strides = [1, 1]} : vector<16x16xf32> to vector<2x16xf32>
    %539 = arith.addf %538, %529 : vector<2x16xf32>
    %540 = arith.negf %539 : vector<2x16xf32>
    %541 = math.exp %540 : vector<2x16xf32>
    %cst_136 = arith.constant 1.000000e+00 : f32
    %542 = vector.broadcast %cst_136 : f32 to vector<2x16xf32>
    %543 = arith.addf %542, %541 : vector<2x16xf32>
    %544 = arith.divf %542, %543 : vector<2x16xf32>
    %545 = vector.extract_strided_slice %495 {offsets = [2, 0], sizes = [2, 16], strides = [1, 1]} : vector<16x16xf32> to vector<2x16xf32>
    %546 = vector.broadcast %489 : vector<1x16xf32> to vector<2x16xf32>
    %547 = arith.addf %530, %546 : vector<2x16xf32>
    %548 = arith.mulf %537, %547 : vector<2x16xf32>
    %549 = arith.addf %545, %548 : vector<2x16xf32>
    %550 = math.tanh %549 : vector<2x16xf32>
    %cst_137 = arith.constant 1.000000e+00 : f32
    %551 = vector.broadcast %cst_137 : f32 to vector<2x16xf32>
    %552 = arith.subf %551, %544 : vector<2x16xf32>
    %553 = arith.mulf %552, %550 : vector<2x16xf32>
    %554 = arith.mulf %544, %527 : vector<2x16xf32>
    %555 = arith.addf %553, %554 : vector<2x16xf32>
    %cst_138 = arith.constant dense<0.000000e+00> : vector<2x16xf32>
    %556 = tpu.matmul %555, %496, %cst_138 {dimension_numbers = #tpu.dot_dimension_numbers<[1], [0], [0], [1], [0, 0, 1, 1], [], []>} : vector<2x16xf32>, vector<16x16xf32>, vector<2x16xf32> -> vector<2x16xf32>
    %cst_139 = arith.constant dense<0.000000e+00> : vector<2x16xf32>
    %557 = tpu.matmul %555, %497, %cst_139 {dimension_numbers = #tpu.dot_dimension_numbers<[1], [0], [0], [1], [0, 0, 1, 1], [], []>} : vector<2x16xf32>, vector<16x16xf32>, vector<2x16xf32> -> vector<2x16xf32>
    %cst_140 = arith.constant dense<0.000000e+00> : vector<2x16xf32>
    %558 = tpu.matmul %555, %498, %cst_140 {dimension_numbers = #tpu.dot_dimension_numbers<[1], [0], [0], [1], [0, 0, 1, 1], [], []>} : vector<2x16xf32>, vector<16x16xf32>, vector<2x16xf32> -> vector<2x16xf32>
    %559 = vector.extract_strided_slice %493 {offsets = [4, 0], sizes = [2, 16], strides = [1, 1]} : vector<16x16xf32> to vector<2x16xf32>
    %560 = arith.addf %559, %556 : vector<2x16xf32>
    %561 = arith.negf %560 : vector<2x16xf32>
    %562 = math.exp %561 : vector<2x16xf32>
    %cst_141 = arith.constant 1.000000e+00 : f32
    %563 = vector.broadcast %cst_141 : f32 to vector<2x16xf32>
    %564 = arith.addf %563, %562 : vector<2x16xf32>
    %565 = arith.divf %563, %564 : vector<2x16xf32>
    %566 = vector.extract_strided_slice %494 {offsets = [4, 0], sizes = [2, 16], strides = [1, 1]} : vector<16x16xf32> to vector<2x16xf32>
    %567 = arith.addf %566, %557 : vector<2x16xf32>
    %568 = arith.negf %567 : vector<2x16xf32>
    %569 = math.exp %568 : vector<2x16xf32>
    %cst_142 = arith.constant 1.000000e+00 : f32
    %570 = vector.broadcast %cst_142 : f32 to vector<2x16xf32>
    %571 = arith.addf %570, %569 : vector<2x16xf32>
    %572 = arith.divf %570, %571 : vector<2x16xf32>
    %573 = vector.extract_strided_slice %495 {offsets = [4, 0], sizes = [2, 16], strides = [1, 1]} : vector<16x16xf32> to vector<2x16xf32>
    %574 = vector.broadcast %489 : vector<1x16xf32> to vector<2x16xf32>
    %575 = arith.addf %558, %574 : vector<2x16xf32>
    %576 = arith.mulf %565, %575 : vector<2x16xf32>
    %577 = arith.addf %573, %576 : vector<2x16xf32>
    %578 = math.tanh %577 : vector<2x16xf32>
    %cst_143 = arith.constant 1.000000e+00 : f32
    %579 = vector.broadcast %cst_143 : f32 to vector<2x16xf32>
    %580 = arith.subf %579, %572 : vector<2x16xf32>
    %581 = arith.mulf %580, %578 : vector<2x16xf32>
    %582 = arith.mulf %572, %555 : vector<2x16xf32>
    %583 = arith.addf %581, %582 : vector<2x16xf32>
    %cst_144 = arith.constant dense<0.000000e+00> : vector<2x16xf32>
    %584 = tpu.matmul %583, %496, %cst_144 {dimension_numbers = #tpu.dot_dimension_numbers<[1], [0], [0], [1], [0, 0, 1, 1], [], []>} : vector<2x16xf32>, vector<16x16xf32>, vector<2x16xf32> -> vector<2x16xf32>
    %cst_145 = arith.constant dense<0.000000e+00> : vector<2x16xf32>
    %585 = tpu.matmul %583, %497, %cst_145 {dimension_numbers = #tpu.dot_dimension_numbers<[1], [0], [0], [1], [0, 0, 1, 1], [], []>} : vector<2x16xf32>, vector<16x16xf32>, vector<2x16xf32> -> vector<2x16xf32>
    %cst_146 = arith.constant dense<0.000000e+00> : vector<2x16xf32>
    %586 = tpu.matmul %583, %498, %cst_146 {dimension_numbers = #tpu.dot_dimension_numbers<[1], [0], [0], [1], [0, 0, 1, 1], [], []>} : vector<2x16xf32>, vector<16x16xf32>, vector<2x16xf32> -> vector<2x16xf32>
    %587 = vector.extract_strided_slice %493 {offsets = [6, 0], sizes = [2, 16], strides = [1, 1]} : vector<16x16xf32> to vector<2x16xf32>
    %588 = arith.addf %587, %584 : vector<2x16xf32>
    %589 = arith.negf %588 : vector<2x16xf32>
    %590 = math.exp %589 : vector<2x16xf32>
    %cst_147 = arith.constant 1.000000e+00 : f32
    %591 = vector.broadcast %cst_147 : f32 to vector<2x16xf32>
    %592 = arith.addf %591, %590 : vector<2x16xf32>
    %593 = arith.divf %591, %592 : vector<2x16xf32>
    %594 = vector.extract_strided_slice %494 {offsets = [6, 0], sizes = [2, 16], strides = [1, 1]} : vector<16x16xf32> to vector<2x16xf32>
    %595 = arith.addf %594, %585 : vector<2x16xf32>
    %596 = arith.negf %595 : vector<2x16xf32>
    %597 = math.exp %596 : vector<2x16xf32>
    %cst_148 = arith.constant 1.000000e+00 : f32
    %598 = vector.broadcast %cst_148 : f32 to vector<2x16xf32>
    %599 = arith.addf %598, %597 : vector<2x16xf32>
    %600 = arith.divf %598, %599 : vector<2x16xf32>
    %601 = vector.extract_strided_slice %495 {offsets = [6, 0], sizes = [2, 16], strides = [1, 1]} : vector<16x16xf32> to vector<2x16xf32>
    %602 = vector.broadcast %489 : vector<1x16xf32> to vector<2x16xf32>
    %603 = arith.addf %586, %602 : vector<2x16xf32>
    %604 = arith.mulf %593, %603 : vector<2x16xf32>
    %605 = arith.addf %601, %604 : vector<2x16xf32>
    %606 = math.tanh %605 : vector<2x16xf32>
    %cst_149 = arith.constant 1.000000e+00 : f32
    %607 = vector.broadcast %cst_149 : f32 to vector<2x16xf32>
    %608 = arith.subf %607, %600 : vector<2x16xf32>
    %609 = arith.mulf %608, %606 : vector<2x16xf32>
    %610 = arith.mulf %600, %583 : vector<2x16xf32>
    %611 = arith.addf %609, %610 : vector<2x16xf32>
    %cst_150 = arith.constant dense<0.000000e+00> : vector<2x16xf32>
    %612 = tpu.matmul %611, %496, %cst_150 {dimension_numbers = #tpu.dot_dimension_numbers<[1], [0], [0], [1], [0, 0, 1, 1], [], []>} : vector<2x16xf32>, vector<16x16xf32>, vector<2x16xf32> -> vector<2x16xf32>
    %cst_151 = arith.constant dense<0.000000e+00> : vector<2x16xf32>
    %613 = tpu.matmul %611, %497, %cst_151 {dimension_numbers = #tpu.dot_dimension_numbers<[1], [0], [0], [1], [0, 0, 1, 1], [], []>} : vector<2x16xf32>, vector<16x16xf32>, vector<2x16xf32> -> vector<2x16xf32>
    %cst_152 = arith.constant dense<0.000000e+00> : vector<2x16xf32>
    %614 = tpu.matmul %611, %498, %cst_152 {dimension_numbers = #tpu.dot_dimension_numbers<[1], [0], [0], [1], [0, 0, 1, 1], [], []>} : vector<2x16xf32>, vector<16x16xf32>, vector<2x16xf32> -> vector<2x16xf32>
    %615 = vector.extract_strided_slice %493 {offsets = [8, 0], sizes = [2, 16], strides = [1, 1]} : vector<16x16xf32> to vector<2x16xf32>
    %616 = arith.addf %615, %612 : vector<2x16xf32>
    %617 = arith.negf %616 : vector<2x16xf32>
    %618 = math.exp %617 : vector<2x16xf32>
    %cst_153 = arith.constant 1.000000e+00 : f32
    %619 = vector.broadcast %cst_153 : f32 to vector<2x16xf32>
    %620 = arith.addf %619, %618 : vector<2x16xf32>
    %621 = arith.divf %619, %620 : vector<2x16xf32>
    %622 = vector.extract_strided_slice %494 {offsets = [8, 0], sizes = [2, 16], strides = [1, 1]} : vector<16x16xf32> to vector<2x16xf32>
    %623 = arith.addf %622, %613 : vector<2x16xf32>
    %624 = arith.negf %623 : vector<2x16xf32>
    %625 = math.exp %624 : vector<2x16xf32>
    %cst_154 = arith.constant 1.000000e+00 : f32
    %626 = vector.broadcast %cst_154 : f32 to vector<2x16xf32>
    %627 = arith.addf %626, %625 : vector<2x16xf32>
    %628 = arith.divf %626, %627 : vector<2x16xf32>
    %629 = vector.extract_strided_slice %495 {offsets = [8, 0], sizes = [2, 16], strides = [1, 1]} : vector<16x16xf32> to vector<2x16xf32>
    %630 = vector.broadcast %489 : vector<1x16xf32> to vector<2x16xf32>
    %631 = arith.addf %614, %630 : vector<2x16xf32>
    %632 = arith.mulf %621, %631 : vector<2x16xf32>
    %633 = arith.addf %629, %632 : vector<2x16xf32>
    %634 = math.tanh %633 : vector<2x16xf32>
    %cst_155 = arith.constant 1.000000e+00 : f32
    %635 = vector.broadcast %cst_155 : f32 to vector<2x16xf32>
    %636 = arith.subf %635, %628 : vector<2x16xf32>
    %637 = arith.mulf %636, %634 : vector<2x16xf32>
    %638 = arith.mulf %628, %611 : vector<2x16xf32>
    %639 = arith.addf %637, %638 : vector<2x16xf32>
    %cst_156 = arith.constant dense<0.000000e+00> : vector<2x16xf32>
    %640 = tpu.matmul %639, %496, %cst_156 {dimension_numbers = #tpu.dot_dimension_numbers<[1], [0], [0], [1], [0, 0, 1, 1], [], []>} : vector<2x16xf32>, vector<16x16xf32>, vector<2x16xf32> -> vector<2x16xf32>
    %cst_157 = arith.constant dense<0.000000e+00> : vector<2x16xf32>
    %641 = tpu.matmul %639, %497, %cst_157 {dimension_numbers = #tpu.dot_dimension_numbers<[1], [0], [0], [1], [0, 0, 1, 1], [], []>} : vector<2x16xf32>, vector<16x16xf32>, vector<2x16xf32> -> vector<2x16xf32>
    %cst_158 = arith.constant dense<0.000000e+00> : vector<2x16xf32>
    %642 = tpu.matmul %639, %498, %cst_158 {dimension_numbers = #tpu.dot_dimension_numbers<[1], [0], [0], [1], [0, 0, 1, 1], [], []>} : vector<2x16xf32>, vector<16x16xf32>, vector<2x16xf32> -> vector<2x16xf32>
    %643 = vector.extract_strided_slice %493 {offsets = [10, 0], sizes = [2, 16], strides = [1, 1]} : vector<16x16xf32> to vector<2x16xf32>
    %644 = arith.addf %643, %640 : vector<2x16xf32>
    %645 = arith.negf %644 : vector<2x16xf32>
    %646 = math.exp %645 : vector<2x16xf32>
    %cst_159 = arith.constant 1.000000e+00 : f32
    %647 = vector.broadcast %cst_159 : f32 to vector<2x16xf32>
    %648 = arith.addf %647, %646 : vector<2x16xf32>
    %649 = arith.divf %647, %648 : vector<2x16xf32>
    %650 = vector.extract_strided_slice %494 {offsets = [10, 0], sizes = [2, 16], strides = [1, 1]} : vector<16x16xf32> to vector<2x16xf32>
    %651 = arith.addf %650, %641 : vector<2x16xf32>
    %652 = arith.negf %651 : vector<2x16xf32>
    %653 = math.exp %652 : vector<2x16xf32>
    %cst_160 = arith.constant 1.000000e+00 : f32
    %654 = vector.broadcast %cst_160 : f32 to vector<2x16xf32>
    %655 = arith.addf %654, %653 : vector<2x16xf32>
    %656 = arith.divf %654, %655 : vector<2x16xf32>
    %657 = vector.extract_strided_slice %495 {offsets = [10, 0], sizes = [2, 16], strides = [1, 1]} : vector<16x16xf32> to vector<2x16xf32>
    %658 = vector.broadcast %489 : vector<1x16xf32> to vector<2x16xf32>
    %659 = arith.addf %642, %658 : vector<2x16xf32>
    %660 = arith.mulf %649, %659 : vector<2x16xf32>
    %661 = arith.addf %657, %660 : vector<2x16xf32>
    %662 = math.tanh %661 : vector<2x16xf32>
    %cst_161 = arith.constant 1.000000e+00 : f32
    %663 = vector.broadcast %cst_161 : f32 to vector<2x16xf32>
    %664 = arith.subf %663, %656 : vector<2x16xf32>
    %665 = arith.mulf %664, %662 : vector<2x16xf32>
    %666 = arith.mulf %656, %639 : vector<2x16xf32>
    %667 = arith.addf %665, %666 : vector<2x16xf32>
    %cst_162 = arith.constant dense<0.000000e+00> : vector<2x16xf32>
    %668 = tpu.matmul %667, %496, %cst_162 {dimension_numbers = #tpu.dot_dimension_numbers<[1], [0], [0], [1], [0, 0, 1, 1], [], []>} : vector<2x16xf32>, vector<16x16xf32>, vector<2x16xf32> -> vector<2x16xf32>
    %cst_163 = arith.constant dense<0.000000e+00> : vector<2x16xf32>
    %669 = tpu.matmul %667, %497, %cst_163 {dimension_numbers = #tpu.dot_dimension_numbers<[1], [0], [0], [1], [0, 0, 1, 1], [], []>} : vector<2x16xf32>, vector<16x16xf32>, vector<2x16xf32> -> vector<2x16xf32>
    %cst_164 = arith.constant dense<0.000000e+00> : vector<2x16xf32>
    %670 = tpu.matmul %667, %498, %cst_164 {dimension_numbers = #tpu.dot_dimension_numbers<[1], [0], [0], [1], [0, 0, 1, 1], [], []>} : vector<2x16xf32>, vector<16x16xf32>, vector<2x16xf32> -> vector<2x16xf32>
    %671 = vector.extract_strided_slice %493 {offsets = [12, 0], sizes = [2, 16], strides = [1, 1]} : vector<16x16xf32> to vector<2x16xf32>
    %672 = arith.addf %671, %668 : vector<2x16xf32>
    %673 = arith.negf %672 : vector<2x16xf32>
    %674 = math.exp %673 : vector<2x16xf32>
    %cst_165 = arith.constant 1.000000e+00 : f32
    %675 = vector.broadcast %cst_165 : f32 to vector<2x16xf32>
    %676 = arith.addf %675, %674 : vector<2x16xf32>
    %677 = arith.divf %675, %676 : vector<2x16xf32>
    %678 = vector.extract_strided_slice %494 {offsets = [12, 0], sizes = [2, 16], strides = [1, 1]} : vector<16x16xf32> to vector<2x16xf32>
    %679 = arith.addf %678, %669 : vector<2x16xf32>
    %680 = arith.negf %679 : vector<2x16xf32>
    %681 = math.exp %680 : vector<2x16xf32>
    %cst_166 = arith.constant 1.000000e+00 : f32
    %682 = vector.broadcast %cst_166 : f32 to vector<2x16xf32>
    %683 = arith.addf %682, %681 : vector<2x16xf32>
    %684 = arith.divf %682, %683 : vector<2x16xf32>
    %685 = vector.extract_strided_slice %495 {offsets = [12, 0], sizes = [2, 16], strides = [1, 1]} : vector<16x16xf32> to vector<2x16xf32>
    %686 = vector.broadcast %489 : vector<1x16xf32> to vector<2x16xf32>
    %687 = arith.addf %670, %686 : vector<2x16xf32>
    %688 = arith.mulf %677, %687 : vector<2x16xf32>
    %689 = arith.addf %685, %688 : vector<2x16xf32>
    %690 = math.tanh %689 : vector<2x16xf32>
    %cst_167 = arith.constant 1.000000e+00 : f32
    %691 = vector.broadcast %cst_167 : f32 to vector<2x16xf32>
    %692 = arith.subf %691, %684 : vector<2x16xf32>
    %693 = arith.mulf %692, %690 : vector<2x16xf32>
    %694 = arith.mulf %684, %667 : vector<2x16xf32>
    %695 = arith.addf %693, %694 : vector<2x16xf32>
    %cst_168 = arith.constant dense<0.000000e+00> : vector<2x16xf32>
    %696 = tpu.matmul %695, %496, %cst_168 {dimension_numbers = #tpu.dot_dimension_numbers<[1], [0], [0], [1], [0, 0, 1, 1], [], []>} : vector<2x16xf32>, vector<16x16xf32>, vector<2x16xf32> -> vector<2x16xf32>
    %cst_169 = arith.constant dense<0.000000e+00> : vector<2x16xf32>
    %697 = tpu.matmul %695, %497, %cst_169 {dimension_numbers = #tpu.dot_dimension_numbers<[1], [0], [0], [1], [0, 0, 1, 1], [], []>} : vector<2x16xf32>, vector<16x16xf32>, vector<2x16xf32> -> vector<2x16xf32>
    %cst_170 = arith.constant dense<0.000000e+00> : vector<2x16xf32>
    %698 = tpu.matmul %695, %498, %cst_170 {dimension_numbers = #tpu.dot_dimension_numbers<[1], [0], [0], [1], [0, 0, 1, 1], [], []>} : vector<2x16xf32>, vector<16x16xf32>, vector<2x16xf32> -> vector<2x16xf32>
    %699 = vector.extract_strided_slice %493 {offsets = [14, 0], sizes = [2, 16], strides = [1, 1]} : vector<16x16xf32> to vector<2x16xf32>
    %700 = arith.addf %699, %696 : vector<2x16xf32>
    %701 = arith.negf %700 : vector<2x16xf32>
    %702 = math.exp %701 : vector<2x16xf32>
    %cst_171 = arith.constant 1.000000e+00 : f32
    %703 = vector.broadcast %cst_171 : f32 to vector<2x16xf32>
    %704 = arith.addf %703, %702 : vector<2x16xf32>
    %705 = arith.divf %703, %704 : vector<2x16xf32>
    %706 = vector.extract_strided_slice %494 {offsets = [14, 0], sizes = [2, 16], strides = [1, 1]} : vector<16x16xf32> to vector<2x16xf32>
    %707 = arith.addf %706, %697 : vector<2x16xf32>
    %708 = arith.negf %707 : vector<2x16xf32>
    %709 = math.exp %708 : vector<2x16xf32>
    %cst_172 = arith.constant 1.000000e+00 : f32
    %710 = vector.broadcast %cst_172 : f32 to vector<2x16xf32>
    %711 = arith.addf %710, %709 : vector<2x16xf32>
    %712 = arith.divf %710, %711 : vector<2x16xf32>
    %713 = vector.extract_strided_slice %495 {offsets = [14, 0], sizes = [2, 16], strides = [1, 1]} : vector<16x16xf32> to vector<2x16xf32>
    %714 = vector.broadcast %489 : vector<1x16xf32> to vector<2x16xf32>
    %715 = arith.addf %698, %714 : vector<2x16xf32>
    %716 = arith.mulf %705, %715 : vector<2x16xf32>
    %717 = arith.addf %713, %716 : vector<2x16xf32>
    %718 = math.tanh %717 : vector<2x16xf32>
    %cst_173 = arith.constant 1.000000e+00 : f32
    %719 = vector.broadcast %cst_173 : f32 to vector<2x16xf32>
    %720 = arith.subf %719, %712 : vector<2x16xf32>
    %721 = arith.mulf %720, %718 : vector<2x16xf32>
    %722 = arith.mulf %712, %695 : vector<2x16xf32>
    %723 = arith.addf %721, %722 : vector<2x16xf32>
    %c0_174 = arith.constant 0 : index
    %c0_175 = arith.constant 0 : index
    %724 = vector.load %arg13[%c0_174, %c0_175] : memref<32x48xf32, #tpu.memory_space<vmem>>, vector<32x48xf32>
    %c0_176 = arith.constant 0 : index
    %c0_177 = arith.constant 0 : index
    %725 = vector.load %arg14[%c0_176, %c0_177] : memref<16x48xf32, #tpu.memory_space<vmem>>, vector<16x48xf32>
    %c0_178 = arith.constant 0 : index
    %c0_179 = arith.constant 0 : index
    %726 = vector.load %arg15[%c0_178, %c0_179] : memref<1x48xf32, #tpu.memory_space<vmem>>, vector<1x48xf32>
    %c0_180 = arith.constant 0 : index
    %c0_181 = arith.constant 0 : index
    %727 = vector.load %arg16[%c0_180, %c0_181] : memref<1x16xf32, #tpu.memory_space<vmem>>, vector<1x16xf32>
    %cst_182 = arith.constant dense<0.000000e+00> : vector<16x48xf32>
    %728 = tpu.matmul %485, %724, %cst_182 {dimension_numbers = #tpu.dot_dimension_numbers<[1], [0], [0], [1], [0, 0, 1, 1], [], []>} : vector<16x32xf32>, vector<32x48xf32>, vector<16x48xf32> -> vector<16x48xf32>
    %729 = vector.broadcast %726 : vector<1x48xf32> to vector<16x48xf32>
    %730 = arith.addf %728, %729 : vector<16x48xf32>
    %731 = vector.extract_strided_slice %730 {offsets = [0, 0], sizes = [16, 16], strides = [1, 1]} : vector<16x48xf32> to vector<16x16xf32>
    %732 = vector.extract_strided_slice %730 {offsets = [0, 16], sizes = [16, 16], strides = [1, 1]} : vector<16x48xf32> to vector<16x16xf32>
    %733 = vector.extract_strided_slice %730 {offsets = [0, 32], sizes = [16, 16], strides = [1, 1]} : vector<16x48xf32> to vector<16x16xf32>
    %734 = vector.extract_strided_slice %725 {offsets = [0, 0], sizes = [16, 16], strides = [1, 1]} : vector<16x48xf32> to vector<16x16xf32>
    %735 = vector.extract_strided_slice %725 {offsets = [0, 16], sizes = [16, 16], strides = [1, 1]} : vector<16x48xf32> to vector<16x16xf32>
    %736 = vector.extract_strided_slice %725 {offsets = [0, 32], sizes = [16, 16], strides = [1, 1]} : vector<16x48xf32> to vector<16x16xf32>
    %cst_183 = arith.constant 0.000000e+00 : f32
    %737 = vector.broadcast %cst_183 : f32 to vector<2x16xf32>
    %cst_184 = arith.constant dense<0.000000e+00> : vector<2x16xf32>
    %738 = tpu.matmul %737, %734, %cst_184 {dimension_numbers = #tpu.dot_dimension_numbers<[1], [0], [0], [1], [0, 0, 1, 1], [], []>} : vector<2x16xf32>, vector<16x16xf32>, vector<2x16xf32> -> vector<2x16xf32>
    %cst_185 = arith.constant dense<0.000000e+00> : vector<2x16xf32>
    %739 = tpu.matmul %737, %735, %cst_185 {dimension_numbers = #tpu.dot_dimension_numbers<[1], [0], [0], [1], [0, 0, 1, 1], [], []>} : vector<2x16xf32>, vector<16x16xf32>, vector<2x16xf32> -> vector<2x16xf32>
    %cst_186 = arith.constant dense<0.000000e+00> : vector<2x16xf32>
    %740 = tpu.matmul %737, %736, %cst_186 {dimension_numbers = #tpu.dot_dimension_numbers<[1], [0], [0], [1], [0, 0, 1, 1], [], []>} : vector<2x16xf32>, vector<16x16xf32>, vector<2x16xf32> -> vector<2x16xf32>
    %741 = vector.extract_strided_slice %731 {offsets = [14, 0], sizes = [2, 16], strides = [1, 1]} : vector<16x16xf32> to vector<2x16xf32>
    %742 = arith.addf %741, %738 : vector<2x16xf32>
    %743 = arith.negf %742 : vector<2x16xf32>
    %744 = math.exp %743 : vector<2x16xf32>
    %cst_187 = arith.constant 1.000000e+00 : f32
    %745 = vector.broadcast %cst_187 : f32 to vector<2x16xf32>
    %746 = arith.addf %745, %744 : vector<2x16xf32>
    %747 = arith.divf %745, %746 : vector<2x16xf32>
    %748 = vector.extract_strided_slice %732 {offsets = [14, 0], sizes = [2, 16], strides = [1, 1]} : vector<16x16xf32> to vector<2x16xf32>
    %749 = arith.addf %748, %739 : vector<2x16xf32>
    %750 = arith.negf %749 : vector<2x16xf32>
    %751 = math.exp %750 : vector<2x16xf32>
    %cst_188 = arith.constant 1.000000e+00 : f32
    %752 = vector.broadcast %cst_188 : f32 to vector<2x16xf32>
    %753 = arith.addf %752, %751 : vector<2x16xf32>
    %754 = arith.divf %752, %753 : vector<2x16xf32>
    %755 = vector.extract_strided_slice %733 {offsets = [14, 0], sizes = [2, 16], strides = [1, 1]} : vector<16x16xf32> to vector<2x16xf32>
    %756 = vector.broadcast %727 : vector<1x16xf32> to vector<2x16xf32>
    %757 = arith.addf %740, %756 : vector<2x16xf32>
    %758 = arith.mulf %747, %757 : vector<2x16xf32>
    %759 = arith.addf %755, %758 : vector<2x16xf32>
    %760 = math.tanh %759 : vector<2x16xf32>
    %cst_189 = arith.constant 1.000000e+00 : f32
    %761 = vector.broadcast %cst_189 : f32 to vector<2x16xf32>
    %762 = arith.subf %761, %754 : vector<2x16xf32>
    %763 = arith.mulf %762, %760 : vector<2x16xf32>
    %764 = arith.mulf %754, %737 : vector<2x16xf32>
    %765 = arith.addf %763, %764 : vector<2x16xf32>
    %cst_190 = arith.constant dense<0.000000e+00> : vector<2x16xf32>
    %766 = tpu.matmul %765, %734, %cst_190 {dimension_numbers = #tpu.dot_dimension_numbers<[1], [0], [0], [1], [0, 0, 1, 1], [], []>} : vector<2x16xf32>, vector<16x16xf32>, vector<2x16xf32> -> vector<2x16xf32>
    %cst_191 = arith.constant dense<0.000000e+00> : vector<2x16xf32>
    %767 = tpu.matmul %765, %735, %cst_191 {dimension_numbers = #tpu.dot_dimension_numbers<[1], [0], [0], [1], [0, 0, 1, 1], [], []>} : vector<2x16xf32>, vector<16x16xf32>, vector<2x16xf32> -> vector<2x16xf32>
    %cst_192 = arith.constant dense<0.000000e+00> : vector<2x16xf32>
    %768 = tpu.matmul %765, %736, %cst_192 {dimension_numbers = #tpu.dot_dimension_numbers<[1], [0], [0], [1], [0, 0, 1, 1], [], []>} : vector<2x16xf32>, vector<16x16xf32>, vector<2x16xf32> -> vector<2x16xf32>
    %769 = vector.extract_strided_slice %731 {offsets = [12, 0], sizes = [2, 16], strides = [1, 1]} : vector<16x16xf32> to vector<2x16xf32>
    %770 = arith.addf %769, %766 : vector<2x16xf32>
    %771 = arith.negf %770 : vector<2x16xf32>
    %772 = math.exp %771 : vector<2x16xf32>
    %cst_193 = arith.constant 1.000000e+00 : f32
    %773 = vector.broadcast %cst_193 : f32 to vector<2x16xf32>
    %774 = arith.addf %773, %772 : vector<2x16xf32>
    %775 = arith.divf %773, %774 : vector<2x16xf32>
    %776 = vector.extract_strided_slice %732 {offsets = [12, 0], sizes = [2, 16], strides = [1, 1]} : vector<16x16xf32> to vector<2x16xf32>
    %777 = arith.addf %776, %767 : vector<2x16xf32>
    %778 = arith.negf %777 : vector<2x16xf32>
    %779 = math.exp %778 : vector<2x16xf32>
    %cst_194 = arith.constant 1.000000e+00 : f32
    %780 = vector.broadcast %cst_194 : f32 to vector<2x16xf32>
    %781 = arith.addf %780, %779 : vector<2x16xf32>
    %782 = arith.divf %780, %781 : vector<2x16xf32>
    %783 = vector.extract_strided_slice %733 {offsets = [12, 0], sizes = [2, 16], strides = [1, 1]} : vector<16x16xf32> to vector<2x16xf32>
    %784 = vector.broadcast %727 : vector<1x16xf32> to vector<2x16xf32>
    %785 = arith.addf %768, %784 : vector<2x16xf32>
    %786 = arith.mulf %775, %785 : vector<2x16xf32>
    %787 = arith.addf %783, %786 : vector<2x16xf32>
    %788 = math.tanh %787 : vector<2x16xf32>
    %cst_195 = arith.constant 1.000000e+00 : f32
    %789 = vector.broadcast %cst_195 : f32 to vector<2x16xf32>
    %790 = arith.subf %789, %782 : vector<2x16xf32>
    %791 = arith.mulf %790, %788 : vector<2x16xf32>
    %792 = arith.mulf %782, %765 : vector<2x16xf32>
    %793 = arith.addf %791, %792 : vector<2x16xf32>
    %cst_196 = arith.constant dense<0.000000e+00> : vector<2x16xf32>
    %794 = tpu.matmul %793, %734, %cst_196 {dimension_numbers = #tpu.dot_dimension_numbers<[1], [0], [0], [1], [0, 0, 1, 1], [], []>} : vector<2x16xf32>, vector<16x16xf32>, vector<2x16xf32> -> vector<2x16xf32>
    %cst_197 = arith.constant dense<0.000000e+00> : vector<2x16xf32>
    %795 = tpu.matmul %793, %735, %cst_197 {dimension_numbers = #tpu.dot_dimension_numbers<[1], [0], [0], [1], [0, 0, 1, 1], [], []>} : vector<2x16xf32>, vector<16x16xf32>, vector<2x16xf32> -> vector<2x16xf32>
    %cst_198 = arith.constant dense<0.000000e+00> : vector<2x16xf32>
    %796 = tpu.matmul %793, %736, %cst_198 {dimension_numbers = #tpu.dot_dimension_numbers<[1], [0], [0], [1], [0, 0, 1, 1], [], []>} : vector<2x16xf32>, vector<16x16xf32>, vector<2x16xf32> -> vector<2x16xf32>
    %797 = vector.extract_strided_slice %731 {offsets = [10, 0], sizes = [2, 16], strides = [1, 1]} : vector<16x16xf32> to vector<2x16xf32>
    %798 = arith.addf %797, %794 : vector<2x16xf32>
    %799 = arith.negf %798 : vector<2x16xf32>
    %800 = math.exp %799 : vector<2x16xf32>
    %cst_199 = arith.constant 1.000000e+00 : f32
    %801 = vector.broadcast %cst_199 : f32 to vector<2x16xf32>
    %802 = arith.addf %801, %800 : vector<2x16xf32>
    %803 = arith.divf %801, %802 : vector<2x16xf32>
    %804 = vector.extract_strided_slice %732 {offsets = [10, 0], sizes = [2, 16], strides = [1, 1]} : vector<16x16xf32> to vector<2x16xf32>
    %805 = arith.addf %804, %795 : vector<2x16xf32>
    %806 = arith.negf %805 : vector<2x16xf32>
    %807 = math.exp %806 : vector<2x16xf32>
    %cst_200 = arith.constant 1.000000e+00 : f32
    %808 = vector.broadcast %cst_200 : f32 to vector<2x16xf32>
    %809 = arith.addf %808, %807 : vector<2x16xf32>
    %810 = arith.divf %808, %809 : vector<2x16xf32>
    %811 = vector.extract_strided_slice %733 {offsets = [10, 0], sizes = [2, 16], strides = [1, 1]} : vector<16x16xf32> to vector<2x16xf32>
    %812 = vector.broadcast %727 : vector<1x16xf32> to vector<2x16xf32>
    %813 = arith.addf %796, %812 : vector<2x16xf32>
    %814 = arith.mulf %803, %813 : vector<2x16xf32>
    %815 = arith.addf %811, %814 : vector<2x16xf32>
    %816 = math.tanh %815 : vector<2x16xf32>
    %cst_201 = arith.constant 1.000000e+00 : f32
    %817 = vector.broadcast %cst_201 : f32 to vector<2x16xf32>
    %818 = arith.subf %817, %810 : vector<2x16xf32>
    %819 = arith.mulf %818, %816 : vector<2x16xf32>
    %820 = arith.mulf %810, %793 : vector<2x16xf32>
    %821 = arith.addf %819, %820 : vector<2x16xf32>
    %cst_202 = arith.constant dense<0.000000e+00> : vector<2x16xf32>
    %822 = tpu.matmul %821, %734, %cst_202 {dimension_numbers = #tpu.dot_dimension_numbers<[1], [0], [0], [1], [0, 0, 1, 1], [], []>} : vector<2x16xf32>, vector<16x16xf32>, vector<2x16xf32> -> vector<2x16xf32>
    %cst_203 = arith.constant dense<0.000000e+00> : vector<2x16xf32>
    %823 = tpu.matmul %821, %735, %cst_203 {dimension_numbers = #tpu.dot_dimension_numbers<[1], [0], [0], [1], [0, 0, 1, 1], [], []>} : vector<2x16xf32>, vector<16x16xf32>, vector<2x16xf32> -> vector<2x16xf32>
    %cst_204 = arith.constant dense<0.000000e+00> : vector<2x16xf32>
    %824 = tpu.matmul %821, %736, %cst_204 {dimension_numbers = #tpu.dot_dimension_numbers<[1], [0], [0], [1], [0, 0, 1, 1], [], []>} : vector<2x16xf32>, vector<16x16xf32>, vector<2x16xf32> -> vector<2x16xf32>
    %825 = vector.extract_strided_slice %731 {offsets = [8, 0], sizes = [2, 16], strides = [1, 1]} : vector<16x16xf32> to vector<2x16xf32>
    %826 = arith.addf %825, %822 : vector<2x16xf32>
    %827 = arith.negf %826 : vector<2x16xf32>
    %828 = math.exp %827 : vector<2x16xf32>
    %cst_205 = arith.constant 1.000000e+00 : f32
    %829 = vector.broadcast %cst_205 : f32 to vector<2x16xf32>
    %830 = arith.addf %829, %828 : vector<2x16xf32>
    %831 = arith.divf %829, %830 : vector<2x16xf32>
    %832 = vector.extract_strided_slice %732 {offsets = [8, 0], sizes = [2, 16], strides = [1, 1]} : vector<16x16xf32> to vector<2x16xf32>
    %833 = arith.addf %832, %823 : vector<2x16xf32>
    %834 = arith.negf %833 : vector<2x16xf32>
    %835 = math.exp %834 : vector<2x16xf32>
    %cst_206 = arith.constant 1.000000e+00 : f32
    %836 = vector.broadcast %cst_206 : f32 to vector<2x16xf32>
    %837 = arith.addf %836, %835 : vector<2x16xf32>
    %838 = arith.divf %836, %837 : vector<2x16xf32>
    %839 = vector.extract_strided_slice %733 {offsets = [8, 0], sizes = [2, 16], strides = [1, 1]} : vector<16x16xf32> to vector<2x16xf32>
    %840 = vector.broadcast %727 : vector<1x16xf32> to vector<2x16xf32>
    %841 = arith.addf %824, %840 : vector<2x16xf32>
    %842 = arith.mulf %831, %841 : vector<2x16xf32>
    %843 = arith.addf %839, %842 : vector<2x16xf32>
    %844 = math.tanh %843 : vector<2x16xf32>
    %cst_207 = arith.constant 1.000000e+00 : f32
    %845 = vector.broadcast %cst_207 : f32 to vector<2x16xf32>
    %846 = arith.subf %845, %838 : vector<2x16xf32>
    %847 = arith.mulf %846, %844 : vector<2x16xf32>
    %848 = arith.mulf %838, %821 : vector<2x16xf32>
    %849 = arith.addf %847, %848 : vector<2x16xf32>
    %cst_208 = arith.constant dense<0.000000e+00> : vector<2x16xf32>
    %850 = tpu.matmul %849, %734, %cst_208 {dimension_numbers = #tpu.dot_dimension_numbers<[1], [0], [0], [1], [0, 0, 1, 1], [], []>} : vector<2x16xf32>, vector<16x16xf32>, vector<2x16xf32> -> vector<2x16xf32>
    %cst_209 = arith.constant dense<0.000000e+00> : vector<2x16xf32>
    %851 = tpu.matmul %849, %735, %cst_209 {dimension_numbers = #tpu.dot_dimension_numbers<[1], [0], [0], [1], [0, 0, 1, 1], [], []>} : vector<2x16xf32>, vector<16x16xf32>, vector<2x16xf32> -> vector<2x16xf32>
    %cst_210 = arith.constant dense<0.000000e+00> : vector<2x16xf32>
    %852 = tpu.matmul %849, %736, %cst_210 {dimension_numbers = #tpu.dot_dimension_numbers<[1], [0], [0], [1], [0, 0, 1, 1], [], []>} : vector<2x16xf32>, vector<16x16xf32>, vector<2x16xf32> -> vector<2x16xf32>
    %853 = vector.extract_strided_slice %731 {offsets = [6, 0], sizes = [2, 16], strides = [1, 1]} : vector<16x16xf32> to vector<2x16xf32>
    %854 = arith.addf %853, %850 : vector<2x16xf32>
    %855 = arith.negf %854 : vector<2x16xf32>
    %856 = math.exp %855 : vector<2x16xf32>
    %cst_211 = arith.constant 1.000000e+00 : f32
    %857 = vector.broadcast %cst_211 : f32 to vector<2x16xf32>
    %858 = arith.addf %857, %856 : vector<2x16xf32>
    %859 = arith.divf %857, %858 : vector<2x16xf32>
    %860 = vector.extract_strided_slice %732 {offsets = [6, 0], sizes = [2, 16], strides = [1, 1]} : vector<16x16xf32> to vector<2x16xf32>
    %861 = arith.addf %860, %851 : vector<2x16xf32>
    %862 = arith.negf %861 : vector<2x16xf32>
    %863 = math.exp %862 : vector<2x16xf32>
    %cst_212 = arith.constant 1.000000e+00 : f32
    %864 = vector.broadcast %cst_212 : f32 to vector<2x16xf32>
    %865 = arith.addf %864, %863 : vector<2x16xf32>
    %866 = arith.divf %864, %865 : vector<2x16xf32>
    %867 = vector.extract_strided_slice %733 {offsets = [6, 0], sizes = [2, 16], strides = [1, 1]} : vector<16x16xf32> to vector<2x16xf32>
    %868 = vector.broadcast %727 : vector<1x16xf32> to vector<2x16xf32>
    %869 = arith.addf %852, %868 : vector<2x16xf32>
    %870 = arith.mulf %859, %869 : vector<2x16xf32>
    %871 = arith.addf %867, %870 : vector<2x16xf32>
    %872 = math.tanh %871 : vector<2x16xf32>
    %cst_213 = arith.constant 1.000000e+00 : f32
    %873 = vector.broadcast %cst_213 : f32 to vector<2x16xf32>
    %874 = arith.subf %873, %866 : vector<2x16xf32>
    %875 = arith.mulf %874, %872 : vector<2x16xf32>
    %876 = arith.mulf %866, %849 : vector<2x16xf32>
    %877 = arith.addf %875, %876 : vector<2x16xf32>
    %cst_214 = arith.constant dense<0.000000e+00> : vector<2x16xf32>
    %878 = tpu.matmul %877, %734, %cst_214 {dimension_numbers = #tpu.dot_dimension_numbers<[1], [0], [0], [1], [0, 0, 1, 1], [], []>} : vector<2x16xf32>, vector<16x16xf32>, vector<2x16xf32> -> vector<2x16xf32>
    %cst_215 = arith.constant dense<0.000000e+00> : vector<2x16xf32>
    %879 = tpu.matmul %877, %735, %cst_215 {dimension_numbers = #tpu.dot_dimension_numbers<[1], [0], [0], [1], [0, 0, 1, 1], [], []>} : vector<2x16xf32>, vector<16x16xf32>, vector<2x16xf32> -> vector<2x16xf32>
    %cst_216 = arith.constant dense<0.000000e+00> : vector<2x16xf32>
    %880 = tpu.matmul %877, %736, %cst_216 {dimension_numbers = #tpu.dot_dimension_numbers<[1], [0], [0], [1], [0, 0, 1, 1], [], []>} : vector<2x16xf32>, vector<16x16xf32>, vector<2x16xf32> -> vector<2x16xf32>
    %881 = vector.extract_strided_slice %731 {offsets = [4, 0], sizes = [2, 16], strides = [1, 1]} : vector<16x16xf32> to vector<2x16xf32>
    %882 = arith.addf %881, %878 : vector<2x16xf32>
    %883 = arith.negf %882 : vector<2x16xf32>
    %884 = math.exp %883 : vector<2x16xf32>
    %cst_217 = arith.constant 1.000000e+00 : f32
    %885 = vector.broadcast %cst_217 : f32 to vector<2x16xf32>
    %886 = arith.addf %885, %884 : vector<2x16xf32>
    %887 = arith.divf %885, %886 : vector<2x16xf32>
    %888 = vector.extract_strided_slice %732 {offsets = [4, 0], sizes = [2, 16], strides = [1, 1]} : vector<16x16xf32> to vector<2x16xf32>
    %889 = arith.addf %888, %879 : vector<2x16xf32>
    %890 = arith.negf %889 : vector<2x16xf32>
    %891 = math.exp %890 : vector<2x16xf32>
    %cst_218 = arith.constant 1.000000e+00 : f32
    %892 = vector.broadcast %cst_218 : f32 to vector<2x16xf32>
    %893 = arith.addf %892, %891 : vector<2x16xf32>
    %894 = arith.divf %892, %893 : vector<2x16xf32>
    %895 = vector.extract_strided_slice %733 {offsets = [4, 0], sizes = [2, 16], strides = [1, 1]} : vector<16x16xf32> to vector<2x16xf32>
    %896 = vector.broadcast %727 : vector<1x16xf32> to vector<2x16xf32>
    %897 = arith.addf %880, %896 : vector<2x16xf32>
    %898 = arith.mulf %887, %897 : vector<2x16xf32>
    %899 = arith.addf %895, %898 : vector<2x16xf32>
    %900 = math.tanh %899 : vector<2x16xf32>
    %cst_219 = arith.constant 1.000000e+00 : f32
    %901 = vector.broadcast %cst_219 : f32 to vector<2x16xf32>
    %902 = arith.subf %901, %894 : vector<2x16xf32>
    %903 = arith.mulf %902, %900 : vector<2x16xf32>
    %904 = arith.mulf %894, %877 : vector<2x16xf32>
    %905 = arith.addf %903, %904 : vector<2x16xf32>
    %cst_220 = arith.constant dense<0.000000e+00> : vector<2x16xf32>
    %906 = tpu.matmul %905, %734, %cst_220 {dimension_numbers = #tpu.dot_dimension_numbers<[1], [0], [0], [1], [0, 0, 1, 1], [], []>} : vector<2x16xf32>, vector<16x16xf32>, vector<2x16xf32> -> vector<2x16xf32>
    %cst_221 = arith.constant dense<0.000000e+00> : vector<2x16xf32>
    %907 = tpu.matmul %905, %735, %cst_221 {dimension_numbers = #tpu.dot_dimension_numbers<[1], [0], [0], [1], [0, 0, 1, 1], [], []>} : vector<2x16xf32>, vector<16x16xf32>, vector<2x16xf32> -> vector<2x16xf32>
    %cst_222 = arith.constant dense<0.000000e+00> : vector<2x16xf32>
    %908 = tpu.matmul %905, %736, %cst_222 {dimension_numbers = #tpu.dot_dimension_numbers<[1], [0], [0], [1], [0, 0, 1, 1], [], []>} : vector<2x16xf32>, vector<16x16xf32>, vector<2x16xf32> -> vector<2x16xf32>
    %909 = vector.extract_strided_slice %731 {offsets = [2, 0], sizes = [2, 16], strides = [1, 1]} : vector<16x16xf32> to vector<2x16xf32>
    %910 = arith.addf %909, %906 : vector<2x16xf32>
    %911 = arith.negf %910 : vector<2x16xf32>
    %912 = math.exp %911 : vector<2x16xf32>
    %cst_223 = arith.constant 1.000000e+00 : f32
    %913 = vector.broadcast %cst_223 : f32 to vector<2x16xf32>
    %914 = arith.addf %913, %912 : vector<2x16xf32>
    %915 = arith.divf %913, %914 : vector<2x16xf32>
    %916 = vector.extract_strided_slice %732 {offsets = [2, 0], sizes = [2, 16], strides = [1, 1]} : vector<16x16xf32> to vector<2x16xf32>
    %917 = arith.addf %916, %907 : vector<2x16xf32>
    %918 = arith.negf %917 : vector<2x16xf32>
    %919 = math.exp %918 : vector<2x16xf32>
    %cst_224 = arith.constant 1.000000e+00 : f32
    %920 = vector.broadcast %cst_224 : f32 to vector<2x16xf32>
    %921 = arith.addf %920, %919 : vector<2x16xf32>
    %922 = arith.divf %920, %921 : vector<2x16xf32>
    %923 = vector.extract_strided_slice %733 {offsets = [2, 0], sizes = [2, 16], strides = [1, 1]} : vector<16x16xf32> to vector<2x16xf32>
    %924 = vector.broadcast %727 : vector<1x16xf32> to vector<2x16xf32>
    %925 = arith.addf %908, %924 : vector<2x16xf32>
    %926 = arith.mulf %915, %925 : vector<2x16xf32>
    %927 = arith.addf %923, %926 : vector<2x16xf32>
    %928 = math.tanh %927 : vector<2x16xf32>
    %cst_225 = arith.constant 1.000000e+00 : f32
    %929 = vector.broadcast %cst_225 : f32 to vector<2x16xf32>
    %930 = arith.subf %929, %922 : vector<2x16xf32>
    %931 = arith.mulf %930, %928 : vector<2x16xf32>
    %932 = arith.mulf %922, %905 : vector<2x16xf32>
    %933 = arith.addf %931, %932 : vector<2x16xf32>
    %cst_226 = arith.constant dense<0.000000e+00> : vector<2x16xf32>
    %934 = tpu.matmul %933, %734, %cst_226 {dimension_numbers = #tpu.dot_dimension_numbers<[1], [0], [0], [1], [0, 0, 1, 1], [], []>} : vector<2x16xf32>, vector<16x16xf32>, vector<2x16xf32> -> vector<2x16xf32>
    %cst_227 = arith.constant dense<0.000000e+00> : vector<2x16xf32>
    %935 = tpu.matmul %933, %735, %cst_227 {dimension_numbers = #tpu.dot_dimension_numbers<[1], [0], [0], [1], [0, 0, 1, 1], [], []>} : vector<2x16xf32>, vector<16x16xf32>, vector<2x16xf32> -> vector<2x16xf32>
    %cst_228 = arith.constant dense<0.000000e+00> : vector<2x16xf32>
    %936 = tpu.matmul %933, %736, %cst_228 {dimension_numbers = #tpu.dot_dimension_numbers<[1], [0], [0], [1], [0, 0, 1, 1], [], []>} : vector<2x16xf32>, vector<16x16xf32>, vector<2x16xf32> -> vector<2x16xf32>
    %937 = vector.extract_strided_slice %731 {offsets = [0, 0], sizes = [2, 16], strides = [1, 1]} : vector<16x16xf32> to vector<2x16xf32>
    %938 = arith.addf %937, %934 : vector<2x16xf32>
    %939 = arith.negf %938 : vector<2x16xf32>
    %940 = math.exp %939 : vector<2x16xf32>
    %cst_229 = arith.constant 1.000000e+00 : f32
    %941 = vector.broadcast %cst_229 : f32 to vector<2x16xf32>
    %942 = arith.addf %941, %940 : vector<2x16xf32>
    %943 = arith.divf %941, %942 : vector<2x16xf32>
    %944 = vector.extract_strided_slice %732 {offsets = [0, 0], sizes = [2, 16], strides = [1, 1]} : vector<16x16xf32> to vector<2x16xf32>
    %945 = arith.addf %944, %935 : vector<2x16xf32>
    %946 = arith.negf %945 : vector<2x16xf32>
    %947 = math.exp %946 : vector<2x16xf32>
    %cst_230 = arith.constant 1.000000e+00 : f32
    %948 = vector.broadcast %cst_230 : f32 to vector<2x16xf32>
    %949 = arith.addf %948, %947 : vector<2x16xf32>
    %950 = arith.divf %948, %949 : vector<2x16xf32>
    %951 = vector.extract_strided_slice %733 {offsets = [0, 0], sizes = [2, 16], strides = [1, 1]} : vector<16x16xf32> to vector<2x16xf32>
    %952 = vector.broadcast %727 : vector<1x16xf32> to vector<2x16xf32>
    %953 = arith.addf %936, %952 : vector<2x16xf32>
    %954 = arith.mulf %943, %953 : vector<2x16xf32>
    %955 = arith.addf %951, %954 : vector<2x16xf32>
    %956 = math.tanh %955 : vector<2x16xf32>
    %cst_231 = arith.constant 1.000000e+00 : f32
    %957 = vector.broadcast %cst_231 : f32 to vector<2x16xf32>
    %958 = arith.subf %957, %950 : vector<2x16xf32>
    %959 = arith.mulf %958, %956 : vector<2x16xf32>
    %960 = arith.mulf %950, %933 : vector<2x16xf32>
    %961 = arith.addf %959, %960 : vector<2x16xf32>
    %962 = tpu.concatenate %723, %961 in 1 : vector<2x16xf32>, vector<2x16xf32> -> vector<2x32xf32>
    %c0_232 = arith.constant 0 : index
    %c0_233 = arith.constant 0 : index
    %963 = vector.load %arg17[%c0_232, %c0_233] : memref<32x2xf32, #tpu.memory_space<vmem>>, vector<32x2xf32>
    %cst_234 = arith.constant dense<0.000000e+00> : vector<2x2xf32>
    %964 = tpu.matmul %962, %963, %cst_234 {dimension_numbers = #tpu.dot_dimension_numbers<[1], [0], [0], [1], [0, 0, 1, 1], [], []>} : vector<2x32xf32>, vector<32x2xf32>, vector<2x2xf32> -> vector<2x2xf32>
    %c0_235 = arith.constant 0 : index
    %c0_236 = arith.constant 0 : index
    %965 = vector.load %arg18[%c0_235, %c0_236] : memref<1x2xf32, #tpu.memory_space<vmem>>, vector<1x2xf32>
    %966 = vector.broadcast %965 : vector<1x2xf32> to vector<2x2xf32>
    %967 = arith.addf %964, %966 : vector<2x2xf32>
    %c0_237 = arith.constant 0 : index
    %c0_238 = arith.constant 0 : index
    %968 = vector.load %arg19[%c0_237, %c0_238] : memref<2x2xf32, #tpu.memory_space<vmem>>, vector<2x2xf32>
    tpu.vector_store %arg19[%c0_237, %c0_238], %967 {strides = array<i32>} : memref<2x2xf32, #tpu.memory_space<vmem>>, vector<2x2xf32>,
    return
  }
}

</mosaic_0001>

<bundles_post_ra>
// kernel: _lambda_.1
= control target key start
LH: loop header
LB: loop body
LE: loop exit
PB: predicated region body
PF: predicated region fallthrough
CT: control target
= control target key end

     0   :  { %s11966_s0 = inlined_call_operand.vmem [shape: f32[16,32], index: 0, kind: input, shape index: {}]   ;;  %s11967_s1 = inlined_call_operand.vmem [shape: f32[32,48], index: 1, kind: input, shape index: {}]   ;;  %s11968_s2 = inlined_call_operand.hbm [shape: f32[16,48], index: 2, kind: input, shape index: {}]   ;;  %s11969_s3 = inlined_call_operand.vmem [shape: f32[1,48], index: 3, kind: input, shape index: {}]   ;;  %s11970_s4 = inlined_call_operand.vmem [shape: f32[1,16], index: 4, kind: input, shape index: {}]   ;;  %s11971_s5 = inlined_call_operand.vmem [shape: f32[32,48], index: 5, kind: input, shape index: {}]   ;;  %s11972_s6 = inlined_call_operand.vmem [shape: f32[16,48], index: 6, kind: input, shape index: {}]   ;;  %s11973_s7 = inlined_call_operand.vmem [shape: f32[1,48], index: 7, kind: input, shape index: {}]   ;;  %s11974_s8 = inlined_call_operand.vmem [shape: f32[1,16], index: 8, kind: input, shape index: {}]   ;;  %s11975_s9 = inlined_call_operand.vmem [shape: f32[32,48], index: 9, kind: input, shape index: {}]   ;;  %s11976_s10 = inlined_call_operand.vmem [shape: f32[16,48], index: 10, kind: input, shape index: {}]   ;;  %s11977_s11 = inlined_call_operand.vmem [shape: f32[1,48], index: 11, kind: input, shape index: {}]   ;;  %s11978_s12 = inlined_call_operand.vmem [shape: f32[1,16], index: 12, kind: input, shape index: {}]   ;;  %s11979_s13 = inlined_call_operand.vmem [shape: f32[32,48], index: 13, kind: input, shape index: {}]   ;;  %s11980_s14 = inlined_call_operand.vmem [shape: f32[16,48], index: 14, kind: input, shape index: {}]   ;;  %s11981_s15 = inlined_call_operand.vmem [shape: f32[1,48], index: 15, kind: input, shape index: {}]   ;;  %s11982_s16 = inlined_call_operand.vmem [shape: f32[1,16], index: 16, kind: input, shape index: {}]   ;;  %s11983_s17 = inlined_call_operand.vmem [shape: f32[32,2], index: 17, kind: input, shape index: {}]   ;;  %s11984_s18 = inlined_call_operand.vmem [shape: f32[1,2], index: 18, kind: input, shape index: {}]   ;;  %s11985_s19 = inlined_call_operand.hbm [shape: f32[2,2], index: 19, kind: output, shape index: {}]  }
   0x1   :  { %11989 = sst [smem:[#allocation8_spill]] %s11966_s0 }
   0x2   :  { %11990 = sst [smem:[#allocation9_spill]] %s11967_s1 }
   0x3   :  { %11991 = sst [smem:[#allocation10_spill]] %s11968_s2 }
   0x4   :  { %11992 = sst [smem:[#allocation11_spill]] %s11969_s3 }
   0x5   :  { %24 = vsyncpa [#allocation3], 0 }
   0x6   :  { %25 = vsyncpa [#allocation4], 0  ;;  %s10791_s0 = smov [#allocation2]   ;;  %s11993_s1 = sld [smem:[#allocation10_spill]] }
   0x7   :  { %s35_s30 = sshll.u32 %s10791_s0, 4  ;;  %s36_s30 = int_to_ptr.vmem [resolvable:$true] %s35_s30 }
   0xc   :  { %s10743_s22 = scalar_lea.hbm %s11993_s1, 256 }
   0xd   :  { %p10744_p0 = scmp.ne.s32.totalorder %s11993_s1, %s10743_s22  ;;  %p10747_p1 = scmp.lt.u32.totalorder %s10743_s22, %s11993_s1 }
   0xf   :  { %p10749_p2 = pnand %p10747_p1, %p10744_p0 }
  0x11   :  { %10752 = shalt.err (!%p10749_p2)
}
  0x12   :  { %s10753_s3 = scalar_lea.vmem %s36_s30, 256  ;;  %p10758_p4 = scmp.lt.s32.totalorder %s36_s30, %s36_s30 }
  0x13   :  { %p10754_p3 = scmp.ne.s32.totalorder %s36_s30, %s10753_s3  ;;  %p10759_p5 = scmp.lt.s32.totalorder %s10753_s3, %s10753_s3 }
  0x15   :  { %p10760_p6 = por %p10759_p5, %p10758_p4 }
  0x17   :  { %p10761_p7 = pnand %p10760_p6, %p10754_p3 }
  0x19   :  { %10764 = shalt.err (!%p10761_p7)
}
  0x1a   :  { %s10792_s26 = smov 128   ;;  %s10793_s27 = smov 8  }
  0x1b   :  { %41 = dma.hbm_to_vmem [thread:$0]  %s11993_s1, 256, %s36_s30, [#allocation3], %s10792_s26, %s10792_s26, %s10793_s27  }
  0x1c   :  { %10787 = dma.done.wait [#allocation3], 256  }
  0x1d   :  { %10788 = vsyncadd [#allocation3], 4294967040  ;;  %v10794_v0 = vmov 0.0|0.0   ;;  %vm10795_vm0 = vmmov 0   ;;  %v10796_v1 = vmov 0.0   ;;  %v83_v2 = vld [vmem:[#allocation2] sm:$0xff] }
  0x1e   :  { %10054 = vmatprep.subr.bf16.mxu1 %v10794_v0  ;;  %9334 = vmatprep.mubr.msk.f32.mxu1 %vm10795_vm0, %v10796_v1  ;;  %v84_v3 = vld [vmem:[#allocation2 + $0x8] sm:$0xff]  ;;  %s11994_s21 = sld [smem:[#allocation9_spill]]  ;;  %vm93_vm1 = vcmask 261120   ;;  %s11995_s26 = sld [smem:[#allocation8_spill]]  ;;  %v10984_v35 = vld [vmem:[%s11970_s4] ss:$0 sm:$0xff] }
  0x1f   :  { %v10383_v5 = vpack.i.bf16 %v84_v3, %v83_v2  ;;  %v10920_v6 = vpack.c.bf16 %v84_v3, %v83_v2  ;;  %s10797_s27 = smov 112   ;;  %s10798_s28 = smov 96   ;;  %vm175_vm2 = vcmask 130048   ;;  %vm4415_vm3 = vcmask 1041408  }
  0x20   :  { %s11996_s30 = sld [smem:[#allocation11_spill]]  ;;  %s10799_s2 = smov 32   ;;  %vm4419_vm4 = vcmask 1045504   ;;  %vm4417_vm5 = vcmask 1043456   ;;  %vm8819_vm6 = vcmask 9216  }
  0x21   :  { %10384 = vrot.lane.b32.xlu0 %v10383_v5, %s10797_s27  ;;  %10056 = vmatpush3.bf16.msra.mxu1 %v10920_v6  ;;  %s10800_s23 = smov 16   ;;  %s10801_s1 = smov [#allocation5]  }
  0x22   :  { %10057 = vmatprep.subr.bf16.mxu1 %v10794_v0 }
  0x24   :  { %v79_v4 = vld [vmem:[%s11994_s21] sm:$0xff]  ;;  %v80_v7 = vld [vmem:[%s11994_s21 + $0x8] sm:$0xff]  ;;  %v81_v8 = vld [vmem:[%s11994_s21 + $0x10] sm:$0xff]  ;;  %9335 = vmatmul.mubr.f32.vlgmr.msra.gmra.mrb[0].mxu1 %v10796_v1 }
  0x25   :  { %v82_v9 = vld [vmem:[%s11994_s21 + $0x18] sm:$0xff]  ;;  %v10046_v10 = vpack.c.bf16 %v80_v7, %v79_v4  ;;  %v10934_v12 = vld [vmem:[%s11995_s26] sm:$0xff]  ;;  %10389 = vrot.lane.b32.xlu0 %v10383_v5, %s10798_s28  ;;  %9341 = vmatprep.mubr.msk.f32.mxu1 %vm10795_vm0, %v10796_v1  ;;  %v10948_v13 = vld [vmem:[%s11995_s26 + $0x8] sm:$0xff] }
  0x26   :  { %v10050_v11 = vpack.c.bf16 %v82_v9, %v81_v8  ;;  %9327 = vmatprep.mubr.msk.f32.mxu0 %vm93_vm1, %v10934_v12  ;;  %v8836_v24 = vld [vmem:[%s11996_s30] ss:$0 sm:$0xff] }
  0x27   :  { %10047 = vmatprep.subr.bf16.mxu0 %v10046_v10 }
  0x28   :  { %10049 = vmatpush3.bf16.msra.mxu0 %v10046_v10 }
  0x29   :  { %10051 = vmatprep.subr.bf16.mxu0 %v10050_v11 }
  0x2c   :  { %10053 = vmatpush3.bf16.msra.mxu0 %v10050_v11 }
  0x2d   :  { %10066 = vmatprep.subr.bf16.mxu0 %v10794_v0 }
  0x2f   :  { %9328 = vmatmul.mubr.msk.f32.vlgmr.msra.gmra.mrb[0].mxu0 %vm93_vm1, %v10948_v13 }
  0x30   :  { %9362 = vmatprep.mubr.msk.f32.mxu0 %vm10795_vm0, %v10796_v1 }
  0x93   :  { %v10385_v14 = vpop.permute.xlu0 %10384 }
  0x94   :  { %v10387_v15 = vunpack.i.h.bf16 %v10385_v14  ;;  %v10386_v16 = vunpack.i.l.bf16 %v10385_v14 }
  0x96   :  { %v10955_v17 = vpack.c.bf16 %v10387_v15, %v10386_v16 }
  0x97   :  { %v10390_v18 = vpop.permute.xlu0 %10389 }
  0x98   :  { %v10392_v19 = vunpack.i.h.bf16 %v10390_v18  ;;  %v10391_v20 = vunpack.i.l.bf16 %v10390_v18  ;;  %10059 = vmatpush3.bf16.msra.mxu1 %v10955_v17  ;;  %10068 = vmatpush3.bf16.msra.mxu0 %v10955_v17 }
  0x99   :  { %10060 = vmatprep.subr.bf16.mxu1 %v10794_v0  ;;  %10072 = vmatprep.subr.bf16.mxu0 %v10794_v0 }
  0x9a   :  { %v10961_v21 = vpack.c.bf16 %v10392_v19, %v10391_v20 }
  0x9b   :  { %9342 = vmatmul.mubr.f32.vlgmr.msra.gmra.mrb[2].mxu1 %v10796_v1 }
  0x9c   :  { %10062 = vmatpush3.bf16.msra.mxu1 %v10961_v21  ;;  %9348 = vmatprep.mubr.msk.f32.mxu1 %vm10795_vm0, %v10796_v1 }
  0x9d   :  { %10063 = vmatprep.subr.bf16.mxu1 %v10794_v0 }
  0x9f   :  { %9349 = vmatmul.mubr.f32.vlgmr.msra.gmra.mrb[4].mxu1 %v10796_v1 }
  0xa0   :  { %10065 = vmatpush3.bf16.msra.mxu1 %v10920_v6  ;;  %9355 = vmatprep.mubr.msk.f32.mxu1 %vm10795_vm0, %v10796_v1 }
  0xa1   :  { %10069 = vmatprep.subr.bf16.mxu1 %v10794_v0 }
  0xf7   :  { %v245_v22 = vpop.f32.mrb[0].mxu1 }
  0xf8   :  { %v9336_v23 = vpop.f32.mrb[1].mxu1 }
 0x102   :  { %v9329_v25 = vpop.f32.mrb[0].mxu0 }
 0x103   :  { %v10976_v26 = vadd.f32 %v9329_v25, %v8836_v24  ;;  %v166_v27 = vpop.f32.mrb[1].mxu0 }
 0x104   :  { %v10978_v28 = vadd.f32 %v8836_v24, %v166_v27 }
 0x106   :  { %v327_v29 = vadd.f32 %v245_v22, %v10978_v28 }
 0x108   :  { %v8839_v30 = vmul.f32 -1.442695, %v327_v29 }
 0x10a   :  { %10423 = vpow2.f32 %v8839_v30 }
 0x114   :  { %v10424_v31 = vpop.eup %10423 }
 0x115   :  { %v331_v32 = vadd.f32 1.0, %v10424_v31 }
 0x117   :  { %10425 = vrcp.f32 %v331_v32 }
 0x121   :  { %v10426_v36 = vpop.eup %10425 }
 0x16e   :  { %v323_v33 = vpop.f32.mrb[2].mxu1 }
 0x16f   :  { %v9343_v34 = vpop.f32.mrb[3].mxu1 }
 0x172   :  { %v423_v37 = vpop.f32.mrb[4].mxu1 }
 0x173   :  { %v424_v38 = vadd.f32 %v10984_v35, %v423_v37  ;;  %v9350_v39 = vpop.f32.mrb[5].mxu1 }
 0x175   :  { %v427_v40 = vmul.f32 %v10426_v36, %v424_v38 }
 0x177   :  { %429 = vrot.lane.b32.xlu1 %v427_v40, %s10799_s2 }
 0x17b   :  { %335 = vrot.lane.b32.xlu1 %v323_v33, %s10800_s23 }
 0x1e9   :  { %v430_v41 = vpop.permute.xlu1 %429 }
 0x1ea   :  { %v432_v42 = vadd.f32 %v430_v41, %v10978_v28 }
 0x1ec   :  { %10427 = vtanh.f32 %v432_v42 }
 0x1ed   :  { %v336_v44 = vpop.permute.xlu1 %335 }
 0x1ee   :  { %v338_v45 = vadd.f32 %v336_v44, %v10978_v28 }
 0x1f0   :  { %v8840_v46 = vmul.f32 -1.442695, %v338_v45 }
 0x1f2   :  { %10429 = vpow2.f32 %v8840_v46 }
 0x1f6   :  { %v10428_v43 = vpop.eup %10427 }
 0x1f7   :  { %436 = vrot.lane.b32.xlu0 %v10428_v43, %s10797_s27 }
 0x1fc   :  { %v10430_v47 = vpop.eup %10429 }
 0x1fd   :  { %v342_v48 = vadd.f32 1.0, %v10430_v47 }
 0x1ff   :  { %10431 = vrcp.f32 %v342_v48 }
 0x209   :  { %v10432_v49 = vpop.eup %10431 }
 0x20a   :  { %v434_v50 = vsub.f32 1.0, %v10432_v49  ;;  %v440_v53 = vmul.f32 0.0, %v10432_v49 }
 0x269   :  { %v437_v51 = vpop.permute.xlu0 %436 }
 0x26a   :  { %v439_v52 = vmul.f32 %v437_v51, %v434_v50 }
 0x26c   :  { %v441_v54 = vadd.f32 %v440_v53, %v439_v52 }
 0x26e   :  { %443 = vrot.lane.b32.xlu1 %v441_v54, %s10797_s27  ;;  %v695_v24 = vrot.slane %v441_v54, 6 }
 0x2e0   :  { %v10993_v55 = vpop.permute.xlu1 %443 }
 0x2e1   :  { %9356 = vmatmul.mubr.msk.f32.vlgmr.msra.gmra.mrb[6].mxu1 %vm175_vm2, %v10993_v55  ;;  %9363 = vmatmul.mubr.msk.f32.vlgmr.msra.gmra.mrb[2].mxu0 %vm175_vm2, %v10993_v55 }
 0x2e2   :  { %10071 = vmatpush3.bf16.msra.mxu1 %v10961_v21  ;;  %9369 = vmatprep.mubr.msk.f32.mxu1 %vm10795_vm0, %v10796_v1 }
 0x2e3   :  { %10075 = vmatprep.subr.bf16.mxu1 %v10794_v0  ;;  %10074 = vmatpush3.bf16.msra.mxu0 %v10920_v6 }
 0x2e4   :  { %9376 = vmatprep.mubr.msk.f32.mxu0 %vm10795_vm0, %v10796_v1  ;;  %10078 = vmatprep.subr.bf16.mxu0 %v10794_v0 }
 0x2e5   :  { %9370 = vmatmul.mubr.msk.f32.vlgmr.msra.gmra.mrb[8].mxu1 %vm175_vm2, %v10993_v55 }
 0x2e6   :  { %10077 = vmatpush3.bf16.msra.mxu1 %v10955_v17  ;;  %9383 = vmatprep.mubr.msk.f32.mxu1 %vm10795_vm0, %v10796_v1 }
 0x2e7   :  { %10081 = vmatprep.subr.bf16.mxu1 %v10794_v0 }
 0x3b4   :  { %v513_v56 = vpop.f32.mrb[6].mxu1  ;;  %v583_v57 = vpop.f32.mrb[2].mxu0 }
 0x3b5   :  { %v588_v58 = vrot.slane %v513_v56, 6  ;;  %v598_v59 = vrot.slane %v583_v57, 6  ;;  %v9357_v60 = vpop.f32.mrb[7].mxu1  ;;  %v9364_v61 = vpop.f32.mrb[3].mxu0 }
 0x3b7   :  { %v590_v62 = vadd.f32 %v588_v58, %v10978_v28  ;;  %599 = vrot.lane.b32.xlu1 %v598_v59, %s10800_s23 }
 0x3b8   :  { %v675_v63 = vpop.f32.mrb[8].mxu1 }
 0x3b9   :  { %v8844_v2 = vmul.f32 -1.442695, %v590_v62  ;;  %v9371_v3 = vpop.f32.mrb[9].mxu1  ;;  %v676_v7 = vadd.f32 %v10984_v35, %v675_v63 }
 0x3bb   :  { %10433 = vpow2.f32 %v8844_v2  ;;  %v680_v8 = vrot.slane %v676_v7, 6 }
 0x3c5   :  { %v10434_v4 = vpop.eup %10433 }
 0x3c6   :  { %v594_v5 = vadd.f32 1.0, %v10434_v4 }
 0x3c8   :  { %10435 = vrcp.f32 %v594_v5 }
 0x3d2   :  { %v10436_v9 = vpop.eup %10435 }
 0x3d3   :  { %v682_v10 = vmul.f32 %v10436_v9, %v680_v8 }
 0x3d5   :  { %684 = vrot.lane.b32.xlu0 %v682_v10, %s10799_s2 }
 0x429   :  { %v600_v16 = vpop.permute.xlu1 %599 }
 0x42a   :  { %v602_v18 = vadd.f32 %v600_v16, %v10978_v28 }
 0x42c   :  { %v8845_v19 = vmul.f32 -1.442695, %v602_v18 }
 0x447   :  { %v685_v11 = vpop.permute.xlu0 %684 }
 0x448   :  { %v687_v14 = vadd.f32 %v685_v11, %v10978_v28 }
 0x44a   :  { %10437 = vtanh.f32 %v687_v14 }
 0x44b   :  { %10439 = vpow2.f32 %v8845_v19 }
 0x454   :  { %v10438_v15 = vpop.eup %10437 }
 0x455   :  { %691 = vrot.lane.b32.xlu0 %v10438_v15, %s10797_s27  ;;  %v10440_v20 = vpop.eup %10439 }
 0x456   :  { %v606_v22 = vadd.f32 1.0, %v10440_v20 }
 0x458   :  { %10441 = vrcp.f32 %v606_v22 }
 0x462   :  { %v10442_v23 = vpop.eup %10441 }
 0x463   :  { %v689_v25 = vsub.f32 1.0, %v10442_v23  ;;  %v697_v30 = vmul.f32 %v10442_v23, %v695_v24 }
 0x4c7   :  { %v692_v27 = vpop.permute.xlu0 %691 }
 0x4c8   :  { %v694_v29 = vmul.f32 %v692_v27, %v689_v25 }
 0x4ca   :  { %v11020_v31 = vadd.f32 %v697_v30, %v694_v29 }
 0x4cc   :  { %v700_v32 = vrot.slane %v11020_v31, 2  ;;  %v953_v62 = vrot.slane %v11020_v31, 6 }
 0x4ce   :  { %701 = vrot.lane.b32.xlu1 %v700_v32, %s10797_s27 }
 0x540   :  { %v702_v33 = vpop.permute.xlu1 %701 }
 0x541   :  { %9377 = vmatmul.mubr.msk.f32.vlgmr.msra.gmra.mrb[4].mxu0 %vm175_vm2, %v702_v33  ;;  %9384 = vmatmul.mubr.msk.f32.vlgmr.msra.gmra.mrb[10].mxu1 %vm175_vm2, %v702_v33 }
 0x542   :  { %10080 = vmatpush3.bf16.msra.mxu0 %v10961_v21  ;;  %9390 = vmatprep.mubr.msk.f32.mxu0 %vm10795_vm0, %v10796_v1 }
 0x543   :  { %10084 = vmatprep.subr.bf16.mxu0 %v10794_v0  ;;  %10083 = vmatpush3.bf16.msra.mxu1 %v10920_v6 }
 0x544   :  { %9397 = vmatprep.mubr.msk.f32.mxu1 %vm10795_vm0, %v10796_v1  ;;  %10087 = vmatprep.subr.bf16.mxu1 %v10794_v0 }
 0x545   :  { %9391 = vmatmul.mubr.msk.f32.vlgmr.msra.gmra.mrb[6].mxu0 %vm175_vm2, %v702_v33 }
 0x546   :  { %10086 = vmatpush3.bf16.msra.mxu0 %v10955_v17  ;;  %9404 = vmatprep.mubr.msk.f32.mxu0 %vm10795_vm0, %v10796_v1 }
 0x547   :  { %10090 = vmatprep.subr.bf16.mxu0 %v10794_v0 }
 0x614   :  { %v771_v34 = vpop.f32.mrb[4].mxu0  ;;  %v841_v36 = vpop.f32.mrb[10].mxu1 }
 0x615   :  { %v846_v37 = vrot.slane %v771_v34, 4  ;;  %v856_v38 = vrot.slane %v841_v36, 4  ;;  %v9378_v39 = vpop.f32.mrb[5].mxu0  ;;  %v9385_v40 = vpop.f32.mrb[11].mxu1 }
 0x617   :  { %v848_v41 = vadd.f32 %v846_v37, %v10978_v28  ;;  %857 = vrot.lane.b32.xlu1 %v856_v38, %s10800_s23 }
 0x618   :  { %v933_v42 = vpop.f32.mrb[6].mxu0 }
 0x619   :  { %v8849_v43 = vmul.f32 -1.442695, %v848_v41  ;;  %v9392_v44 = vpop.f32.mrb[7].mxu0  ;;  %v934_v47 = vadd.f32 %v10984_v35, %v933_v42 }
 0x61b   :  { %10443 = vpow2.f32 %v8849_v43  ;;  %v938_v48 = vrot.slane %v934_v47, 4 }
 0x625   :  { %v10444_v45 = vpop.eup %10443 }
 0x626   :  { %v852_v46 = vadd.f32 1.0, %v10444_v45 }
 0x628   :  { %10445 = vrcp.f32 %v852_v46 }
 0x632   :  { %v10446_v49 = vpop.eup %10445 }
 0x633   :  { %v940_v50 = vmul.f32 %v10446_v49, %v938_v48 }
 0x635   :  { %942 = vrot.lane.b32.xlu0 %v940_v50, %s10799_s2 }
 0x689   :  { %v858_v54 = vpop.permute.xlu1 %857 }
 0x68a   :  { %v860_v56 = vadd.f32 %v858_v54, %v10978_v28 }
 0x68c   :  { %v8850_v57 = vmul.f32 -1.442695, %v860_v56 }
 0x6a7   :  { %v943_v51 = vpop.permute.xlu0 %942 }
 0x6a8   :  { %v945_v52 = vadd.f32 %v943_v51, %v10978_v28 }
 0x6aa   :  { %10447 = vtanh.f32 %v945_v52 }
 0x6ab   :  { %10449 = vpow2.f32 %v8850_v57 }
 0x6b4   :  { %v10448_v53 = vpop.eup %10447 }
 0x6b5   :  { %949 = vrot.lane.b32.xlu0 %v10448_v53, %s10797_s27  ;;  %v10450_v58 = vpop.eup %10449 }
 0x6b6   :  { %v864_v59 = vadd.f32 1.0, %v10450_v58 }
 0x6b8   :  { %10451 = vrcp.f32 %v864_v59 }
 0x6c2   :  { %v10452_v60 = vpop.eup %10451 }
 0x6c3   :  { %v947_v61 = vsub.f32 1.0, %v10452_v60  ;;  %v955_v2 = vmul.f32 %v10452_v60, %v953_v62 }
 0x727   :  { %v950_v63 = vpop.permute.xlu0 %949 }
 0x728   :  { %v952_v3 = vmul.f32 %v950_v63, %v947_v61 }
 0x72a   :  { %v11047_v4 = vadd.f32 %v955_v2, %v952_v3 }
 0x72c   :  { %v958_v5 = vrot.slane %v11047_v4, 4  ;;  %v1211_v41 = vrot.slane %v11047_v4, 6 }
 0x72e   :  { %959 = vrot.lane.b32.xlu1 %v958_v5, %s10797_s27 }
 0x7a0   :  { %v960_v7 = vpop.permute.xlu1 %959 }
 0x7a1   :  { %9398 = vmatmul.mubr.msk.f32.vlgmr.msra.gmra.mrb[12].mxu1 %vm175_vm2, %v960_v7  ;;  %9405 = vmatmul.mubr.msk.f32.vlgmr.msra.gmra.mrb[8].mxu0 %vm175_vm2, %v960_v7 }
 0x7a2   :  { %10089 = vmatpush3.bf16.msra.mxu1 %v10961_v21  ;;  %9411 = vmatprep.mubr.msk.f32.mxu1 %vm10795_vm0, %v10796_v1 }
 0x7a3   :  { %10093 = vmatprep.subr.bf16.mxu1 %v10794_v0  ;;  %10092 = vmatpush3.bf16.msra.mxu0 %v10920_v6 }
 0x7a4   :  { %9418 = vmatprep.mubr.msk.f32.mxu0 %vm10795_vm0, %v10796_v1  ;;  %10096 = vmatprep.subr.bf16.mxu0 %v10794_v0 }
 0x7a5   :  { %9412 = vmatmul.mubr.msk.f32.vlgmr.msra.gmra.mrb[14].mxu1 %vm175_vm2, %v960_v7 }
 0x7a6   :  { %10095 = vmatpush3.bf16.msra.mxu1 %v10955_v17  ;;  %9425 = vmatprep.mubr.msk.f32.mxu1 %vm10795_vm0, %v10796_v1 }
 0x7a7   :  { %10099 = vmatprep.subr.bf16.mxu1 %v10794_v0 }
 0x874   :  { %v1029_v8 = vpop.f32.mrb[12].mxu1  ;;  %v1099_v9 = vpop.f32.mrb[8].mxu0 }
 0x875   :  { %v1104_v10 = vrot.slane %v1029_v8, 2  ;;  %v1114_v11 = vrot.slane %v1099_v9, 2  ;;  %v9399_v14 = vpop.f32.mrb[13].mxu1  ;;  %v9406_v15 = vpop.f32.mrb[9].mxu0 }
 0x877   :  { %v1106_v16 = vadd.f32 %v1104_v10, %v10978_v28  ;;  %1115 = vrot.lane.b32.xlu1 %v1114_v11, %s10800_s23 }
 0x878   :  { %v1191_v18 = vpop.f32.mrb[14].mxu1 }
 0x879   :  { %v8854_v19 = vmul.f32 -1.442695, %v1106_v16  ;;  %v9413_v20 = vpop.f32.mrb[15].mxu1  ;;  %v1192_v24 = vadd.f32 %v10984_v35, %v1191_v18 }
 0x87b   :  { %10453 = vpow2.f32 %v8854_v19  ;;  %v1196_v25 = vrot.slane %v1192_v24, 2 }
 0x885   :  { %v10454_v22 = vpop.eup %10453 }
 0x886   :  { %v1110_v23 = vadd.f32 1.0, %v10454_v22 }
 0x888   :  { %10455 = vrcp.f32 %v1110_v23 }
 0x892   :  { %v10456_v27 = vpop.eup %10455 }
 0x893   :  { %v1198_v29 = vmul.f32 %v10456_v27, %v1196_v25 }
 0x895   :  { %1200 = vrot.lane.b32.xlu0 %v1198_v29, %s10799_s2 }
 0x8e9   :  { %v1116_v34 = vpop.permute.xlu1 %1115 }
 0x8ea   :  { %v1118_v36 = vadd.f32 %v1116_v34, %v10978_v28 }
 0x8ec   :  { %v8855_v37 = vmul.f32 -1.442695, %v1118_v36 }
 0x907   :  { %v1201_v30 = vpop.permute.xlu0 %1200 }
 0x908   :  { %v1203_v32 = vadd.f32 %v1201_v30, %v10978_v28 }
 0x90a   :  { %10457 = vtanh.f32 %v1203_v32 }
 0x90b   :  { %10459 = vpow2.f32 %v8855_v37 }
 0x914   :  { %v10458_v33 = vpop.eup %10457 }
 0x915   :  { %1207 = vrot.lane.b32.xlu0 %v10458_v33, %s10797_s27  ;;  %v10460_v38 = vpop.eup %10459 }
 0x916   :  { %v1122_v39 = vadd.f32 1.0, %v10460_v38 }
 0x918   :  { %10461 = vrcp.f32 %v1122_v39 }
 0x922   :  { %v10462_v40 = vpop.eup %10461 }
 0x923   :  { %v1205_v42 = vsub.f32 1.0, %v10462_v40  ;;  %v1213_v45 = vmul.f32 %v10462_v40, %v1211_v41 }
 0x987   :  { %v1208_v43 = vpop.permute.xlu0 %1207 }
 0x988   :  { %v1210_v44 = vmul.f32 %v1208_v43, %v1205_v42 }
 0x98a   :  { %v11074_v46 = vadd.f32 %v1213_v45, %v1210_v44 }
 0x98c   :  { %v1216_v47 = vrot.slane %v11074_v46, 6 }
 0x98e   :  { %1217 = vrot.lane.b32.xlu1 %v1216_v47, %s10797_s27 }
 0xa00   :  { %v1218_v48 = vpop.permute.xlu1 %1217 }
 0xa01   :  { %9419 = vmatmul.mubr.msk.f32.vlgmr.msra.gmra.mrb[10].mxu0 %vm175_vm2, %v1218_v48  ;;  %9426 = vmatmul.mubr.msk.f32.vlgmr.msra.gmra.mrb[16].mxu1 %vm175_vm2, %v1218_v48 }
 0xa02   :  { %10098 = vmatpush3.bf16.msra.mxu0 %v10961_v21  ;;  %9432 = vmatprep.mubr.msk.f32.mxu0 %vm10795_vm0, %v10796_v1 }
 0xa03   :  { %10102 = vmatprep.subr.bf16.mxu0 %v10794_v0  ;;  %10101 = vmatpush3.bf16.msra.mxu1 %v10920_v6 }
 0xa04   :  { %9439 = vmatprep.mubr.msk.f32.mxu1 %vm10795_vm0, %v10796_v1  ;;  %10105 = vmatprep.subr.bf16.mxu1 %v10794_v0 }
 0xa05   :  { %9433 = vmatmul.mubr.msk.f32.vlgmr.msra.gmra.mrb[12].mxu0 %vm175_vm2, %v1218_v48 }
 0xa06   :  { %10104 = vmatpush3.bf16.msra.mxu0 %v10955_v17  ;;  %9446 = vmatprep.mubr.msk.f32.mxu0 %vm10795_vm0, %v10796_v1 }
 0xa07   :  { %10108 = vmatprep.subr.bf16.mxu0 %v10794_v0 }
 0xad4   :  { %v1287_v28 = vpop.f32.mrb[10].mxu0  ;;  %v1357_v49 = vpop.f32.mrb[16].mxu1 }
 0xad5   :  { %v1361_v50 = vadd.f32 %v1287_v28, %v10976_v26  ;;  %1369 = vrot.lane.b32.xlu1 %v1357_v49, %s10800_s23  ;;  %v9420_v51 = vpop.f32.mrb[11].mxu0  ;;  %v9427_v52 = vpop.f32.mrb[17].mxu1 }
 0xad7   :  { %v8859_v53 = vmul.f32 -1.442695, %v1361_v50 }
 0xad8   :  { %v1445_v54 = vpop.f32.mrb[12].mxu0 }
 0xad9   :  { %10463 = vpow2.f32 %v8859_v53  ;;  %v9434_v56 = vpop.f32.mrb[13].mxu0  ;;  %v1446_v59 = vadd.f32 %v10984_v35, %v1445_v54 }
 0xae3   :  { %v10464_v57 = vpop.eup %10463 }
 0xae4   :  { %v1365_v58 = vadd.f32 1.0, %v10464_v57 }
 0xae6   :  { %10465 = vrcp.f32 %v1365_v58 }
 0xaf0   :  { %v10466_v60 = vpop.eup %10465 }
 0xaf1   :  { %v1449_v61 = vmul.f32 %v10466_v60, %v1446_v59 }
 0xaf3   :  { %1451 = vrot.lane.b32.xlu0 %v1449_v61, %s10799_s2 }
 0xb47   :  { %v1370_v3 = vpop.permute.xlu1 %1369 }
 0xb48   :  { %v1372_v5 = vadd.f32 %v1370_v3, %v10976_v26 }
 0xb4a   :  { %v8860_v7 = vmul.f32 -1.442695, %v1372_v5 }
 0xb65   :  { %v1452_v62 = vpop.permute.xlu0 %1451 }
 0xb66   :  { %v1454_v63 = vadd.f32 %v1452_v62, %v10976_v26 }
 0xb68   :  { %10467 = vtanh.f32 %v1454_v63 }
 0xb69   :  { %10469 = vpow2.f32 %v8860_v7 }
 0xb72   :  { %v10468_v2 = vpop.eup %10467 }
 0xb73   :  { %1458 = vrot.lane.b32.xlu0 %v10468_v2, %s10797_s27  ;;  %v10470_v8 = vpop.eup %10469 }
 0xb74   :  { %v1376_v9 = vadd.f32 1.0, %v10470_v8 }
 0xb76   :  { %10471 = vrcp.f32 %v1376_v9 }
 0xb80   :  { %v10472_v10 = vpop.eup %10471 }
 0xb81   :  { %v1456_v11 = vsub.f32 1.0, %v10472_v10  ;;  %v1463_v15 = vmul.f32 %v10472_v10, %v1216_v47 }
 0xbe5   :  { %v1459_v14 = vpop.permute.xlu0 %1458 }
 0xbe6   :  { %v1461_v16 = vmul.f32 %v1459_v14, %v1456_v11 }
 0xbe8   :  { %v1464_v18 = vadd.f32 %v1463_v15, %v1461_v16 }
 0xbea   :  { %1466 = vrot.lane.b32.xlu1 %v1464_v18, %s10797_s27  ;;  %v1718_v50 = vrot.slane %v1464_v18, 6  ;;  %v2242_v18 = vld [vmem:[%s11972_s6] sm:$0xff] }
 0xc5c   :  { %v11101_v19 = vpop.permute.xlu1 %1466 }
 0xc5d   :  { %9440 = vmatmul.mubr.msk.f32.vlgmr.msra.gmra.mrb[18].mxu1 %vm175_vm2, %v11101_v19  ;;  %9447 = vmatmul.mubr.msk.f32.vlgmr.msra.gmra.mrb[14].mxu0 %vm175_vm2, %v11101_v19 }
 0xc5e   :  { %10107 = vmatpush3.bf16.msra.mxu1 %v10961_v21  ;;  %9453 = vmatprep.mubr.msk.f32.mxu1 %vm10795_vm0, %v10796_v1 }
 0xc5f   :  { %10111 = vmatprep.subr.bf16.mxu1 %v10794_v0  ;;  %10110 = vmatpush3.bf16.msra.mxu0 %v10920_v6 }
 0xc60   :  { %9460 = vmatprep.mubr.msk.f32.mxu0 %vm10795_vm0, %v10796_v1  ;;  %10114 = vmatprep.subr.bf16.mxu0 %v10794_v0 }
 0xc61   :  { %9454 = vmatmul.mubr.msk.f32.vlgmr.msra.gmra.mrb[20].mxu1 %vm175_vm2, %v11101_v19 }
 0xc62   :  { %10113 = vmatpush3.bf16.msra.mxu1 %v10955_v17  ;;  %9467 = vmatprep.mubr.msk.f32.mxu1 %vm10795_vm0, %v10796_v1 }
 0xc63   :  { %10117 = vmatprep.subr.bf16.mxu1 %v10794_v0 }
 0xd30   :  { %v1536_v20 = vpop.f32.mrb[18].mxu1  ;;  %v1606_v22 = vpop.f32.mrb[14].mxu0 }
 0xd31   :  { %v1611_v23 = vrot.slane %v1536_v20, 6  ;;  %v1621_v24 = vrot.slane %v1606_v22, 6  ;;  %v9441_v25 = vpop.f32.mrb[19].mxu1  ;;  %v9448_v27 = vpop.f32.mrb[15].mxu0  ;;  %v2243_v20 = vld [vmem:[%s11972_s6 + $0x8] sm:$0xff] }
 0xd32   :  { %v10398_v22 = vpack.i.bf16 %v2243_v20, %v2242_v18 }
 0xd33   :  { %v1613_v29 = vadd.f32 %v1611_v23, %v10976_v26  ;;  %1622 = vrot.lane.b32.xlu1 %v1621_v24, %s10800_s23  ;;  %v11157_v23 = vpack.c.bf16 %v2243_v20, %v2242_v18 }
 0xd34   :  { %v1698_v30 = vpop.f32.mrb[20].mxu1 }
 0xd35   :  { %v8864_v32 = vmul.f32 -1.442695, %v1613_v29  ;;  %v9455_v33 = vpop.f32.mrb[21].mxu1  ;;  %v1699_v37 = vadd.f32 %v10984_v35, %v1698_v30 }
 0xd36   :  { %v2238_v33 = vld [vmem:[%s11971_s5] sm:$0xff] }
 0xd37   :  { %10473 = vpow2.f32 %v8864_v32  ;;  %v1703_v38 = vrot.slane %v1699_v37, 6 }
 0xd41   :  { %v10474_v34 = vpop.eup %10473 }
 0xd42   :  { %v1617_v36 = vadd.f32 1.0, %v10474_v34  ;;  %v2239_v34 = vld [vmem:[%s11971_s5 + $0x8] sm:$0xff] }
 0xd44   :  { %10475 = vrcp.f32 %v1617_v36  ;;  %v10126_v36 = vpack.c.bf16 %v2239_v34, %v2238_v33 }
 0xd4e   :  { %v10476_v39 = vpop.eup %10475 }
 0xd4f   :  { %v1705_v40 = vmul.f32 %v10476_v39, %v1703_v38 }
 0xd51   :  { %1707 = vrot.lane.b32.xlu0 %v1705_v40, %s10799_s2 }
 0xda5   :  { %v1623_v44 = vpop.permute.xlu1 %1622 }
 0xda6   :  { %v1625_v45 = vadd.f32 %v1623_v44, %v10976_v26 }
 0xda8   :  { %v8865_v47 = vmul.f32 -1.442695, %v1625_v45  ;;  %v2240_v45 = vld [vmem:[%s11971_s5 + $0x10] sm:$0xff] }
 0xdc3   :  { %v1708_v41 = vpop.permute.xlu0 %1707 }
 0xdc4   :  { %v1710_v42 = vadd.f32 %v1708_v41, %v10976_v26 }
 0xdc6   :  { %10477 = vtanh.f32 %v1710_v42 }
 0xdc7   :  { %10479 = vpow2.f32 %v8865_v47  ;;  %v2241_v47 = vld [vmem:[%s11971_s5 + $0x18] sm:$0xff] }
 0xdd0   :  { %v10478_v43 = vpop.eup %10477 }
 0xdd1   :  { %1714 = vrot.lane.b32.xlu0 %v10478_v43, %s10797_s27  ;;  %v10480_v48 = vpop.eup %10479 }
 0xdd2   :  { %v1629_v28 = vadd.f32 1.0, %v10480_v48  ;;  %v10130_v48 = vpack.c.bf16 %v2241_v47, %v2240_v45 }
 0xdd4   :  { %10481 = vrcp.f32 %v1629_v28 }
 0xdde   :  { %v10482_v49 = vpop.eup %10481 }
 0xddf   :  { %v1712_v51 = vsub.f32 1.0, %v10482_v49  ;;  %v1720_v54 = vmul.f32 %v10482_v49, %v1718_v50 }
 0xe43   :  { %v1715_v52 = vpop.permute.xlu0 %1714 }
 0xe44   :  { %v1717_v53 = vmul.f32 %v1715_v52, %v1712_v51 }
 0xe46   :  { %v11128_v56 = vadd.f32 %v1720_v54, %v1717_v53 }
 0xe48   :  { %v1723_v57 = vrot.slane %v11128_v56, 2  ;;  %v1976_v39 = vrot.slane %v11128_v56, 6 }
 0xe4a   :  { %1724 = vrot.lane.b32.xlu1 %v1723_v57, %s10797_s27 }
 0xebc   :  { %v1725_v58 = vpop.permute.xlu1 %1724 }
 0xebd   :  { %9461 = vmatmul.mubr.msk.f32.vlgmr.msra.gmra.mrb[16].mxu0 %vm175_vm2, %v1725_v58  ;;  %9468 = vmatmul.mubr.msk.f32.vlgmr.msra.gmra.mrb[22].mxu1 %vm175_vm2, %v1725_v58 }
 0xebe   :  { %10116 = vmatpush3.bf16.msra.mxu0 %v10961_v21  ;;  %9474 = vmatprep.mubr.msk.f32.mxu0 %vm10795_vm0, %v10796_v1 }
 0xebf   :  { %10120 = vmatprep.subr.bf16.mxu0 %v10794_v0  ;;  %10119 = vmatpush3.bf16.msra.mxu1 %v10920_v6 }
 0xec0   :  { %9481 = vmatprep.mubr.msk.f32.mxu1 %vm10795_vm0, %v10796_v1  ;;  %10123 = vmatprep.subr.bf16.mxu1 %v10794_v0 }
 0xec1   :  { %9475 = vmatmul.mubr.msk.f32.vlgmr.msra.gmra.mrb[18].mxu0 %vm175_vm2, %v1725_v58 }
 0xec2   :  { %10122 = vmatpush3.bf16.msra.mxu0 %v10955_v17  ;;  %9488 = vmatprep.mubr.msk.f32.mxu0 %vm10795_vm0, %v10796_v1 }
 0xec3   :  { %10127 = vmatprep.subr.bf16.mxu0 %v10126_v36 }
 0xf90   :  { %v1794_v59 = vpop.f32.mrb[16].mxu0  ;;  %v1864_v60 = vpop.f32.mrb[22].mxu1 }
 0xf91   :  { %v1869_v61 = vrot.slane %v1794_v59, 4  ;;  %v1879_v62 = vrot.slane %v1864_v60, 4  ;;  %v9462_v63 = vpop.f32.mrb[17].mxu0  ;;  %v9469_v2 = vpop.f32.mrb[23].mxu1 }
 0xf93   :  { %v1871_v6 = vadd.f32 %v1869_v61, %v10976_v26  ;;  %1880 = vrot.lane.b32.xlu1 %v1879_v62, %s10800_s23 }
 0xf94   :  { %v1956_v3 = vpop.f32.mrb[18].mxu0 }
 0xf95   :  { %v8869_v5 = vmul.f32 -1.442695, %v1871_v6  ;;  %v9476_v7 = vpop.f32.mrb[19].mxu0  ;;  %v1957_v17 = vadd.f32 %v10984_v35, %v1956_v3  ;;  %v8877_v6 = vld [vmem:[%s11973_s7] ss:$0 sm:$0xff] }
 0xf97   :  { %10483 = vpow2.f32 %v8869_v5  ;;  %v1961_v10 = vrot.slane %v1957_v17, 4 }
 0xfa1   :  { %v10484_v8 = vpop.eup %10483 }
 0xfa2   :  { %v1875_v9 = vadd.f32 1.0, %v10484_v8 }
 0xfa4   :  { %10485 = vrcp.f32 %v1875_v9 }
 0xfae   :  { %v10486_v11 = vpop.eup %10485 }
 0xfaf   :  { %v1963_v14 = vmul.f32 %v10486_v11, %v1961_v10 }
 0xfb1   :  { %1965 = vrot.lane.b32.xlu0 %v1963_v14, %s10799_s2 }
0x1005   :  { %v1881_v25 = vpop.permute.xlu1 %1880 }
0x1006   :  { %v1883_v27 = vadd.f32 %v1881_v25, %v10976_v26 }
0x1008   :  { %v8870_v29 = vmul.f32 -1.442695, %v1883_v27 }
0x1023   :  { %v1966_v15 = vpop.permute.xlu0 %1965 }
0x1024   :  { %v1968_v16 = vadd.f32 %v1966_v15, %v10976_v26 }
0x1026   :  { %10487 = vtanh.f32 %v1968_v16 }
0x1027   :  { %10489 = vpow2.f32 %v8870_v29 }
0x1030   :  { %v10488_v24 = vpop.eup %10487 }
0x1031   :  { %1972 = vrot.lane.b32.xlu0 %v10488_v24, %s10797_s27  ;;  %v10490_v30 = vpop.eup %10489 }
0x1032   :  { %v1887_v32 = vadd.f32 1.0, %v10490_v30 }
0x1034   :  { %10491 = vrcp.f32 %v1887_v32  ;;  %v11235_v32 = vld [vmem:[%s11974_s8] ss:$0 sm:$0xff] }
0x1035   :  { %10394 = vrot.lane.b32.xlu0 %v10398_v22, %s10798_s28 }
0x103e   :  { %v10492_v37 = vpop.eup %10491 }
0x103f   :  { %v1970_v38 = vsub.f32 1.0, %v10492_v37  ;;  %v1978_v41 = vmul.f32 %v10492_v37, %v1976_v39 }
0x10a3   :  { %v1973_v40 = vpop.permute.xlu0 %1972 }
0x10a4   :  { %v1975_v42 = vmul.f32 %v1973_v40, %v1970_v38 }
0x10a6   :  { %v11169_v43 = vadd.f32 %v1978_v41, %v1975_v42 }
0x10a7   :  { %v10395_v49 = vpop.permute.xlu0 %10394 }
0x10a8   :  { %v1981_v44 = vrot.slane %v11169_v43, 4  ;;  %v10397_v50 = vunpack.i.h.bf16 %v10395_v49  ;;  %v10396_v51 = vunpack.i.l.bf16 %v10395_v49 }
0x10aa   :  { %1982 = vrot.lane.b32.xlu1 %v1981_v44, %s10797_s27  ;;  %v11195_v57 = vpack.c.bf16 %v10397_v50, %v10396_v51 }
0x10ae   :  { %10399 = vrot.lane.b32.xlu1 %v10398_v22, %s10797_s27 }
0x111c   :  { %v1983_v28 = vpop.permute.xlu1 %1982 }
0x111d   :  { %9482 = vmatmul.mubr.msk.f32.vlgmr.msra.gmra.mrb[24].mxu1 %vm175_vm2, %v1983_v28  ;;  %9489 = vmatmul.mubr.msk.f32.vlgmr.msra.gmra.mrb[20].mxu0 %vm175_vm2, %v1983_v28 }
0x111e   :  { %10125 = vmatpush3.bf16.msra.mxu1 %v10961_v21  ;;  %10129 = vmatpush3.bf16.msra.mxu0 %v10126_v36 }
0x111f   :  { %9495 = vmatprep.mubr.msk.f32.mxu1 %vm10795_vm0, %v10796_v1  ;;  %10131 = vmatprep.subr.bf16.mxu0 %v10130_v48 }
0x1120   :  { %10134 = vmatprep.subr.bf16.mxu1 %v10794_v0  ;;  %v10400_v52 = vpop.permute.xlu1 %10399  ;;  %9506 = vmatprep.mubr.msk.f32.mxu0 %vm93_vm1, %v10934_v12 }
0x1121   :  { %9496 = vmatmul.mubr.msk.f32.vlgmr.msra.gmra.mrb[26].mxu1 %vm175_vm2, %v1983_v28  ;;  %v10402_v53 = vunpack.i.h.bf16 %v10400_v52  ;;  %v10401_v54 = vunpack.i.l.bf16 %v10400_v52 }
0x1122   :  { %10133 = vmatpush3.bf16.msra.mxu0 %v10130_v48  ;;  %10136 = vmatpush3.bf16.msra.mxu1 %v11157_v23 }
0x1123   :  { %v11190_v21 = vpack.c.bf16 %v10402_v53, %v10401_v54  ;;  %9513 = vmatprep.mubr.msk.f32.mxu1 %vm10795_vm0, %v10796_v1  ;;  %10137 = vmatprep.subr.bf16.mxu1 %v10794_v0 }
0x1124   :  { %10140 = vmatprep.subr.bf16.mxu0 %v10794_v0 }
0x1125   :  { %9507 = vmatmul.mubr.msk.f32.vlgmr.msra.gmra.mrb[22].mxu0 %vm93_vm1, %v10948_v13  ;;  %9514 = vmatmul.mubr.f32.vlgmr.msra.gmra.mrb[28].mxu1 %v10796_v1 }
0x1126   :  { %10139 = vmatpush3.bf16.msra.mxu1 %v11190_v21  ;;  %9520 = vmatprep.mubr.msk.f32.mxu1 %vm10795_vm0, %v10796_v1 }
0x1127   :  { %10142 = vmatpush3.bf16.msra.mxu0 %v11195_v57  ;;  %9527 = vmatprep.mubr.msk.f32.mxu0 %vm10795_vm0, %v10796_v1 }
0x1128   :  { %10146 = vmatprep.subr.bf16.mxu0 %v10794_v0  ;;  %10143 = vmatprep.subr.bf16.mxu1 %v10794_v0 }
0x1129   :  { %9521 = vmatmul.mubr.f32.vlgmr.msra.gmra.mrb[30].mxu1 %v10796_v1 }
0x112a   :  { %9528 = vmatmul.mubr.f32.vlgmr.msra.gmra.mrb[24].mxu0 %v10796_v1  ;;  %10145 = vmatpush3.bf16.msra.mxu1 %v11157_v23 }
0x112b   :  { %10148 = vmatpush3.bf16.msra.mxu0 %v11190_v21  ;;  %9534 = vmatprep.mubr.msk.f32.mxu1 %vm10795_vm0, %v10796_v1 }
0x112c   :  { %9541 = vmatprep.mubr.msk.f32.mxu0 %vm10795_vm0, %v10796_v1  ;;  %10149 = vmatprep.subr.bf16.mxu1 %v10794_v0 }
0x112d   :  { %10152 = vmatprep.subr.bf16.mxu0 %v10794_v0 }
0x11f0   :  { %v2052_v12 = vpop.f32.mrb[24].mxu1  ;;  %v11219_v13 = vpop.f32.mrb[20].mxu0 }
0x11f1   :  { %v2127_v58 = vrot.slane %v2052_v12, 2  ;;  %v9483_v59 = vpop.f32.mrb[25].mxu1  ;;  %v9490_v60 = vpop.f32.mrb[21].mxu0 }
0x11f3   :  { %v2129_v61 = vadd.f32 %v2127_v58, %v10976_v26 }
0x11f4   :  { %v2214_v62 = vpop.f32.mrb[26].mxu1 }
0x11f5   :  { %v8874_v63 = vmul.f32 -1.442695, %v2129_v61  ;;  %v9497_v2 = vpop.f32.mrb[27].mxu1  ;;  %v2215_v29 = vadd.f32 %v10984_v35, %v2214_v62 }
0x11f7   :  { %10493 = vpow2.f32 %v8874_v63  ;;  %v2219_v33 = vrot.slane %v2215_v29, 2 }
0x11f8   :  { %v9508_v3 = vpop.f32.mrb[22].mxu0  ;;  %v2393_v5 = vpop.f32.mrb[28].mxu1 }
0x11f9   :  { %v11225_v7 = vadd.f32 %v9508_v3, %v8877_v6  ;;  %v2476_v8 = vrot.slane %v2393_v5, 2  ;;  %v2318_v9 = vpop.f32.mrb[23].mxu0  ;;  %v9515_v17 = vpop.f32.mrb[29].mxu1 }
0x11fa   :  { %v11227_v10 = vadd.f32 %v8877_v6, %v2318_v9 }
0x11fb   :  { %v2478_v11 = vadd.f32 %v2476_v8, %v11225_v7 }
0x11fc   :  { %v2471_v14 = vpop.f32.mrb[30].mxu1 }
0x11fd   :  { %v8880_v15 = vmul.f32 -1.442695, %v2478_v11  ;;  %v2486_v16 = vrot.slane %v2471_v14, 2  ;;  %v2575_v18 = vpop.f32.mrb[24].mxu0  ;;  %v9522_v20 = vpop.f32.mrb[31].mxu1 }
0x11fe   :  { %v9529_v22 = vpop.f32.mrb[25].mxu0  ;;  %v2576_v37 = vadd.f32 %v11235_v32, %v2575_v18 }
0x11ff   :  { %10495 = vpow2.f32 %v8880_v15  ;;  %2487 = vrot.lane.b32.xlu1 %v2486_v16, %s10800_s23 }
0x1200   :  { %v2580_v38 = vrot.slane %v2576_v37, 2 }
0x1201   :  { %v10494_v24 = vpop.eup %10493 }
0x1202   :  { %v2133_v25 = vadd.f32 1.0, %v10494_v24 }
0x1204   :  { %10497 = vrcp.f32 %v2133_v25 }
0x1209   :  { %v10496_v27 = vpop.eup %10495 }
0x120a   :  { %v2482_v30 = vadd.f32 1.0, %v10496_v27 }
0x120c   :  { %10499 = vrcp.f32 %v2482_v30 }
0x120e   :  { %v10498_v34 = vpop.eup %10497 }
0x120f   :  { %v11237_v36 = vmul.f32 %v10498_v34, %v2219_v33 }
0x1216   :  { %v10500_v39 = vpop.eup %10499 }
0x1217   :  { %v2582_v40 = vmul.f32 %v10500_v39, %v2580_v38 }
0x1219   :  { %2584 = vrot.lane.b32.xlu0 %v2582_v40, %s10799_s2 }
0x1271   :  { %v2488_v44 = vpop.permute.xlu1 %2487 }
0x1272   :  { %v2490_v45 = vadd.f32 %v2488_v44, %v11225_v7 }
0x1274   :  { %v8881_v47 = vmul.f32 -1.442695, %v2490_v45 }
0x128b   :  { %v2585_v41 = vpop.permute.xlu0 %2584 }
0x128c   :  { %v2587_v35 = vadd.f32 %v2585_v41, %v11225_v7 }
0x128e   :  { %10501 = vtanh.f32 %v2587_v35 }
0x128f   :  { %10503 = vpow2.f32 %v8881_v47 }
0x1298   :  { %v10502_v42 = vpop.eup %10501 }
0x1299   :  { %2591 = vrot.lane.b32.xlu0 %v10502_v42, %s10797_s27  ;;  %v10504_v48 = vpop.eup %10503 }
0x129a   :  { %v2494_v28 = vadd.f32 1.0, %v10504_v48 }
0x129c   :  { %10505 = vrcp.f32 %v2494_v28 }
0x12a6   :  { %v10506_v49 = vpop.eup %10505 }
0x12a7   :  { %v2589_v50 = vsub.f32 1.0, %v10506_v49  ;;  %v2595_v52 = vmul.f32 0.0, %v10506_v49 }
0x130b   :  { %v2592_v51 = vpop.permute.xlu0 %2591 }
0x130c   :  { %v2594_v53 = vmul.f32 %v2592_v51, %v2589_v50 }
0x130e   :  { %v11244_v54 = vadd.f32 %v2595_v52, %v2594_v53 }
0x1310   :  { %v2598_v12 = vrot.slane %v11244_v54, 6  ;;  %v2851_v34 = vrot.slane %v11244_v54, 2 }
0x1312   :  { %2599 = vrot.lane.b32.xlu1 %v2598_v12, %s10797_s27 }
0x1384   :  { %v2600_v58 = vpop.permute.xlu1 %2599 }
0x1385   :  { %9535 = vmatmul.mubr.msk.f32.vlgmr.msra.gmra.mrb[32].mxu1 %vm175_vm2, %v2600_v58  ;;  %9542 = vmatmul.mubr.msk.f32.vlgmr.msra.gmra.mrb[26].mxu0 %vm175_vm2, %v2600_v58 }
0x1386   :  { %10151 = vmatpush3.bf16.msra.mxu1 %v11195_v57  ;;  %9548 = vmatprep.mubr.msk.f32.mxu1 %vm10795_vm0, %v10796_v1 }
0x1387   :  { %10155 = vmatprep.subr.bf16.mxu1 %v10794_v0  ;;  %10154 = vmatpush3.bf16.msra.mxu0 %v11157_v23 }
0x1388   :  { %9555 = vmatprep.mubr.msk.f32.mxu0 %vm10795_vm0, %v10796_v1  ;;  %10158 = vmatprep.subr.bf16.mxu0 %v10794_v0 }
0x1389   :  { %9549 = vmatmul.mubr.msk.f32.vlgmr.msra.gmra.mrb[34].mxu1 %vm175_vm2, %v2600_v58 }
0x138a   :  { %10157 = vmatpush3.bf16.msra.mxu1 %v11190_v21  ;;  %9562 = vmatprep.mubr.msk.f32.mxu1 %vm10795_vm0, %v10796_v1 }
0x138b   :  { %10161 = vmatprep.subr.bf16.mxu1 %v10794_v0 }
0x1458   :  { %v2669_v59 = vpop.f32.mrb[32].mxu1  ;;  %v2739_v60 = vpop.f32.mrb[26].mxu0 }
0x1459   :  { %v2744_v61 = vrot.slane %v2669_v59, 4  ;;  %v2754_v62 = vrot.slane %v2739_v60, 4  ;;  %v9536_v63 = vpop.f32.mrb[33].mxu1  ;;  %v9543_v2 = vpop.f32.mrb[27].mxu0 }
0x145b   :  { %v2746_v6 = vadd.f32 %v2744_v61, %v11225_v7  ;;  %2755 = vrot.lane.b32.xlu1 %v2754_v62, %s10800_s23 }
0x145c   :  { %v2831_v3 = vpop.f32.mrb[34].mxu1 }
0x145d   :  { %v8885_v5 = vmul.f32 -1.442695, %v2746_v6  ;;  %v9550_v8 = vpop.f32.mrb[35].mxu1  ;;  %v2832_v11 = vadd.f32 %v11235_v32, %v2831_v3 }
0x145f   :  { %10507 = vpow2.f32 %v8885_v5  ;;  %v2836_v14 = vrot.slane %v2832_v11, 4 }
0x1469   :  { %v10508_v9 = vpop.eup %10507 }
0x146a   :  { %v2750_v17 = vadd.f32 1.0, %v10508_v9 }
0x146c   :  { %10509 = vrcp.f32 %v2750_v17 }
0x1476   :  { %v10510_v15 = vpop.eup %10509 }
0x1477   :  { %v2838_v16 = vmul.f32 %v10510_v15, %v2836_v14 }
0x1479   :  { %2840 = vrot.lane.b32.xlu0 %v2838_v16, %s10799_s2 }
0x14cd   :  { %v2756_v24 = vpop.permute.xlu1 %2755 }
0x14ce   :  { %v2758_v25 = vadd.f32 %v2756_v24, %v11225_v7 }
0x14d0   :  { %v8886_v27 = vmul.f32 -1.442695, %v2758_v25 }
0x14eb   :  { %v2841_v18 = vpop.permute.xlu0 %2840 }
0x14ec   :  { %v2843_v20 = vadd.f32 %v2841_v18, %v11225_v7 }
0x14ee   :  { %10511 = vtanh.f32 %v2843_v20 }
0x14ef   :  { %10513 = vpow2.f32 %v8886_v27 }
0x14f8   :  { %v10512_v22 = vpop.eup %10511 }
0x14f9   :  { %2847 = vrot.lane.b32.xlu0 %v10512_v22, %s10797_s27  ;;  %v10514_v29 = vpop.eup %10513 }
0x14fa   :  { %v2762_v30 = vadd.f32 1.0, %v10514_v29 }
0x14fc   :  { %10515 = vrcp.f32 %v2762_v30 }
0x1506   :  { %v10516_v33 = vpop.eup %10515 }
0x1507   :  { %v2845_v37 = vsub.f32 1.0, %v10516_v33  ;;  %v2853_v40 = vmul.f32 %v10516_v33, %v2851_v34 }
0x156b   :  { %v2848_v38 = vpop.permute.xlu0 %2847 }
0x156c   :  { %v2850_v39 = vmul.f32 %v2848_v38, %v2845_v37 }
0x156e   :  { %v11271_v41 = vadd.f32 %v2853_v40, %v2850_v39 }
0x1570   :  { %v2856_v35 = vrot.slane %v11271_v41, 4  ;;  %v3109_v15 = vrot.slane %v11271_v41, 2 }
0x1572   :  { %2857 = vrot.lane.b32.xlu1 %v2856_v35, %s10797_s27 }
0x15e4   :  { %v2858_v42 = vpop.permute.xlu1 %2857 }
0x15e5   :  { %9556 = vmatmul.mubr.msk.f32.vlgmr.msra.gmra.mrb[28].mxu0 %vm175_vm2, %v2858_v42  ;;  %9563 = vmatmul.mubr.msk.f32.vlgmr.msra.gmra.mrb[36].mxu1 %vm175_vm2, %v2858_v42 }
0x15e6   :  { %10160 = vmatpush3.bf16.msra.mxu0 %v11195_v57  ;;  %9569 = vmatprep.mubr.msk.f32.mxu0 %vm10795_vm0, %v10796_v1 }
0x15e7   :  { %10164 = vmatprep.subr.bf16.mxu0 %v10794_v0  ;;  %10163 = vmatpush3.bf16.msra.mxu1 %v11157_v23 }
0x15e8   :  { %9576 = vmatprep.mubr.msk.f32.mxu1 %vm10795_vm0, %v10796_v1  ;;  %10167 = vmatprep.subr.bf16.mxu1 %v10794_v0 }
0x15e9   :  { %9570 = vmatmul.mubr.msk.f32.vlgmr.msra.gmra.mrb[30].mxu0 %vm175_vm2, %v2858_v42 }
0x15ea   :  { %10166 = vmatpush3.bf16.msra.mxu0 %v11190_v21  ;;  %9583 = vmatprep.mubr.msk.f32.mxu0 %vm10795_vm0, %v10796_v1 }
0x15eb   :  { %10170 = vmatprep.subr.bf16.mxu0 %v10794_v0 }
0x16b8   :  { %v2927_v44 = vpop.f32.mrb[28].mxu0  ;;  %v2997_v45 = vpop.f32.mrb[36].mxu1 }
0x16b9   :  { %v3002_v47 = vrot.slane %v2927_v44, 6  ;;  %v3012_v48 = vrot.slane %v2997_v45, 6  ;;  %v9557_v28 = vpop.f32.mrb[29].mxu0  ;;  %v9564_v49 = vpop.f32.mrb[37].mxu1 }
0x16bb   :  { %v3004_v50 = vadd.f32 %v3002_v47, %v11225_v7  ;;  %3013 = vrot.lane.b32.xlu1 %v3012_v48, %s10800_s23 }
0x16bc   :  { %v3089_v51 = vpop.f32.mrb[30].mxu0 }
0x16bd   :  { %v8890_v52 = vmul.f32 -1.442695, %v3004_v50  ;;  %v9571_v53 = vpop.f32.mrb[31].mxu0  ;;  %v3090_v59 = vadd.f32 %v11235_v32, %v3089_v51 }
0x16bf   :  { %10517 = vpow2.f32 %v8890_v52  ;;  %v3094_v60 = vrot.slane %v3090_v59, 6 }
0x16c9   :  { %v10518_v12 = vpop.eup %10517 }
0x16ca   :  { %v3008_v58 = vadd.f32 1.0, %v10518_v12 }
0x16cc   :  { %10519 = vrcp.f32 %v3008_v58 }
0x16d6   :  { %v10520_v61 = vpop.eup %10519 }
0x16d7   :  { %v3096_v62 = vmul.f32 %v10520_v61, %v3094_v60 }
0x16d9   :  { %3098 = vrot.lane.b32.xlu0 %v3096_v62, %s10799_s2 }
0x172d   :  { %v3014_v3 = vpop.permute.xlu1 %3013 }
0x172e   :  { %v3016_v5 = vadd.f32 %v3014_v3, %v11225_v7 }
0x1730   :  { %v8891_v8 = vmul.f32 -1.442695, %v3016_v5 }
0x174b   :  { %v3099_v63 = vpop.permute.xlu0 %3098 }
0x174c   :  { %v3101_v2 = vadd.f32 %v3099_v63, %v11225_v7 }
0x174e   :  { %10521 = vtanh.f32 %v3101_v2 }
0x174f   :  { %10523 = vpow2.f32 %v8891_v8 }
0x1758   :  { %v10522_v6 = vpop.eup %10521 }
0x1759   :  { %3105 = vrot.lane.b32.xlu0 %v10522_v6, %s10797_s27  ;;  %v10524_v9 = vpop.eup %10523 }
0x175a   :  { %v3020_v17 = vadd.f32 1.0, %v10524_v9 }
0x175c   :  { %10525 = vrcp.f32 %v3020_v17 }
0x1766   :  { %v10526_v11 = vpop.eup %10525 }
0x1767   :  { %v3103_v14 = vsub.f32 1.0, %v10526_v11  ;;  %v3111_v18 = vmul.f32 %v10526_v11, %v3109_v15 }
0x17cb   :  { %v3106_v16 = vpop.permute.xlu0 %3105 }
0x17cc   :  { %v3108_v20 = vmul.f32 %v3106_v16, %v3103_v14 }
0x17ce   :  { %v11298_v22 = vadd.f32 %v3111_v18, %v3108_v20 }
0x17d0   :  { %v3114_v24 = vrot.slane %v11298_v22, 2 }
0x17d2   :  { %3115 = vrot.lane.b32.xlu1 %v3114_v24, %s10797_s27 }
0x1844   :  { %v3116_v25 = vpop.permute.xlu1 %3115 }
0x1845   :  { %9577 = vmatmul.mubr.msk.f32.vlgmr.msra.gmra.mrb[38].mxu1 %vm175_vm2, %v3116_v25  ;;  %9584 = vmatmul.mubr.msk.f32.vlgmr.msra.gmra.mrb[32].mxu0 %vm175_vm2, %v3116_v25 }
0x1846   :  { %10169 = vmatpush3.bf16.msra.mxu1 %v11195_v57  ;;  %9590 = vmatprep.mubr.msk.f32.mxu1 %vm10795_vm0, %v10796_v1 }
0x1847   :  { %10173 = vmatprep.subr.bf16.mxu1 %v10794_v0  ;;  %10172 = vmatpush3.bf16.msra.mxu0 %v11157_v23 }
0x1848   :  { %9597 = vmatprep.mubr.msk.f32.mxu0 %vm10795_vm0, %v10796_v1  ;;  %10176 = vmatprep.subr.bf16.mxu0 %v10794_v0 }
0x1849   :  { %9591 = vmatmul.mubr.msk.f32.vlgmr.msra.gmra.mrb[40].mxu1 %vm175_vm2, %v3116_v25 }
0x184a   :  { %10175 = vmatpush3.bf16.msra.mxu1 %v11190_v21  ;;  %9604 = vmatprep.mubr.msk.f32.mxu1 %vm10795_vm0, %v10796_v1 }
0x184b   :  { %10179 = vmatprep.subr.bf16.mxu1 %v10794_v0 }
0x1918   :  { %v3185_v27 = vpop.f32.mrb[38].mxu1  ;;  %v3255_v29 = vpop.f32.mrb[32].mxu0 }
0x1919   :  { %v3259_v30 = vadd.f32 %v3185_v27, %v11225_v7  ;;  %v9578_v33 = vpop.f32.mrb[39].mxu1  ;;  %3267 = vrot.lane.b32.xlu1 %v3255_v29, %s10800_s23  ;;  %v9585_v34 = vpop.f32.mrb[33].mxu0 }
0x191b   :  { %v8895_v37 = vmul.f32 -1.442695, %v3259_v30 }
0x191c   :  { %v3343_v38 = vpop.f32.mrb[40].mxu1 }
0x191d   :  { %10527 = vpow2.f32 %v8895_v37  ;;  %v9592_v39 = vpop.f32.mrb[41].mxu1  ;;  %v3344_v42 = vadd.f32 %v11235_v32, %v3343_v38 }
0x1927   :  { %v10528_v40 = vpop.eup %10527 }
0x1928   :  { %v3263_v35 = vadd.f32 1.0, %v10528_v40 }
0x192a   :  { %10529 = vrcp.f32 %v3263_v35 }
0x1934   :  { %v10530_v44 = vpop.eup %10529 }
0x1935   :  { %v3347_v45 = vmul.f32 %v10530_v44, %v3344_v42 }
0x1937   :  { %3349 = vrot.lane.b32.xlu0 %v3347_v45, %s10799_s2 }
0x198b   :  { %v3268_v49 = vpop.permute.xlu1 %3267 }
0x198c   :  { %v3270_v50 = vadd.f32 %v3268_v49, %v11225_v7 }
0x198e   :  { %v8896_v51 = vmul.f32 -1.442695, %v3270_v50 }
0x19a9   :  { %v3350_v47 = vpop.permute.xlu0 %3349 }
0x19aa   :  { %v3352_v48 = vadd.f32 %v3350_v47, %v11225_v7 }
0x19ac   :  { %10531 = vtanh.f32 %v3352_v48 }
0x19ad   :  { %10533 = vpow2.f32 %v8896_v51 }
0x19b6   :  { %v10532_v28 = vpop.eup %10531 }
0x19b7   :  { %3356 = vrot.lane.b32.xlu0 %v10532_v28, %s10797_s27  ;;  %v10534_v52 = vpop.eup %10533 }
0x19b8   :  { %v3274_v53 = vadd.f32 1.0, %v10534_v52 }
0x19ba   :  { %10535 = vrcp.f32 %v3274_v53 }
0x19c4   :  { %v10536_v12 = vpop.eup %10535 }
0x19c5   :  { %v3354_v58 = vsub.f32 1.0, %v10536_v12  ;;  %v3361_v61 = vmul.f32 %v10536_v12, %v3114_v24 }
0x1a29   :  { %v3357_v59 = vpop.permute.xlu0 %3356 }
0x1a2a   :  { %v3359_v60 = vmul.f32 %v3357_v59, %v3354_v58 }
0x1a2c   :  { %v11324_v62 = vadd.f32 %v3361_v61, %v3359_v60 }
0x1a2e   :  { %3364 = vrot.lane.b32.xlu1 %v11324_v62, %s10797_s27  ;;  %v3616_v42 = vrot.slane %v11324_v62, 2 }
0x1aa0   :  { %v3365_v63 = vpop.permute.xlu1 %3364 }
0x1aa1   :  { %9598 = vmatmul.mubr.msk.f32.vlgmr.msra.gmra.mrb[34].mxu0 %vm175_vm2, %v3365_v63  ;;  %9605 = vmatmul.mubr.msk.f32.vlgmr.msra.gmra.mrb[42].mxu1 %vm175_vm2, %v3365_v63 }
0x1aa2   :  { %10178 = vmatpush3.bf16.msra.mxu0 %v11195_v57  ;;  %9611 = vmatprep.mubr.msk.f32.mxu0 %vm10795_vm0, %v10796_v1 }
0x1aa3   :  { %10182 = vmatprep.subr.bf16.mxu0 %v10794_v0  ;;  %10181 = vmatpush3.bf16.msra.mxu1 %v11157_v23 }
0x1aa4   :  { %9618 = vmatprep.mubr.msk.f32.mxu1 %vm10795_vm0, %v10796_v1  ;;  %10185 = vmatprep.subr.bf16.mxu1 %v10794_v0 }
0x1aa5   :  { %9612 = vmatmul.mubr.msk.f32.vlgmr.msra.gmra.mrb[36].mxu0 %vm175_vm2, %v3365_v63 }
0x1aa6   :  { %10184 = vmatpush3.bf16.msra.mxu0 %v11190_v21  ;;  %9625 = vmatprep.mubr.msk.f32.mxu0 %vm10795_vm0, %v10796_v1 }
0x1aa7   :  { %10188 = vmatprep.subr.bf16.mxu0 %v10794_v0 }
0x1b74   :  { %v3434_v7 = vpop.f32.mrb[34].mxu0  ;;  %v3504_v2 = vpop.f32.mrb[42].mxu1 }
0x1b75   :  { %v3509_v6 = vrot.slane %v3434_v7, 2  ;;  %v3519_v3 = vrot.slane %v3504_v2, 2  ;;  %v9599_v5 = vpop.f32.mrb[35].mxu0  ;;  %v9606_v8 = vpop.f32.mrb[43].mxu1 }
0x1b77   :  { %v3511_v9 = vadd.f32 %v3509_v6, %v11227_v10  ;;  %3520 = vrot.lane.b32.xlu1 %v3519_v3, %s10800_s23 }
0x1b78   :  { %v3596_v17 = vpop.f32.mrb[36].mxu0 }
0x1b79   :  { %v8900_v11 = vmul.f32 -1.442695, %v3511_v9  ;;  %v9613_v14 = vpop.f32.mrb[37].mxu0  ;;  %v3597_v18 = vadd.f32 %v11235_v32, %v3596_v17 }
0x1b7b   :  { %10537 = vpow2.f32 %v8900_v11  ;;  %v3601_v20 = vrot.slane %v3597_v18, 2 }
0x1b85   :  { %v10538_v15 = vpop.eup %10537 }
0x1b86   :  { %v3515_v16 = vadd.f32 1.0, %v10538_v15 }
0x1b88   :  { %10539 = vrcp.f32 %v3515_v16 }
0x1b92   :  { %v10540_v24 = vpop.eup %10539 }
0x1b93   :  { %v3603_v25 = vmul.f32 %v10540_v24, %v3601_v20 }
0x1b95   :  { %3605 = vrot.lane.b32.xlu0 %v3603_v25, %s10799_s2 }
0x1be9   :  { %v3521_v33 = vpop.permute.xlu1 %3520 }
0x1bea   :  { %v3523_v34 = vadd.f32 %v3521_v33, %v11227_v10 }
0x1bec   :  { %v8901_v37 = vmul.f32 -1.442695, %v3523_v34 }
0x1c07   :  { %v3606_v27 = vpop.permute.xlu0 %3605 }
0x1c08   :  { %v3608_v29 = vadd.f32 %v3606_v27, %v11227_v10 }
0x1c0a   :  { %10541 = vtanh.f32 %v3608_v29 }
0x1c0b   :  { %10543 = vpow2.f32 %v8901_v37 }
0x1c14   :  { %v10542_v30 = vpop.eup %10541 }
0x1c15   :  { %3612 = vrot.lane.b32.xlu0 %v10542_v30, %s10797_s27  ;;  %v10544_v38 = vpop.eup %10543 }
0x1c16   :  { %v3527_v39 = vadd.f32 1.0, %v10544_v38 }
0x1c18   :  { %10545 = vrcp.f32 %v3527_v39 }
0x1c22   :  { %v10546_v40 = vpop.eup %10545 }
0x1c23   :  { %v3610_v35 = vsub.f32 1.0, %v10546_v40  ;;  %v3618_v45 = vmul.f32 %v10546_v40, %v3616_v42 }
0x1c87   :  { %v3613_v44 = vpop.permute.xlu0 %3612 }
0x1c88   :  { %v3615_v47 = vmul.f32 %v3613_v44, %v3610_v35 }
0x1c8a   :  { %v11351_v48 = vadd.f32 %v3618_v45, %v3615_v47 }
0x1c8c   :  { %v3621_v28 = vrot.slane %v11351_v48, 6  ;;  %v3874_v27 = vrot.slane %v11351_v48, 2 }
0x1c8e   :  { %3622 = vrot.lane.b32.xlu1 %v3621_v28, %s10797_s27 }
0x1d00   :  { %v3623_v49 = vpop.permute.xlu1 %3622 }
0x1d01   :  { %9619 = vmatmul.mubr.msk.f32.vlgmr.msra.gmra.mrb[44].mxu1 %vm175_vm2, %v3623_v49  ;;  %9626 = vmatmul.mubr.msk.f32.vlgmr.msra.gmra.mrb[38].mxu0 %vm175_vm2, %v3623_v49 }
0x1d02   :  { %10187 = vmatpush3.bf16.msra.mxu1 %v11195_v57  ;;  %9632 = vmatprep.mubr.msk.f32.mxu1 %vm10795_vm0, %v10796_v1 }
0x1d03   :  { %10191 = vmatprep.subr.bf16.mxu1 %v10794_v0  ;;  %10190 = vmatpush3.bf16.msra.mxu0 %v11157_v23 }
0x1d04   :  { %9639 = vmatprep.mubr.msk.f32.mxu0 %vm10795_vm0, %v10796_v1  ;;  %10194 = vmatprep.subr.bf16.mxu0 %v10794_v0 }
0x1d05   :  { %9633 = vmatmul.mubr.msk.f32.vlgmr.msra.gmra.mrb[46].mxu1 %vm175_vm2, %v3623_v49 }
0x1d06   :  { %10193 = vmatpush3.bf16.msra.mxu1 %v11190_v21  ;;  %9646 = vmatprep.mubr.msk.f32.mxu1 %vm10795_vm0, %v10796_v1 }
0x1d07   :  { %10197 = vmatprep.subr.bf16.mxu1 %v10794_v0 }
0x1dd4   :  { %v3692_v50 = vpop.f32.mrb[44].mxu1  ;;  %v3762_v51 = vpop.f32.mrb[38].mxu0 }
0x1dd5   :  { %v3767_v52 = vrot.slane %v3692_v50, 4  ;;  %v3777_v53 = vrot.slane %v3762_v51, 4  ;;  %v9620_v12 = vpop.f32.mrb[45].mxu1  ;;  %v9627_v58 = vpop.f32.mrb[39].mxu0 }
0x1dd7   :  { %v3769_v59 = vadd.f32 %v3767_v52, %v11227_v10  ;;  %3778 = vrot.lane.b32.xlu1 %v3777_v53, %s10800_s23 }
0x1dd8   :  { %v3854_v60 = vpop.f32.mrb[46].mxu1 }
0x1dd9   :  { %v8905_v61 = vmul.f32 -1.442695, %v3769_v59  ;;  %v9634_v63 = vpop.f32.mrb[47].mxu1  ;;  %v3855_v6 = vadd.f32 %v11235_v32, %v3854_v60 }
0x1ddb   :  { %10547 = vpow2.f32 %v8905_v61  ;;  %v3859_v3 = vrot.slane %v3855_v6, 4 }
0x1de5   :  { %v10548_v7 = vpop.eup %10547 }
0x1de6   :  { %v3773_v2 = vadd.f32 1.0, %v10548_v7 }
0x1de8   :  { %10549 = vrcp.f32 %v3773_v2 }
0x1df2   :  { %v10550_v5 = vpop.eup %10549 }
0x1df3   :  { %v3861_v8 = vmul.f32 %v10550_v5, %v3859_v3 }
0x1df5   :  { %3863 = vrot.lane.b32.xlu0 %v3861_v8, %s10799_s2 }
0x1e49   :  { %v3779_v14 = vpop.permute.xlu1 %3778 }
0x1e4a   :  { %v3781_v15 = vadd.f32 %v3779_v14, %v11227_v10 }
0x1e4c   :  { %v8906_v16 = vmul.f32 -1.442695, %v3781_v15 }
0x1e67   :  { %v3864_v9 = vpop.permute.xlu0 %3863 }
0x1e68   :  { %v3866_v17 = vadd.f32 %v3864_v9, %v11227_v10 }
0x1e6a   :  { %10551 = vtanh.f32 %v3866_v17 }
0x1e6b   :  { %10553 = vpow2.f32 %v8906_v16 }
0x1e74   :  { %v10552_v11 = vpop.eup %10551 }
0x1e75   :  { %3870 = vrot.lane.b32.xlu0 %v10552_v11, %s10797_s27  ;;  %v10554_v18 = vpop.eup %10553 }
0x1e76   :  { %v3785_v20 = vadd.f32 1.0, %v10554_v18  ;;  %v2137_v18 = vrot.slane %v11219_v13, 2 }
0x1e78   :  { %10555 = vrcp.f32 %v3785_v20 }
0x1e82   :  { %v10556_v24 = vpop.eup %10555 }
0x1e83   :  { %v3868_v25 = vsub.f32 1.0, %v10556_v24  ;;  %v3876_v30 = vmul.f32 %v10556_v24, %v3874_v27 }
0x1ee7   :  { %v3871_v29 = vpop.permute.xlu0 %3870 }
0x1ee8   :  { %v3873_v33 = vmul.f32 %v3871_v29, %v3868_v25 }
0x1eea   :  { %v11378_v34 = vadd.f32 %v3876_v30, %v3873_v33 }
0x1eec   :  { %v3879_v37 = vrot.slane %v11378_v34, 4  ;;  %v4132_v5 = vrot.slane %v11378_v34, 2 }
0x1eee   :  { %3880 = vrot.lane.b32.xlu1 %v3879_v37, %s10797_s27 }
0x1f60   :  { %v3881_v38 = vpop.permute.xlu1 %3880 }
0x1f61   :  { %9640 = vmatmul.mubr.msk.f32.vlgmr.msra.gmra.mrb[40].mxu0 %vm175_vm2, %v3881_v38  ;;  %9647 = vmatmul.mubr.msk.f32.vlgmr.msra.gmra.mrb[48].mxu1 %vm175_vm2, %v3881_v38 }
0x1f62   :  { %10196 = vmatpush3.bf16.msra.mxu0 %v11195_v57  ;;  %9653 = vmatprep.mubr.msk.f32.mxu0 %vm10795_vm0, %v10796_v1 }
0x1f63   :  { %10200 = vmatprep.subr.bf16.mxu0 %v10794_v0  ;;  %10199 = vmatpush3.bf16.msra.mxu1 %v11157_v23 }
0x1f64   :  { %9660 = vmatprep.mubr.msk.f32.mxu1 %vm10795_vm0, %v10796_v1  ;;  %10203 = vmatprep.subr.bf16.mxu1 %v10794_v0 }
0x1f65   :  { %9654 = vmatmul.mubr.msk.f32.vlgmr.msra.gmra.mrb[42].mxu0 %vm175_vm2, %v3881_v38 }
0x1f66   :  { %10202 = vmatpush3.bf16.msra.mxu0 %v11190_v21  ;;  %9667 = vmatprep.mubr.msk.f32.mxu0 %vm10795_vm0, %v10796_v1 }
0x2034   :  { %v3950_v39 = vpop.f32.mrb[40].mxu0  ;;  %v4020_v40 = vpop.f32.mrb[48].mxu1 }
0x2035   :  { %v4025_v35 = vrot.slane %v3950_v39, 6  ;;  %v4035_v42 = vrot.slane %v4020_v40, 6  ;;  %v9641_v44 = vpop.f32.mrb[41].mxu0  ;;  %v9648_v45 = vpop.f32.mrb[49].mxu1 }
0x2036   :  { %v4429_v44 = vld [vmem:[%s11976_s10 + $0x8] sm:$0xff] }
0x2037   :  { %v4027_v23 = vadd.f32 %v4025_v35, %v11227_v10  ;;  %4036 = vrot.lane.b32.xlu1 %v4035_v42, %s10800_s23  ;;  %v4428_v42 = vld [vmem:[%s11976_s10] sm:$0xff] }
0x2038   :  { %v4112_v47 = vpop.f32.mrb[42].mxu0  ;;  %v10408_v45 = vpack.i.bf16 %v4429_v44, %v4428_v42 }
0x2039   :  { %v8910_v28 = vmul.f32 -1.442695, %v4027_v23  ;;  %v9655_v49 = vpop.f32.mrb[43].mxu0  ;;  %v4113_v21 = vadd.f32 %v11235_v32, %v4112_v47  ;;  %v11439_v23 = vpack.c.bf16 %v4429_v44, %v4428_v42 }
0x203b   :  { %10557 = vpow2.f32 %v8910_v28  ;;  %v4117_v52 = vrot.slane %v4113_v21, 6  ;;  %v4425_v21 = vld [vmem:[%s11975_s9 + $0x8] sm:$0xff] }
0x2045   :  { %v10558_v50 = vpop.eup %10557 }
0x2046   :  { %v4031_v51 = vadd.f32 1.0, %v10558_v50 }
0x2048   :  { %10559 = vrcp.f32 %v4031_v51  ;;  %v4424_v51 = vld [vmem:[%s11975_s9] sm:$0xff] }
0x2052   :  { %v10560_v53 = vpop.eup %10559 }
0x2053   :  { %v4119_v12 = vmul.f32 %v10560_v53, %v4117_v52  ;;  %v10206_v52 = vpack.c.bf16 %v4425_v21, %v4424_v51  ;;  %v4427_v53 = vld [vmem:[%s11975_s9 + $0x18] sm:$0xff] }
0x2055   :  { %4121 = vrot.lane.b32.xlu0 %v4119_v12, %s10799_s2  ;;  %10207 = vmatprep.subr.bf16.mxu0 %v10206_v52 }
0x20a9   :  { %v4037_v61 = vpop.permute.xlu1 %4036 }
0x20aa   :  { %v4039_v63 = vadd.f32 %v4037_v61, %v11227_v10 }
0x20ac   :  { %v8911_v7 = vmul.f32 -1.442695, %v4039_v63  ;;  %v2234_v63 = vrot.slane %v11169_v43, 6 }
0x20c7   :  { %v4122_v58 = vpop.permute.xlu0 %4121 }
0x20c8   :  { %v4124_v59 = vadd.f32 %v4122_v58, %v11227_v10 }
0x20ca   :  { %10561 = vtanh.f32 %v4124_v59 }
0x20cb   :  { %10563 = vpow2.f32 %v8911_v7 }
0x20d4   :  { %v10562_v60 = vpop.eup %10561 }
0x20d5   :  { %4128 = vrot.lane.b32.xlu0 %v10562_v60, %s10797_s27  ;;  %v10564_v2 = vpop.eup %10563 }
0x20d6   :  { %v4043_v6 = vadd.f32 1.0, %v10564_v2 }
0x20d8   :  { %10565 = vrcp.f32 %v4043_v6 }
0x20d9   :  { %2223 = vrot.lane.b32.xlu0 %v11237_v36, %s10799_s2 }
0x20e2   :  { %v10566_v3 = vpop.eup %10565 }
0x20e3   :  { %v4126_v8 = vsub.f32 1.0, %v10566_v3  ;;  %v4134_v11 = vmul.f32 %v10566_v3, %v4132_v5 }
0x2147   :  { %v4129_v9 = vpop.permute.xlu0 %4128 }
0x2148   :  { %v4131_v17 = vmul.f32 %v4129_v9, %v4126_v8 }
0x214a   :  { %v11406_v14 = vadd.f32 %v4134_v11, %v4131_v17 }
0x214b   :  { %v2224_v15 = vpop.permute.xlu0 %2223 }
0x214c   :  { %v2226_v36 = vadd.f32 %v2224_v15, %v10976_v26  ;;  %v4137_v16 = vrot.slane %v11406_v14, 2 }
0x214e   :  { %10567 = vtanh.f32 %v2226_v36  ;;  %4138 = vrot.lane.b32.xlu1 %v4137_v16, %s10797_s27 }
0x2152   :  { %2138 = vrot.lane.b32.xlu1 %v2137_v18, %s10800_s23 }
0x2158   :  { %v10568_v20 = vpop.eup %10567 }
0x2159   :  { %2230 = vrot.lane.b32.xlu1 %v10568_v20, %s10797_s27 }
0x215d   :  { %4392 = vrot.lane.b32.xlu1 %v11047_v4, %s10797_s27 }
0x21c0   :  { %v4139_v24 = vpop.permute.xlu1 %4138 }
0x21c1   :  { %9661 = vmatmul.mubr.msk.f32.vlgmr.msra.gmra.mrb[50].mxu1 %vm175_vm2, %v4139_v24  ;;  %9668 = vmatmul.mubr.msk.f32.vlgmr.msra.gmra.mrb[44].mxu0 %vm175_vm2, %v4139_v24 }
0x21c2   :  { %10205 = vmatpush3.bf16.msra.mxu1 %v11195_v57  ;;  %9674 = vmatprep.mubr.msk.f32.mxu1 %vm10795_vm0, %v10796_v1 }
0x21c3   :  { %10214 = vmatprep.subr.bf16.mxu1 %v10794_v0  ;;  %10209 = vmatpush3.bf16.msra.mxu0 %v10206_v52 }
0x21c5   :  { %9675 = vmatmul.mubr.msk.f32.vlgmr.msra.gmra.mrb[52].mxu1 %vm175_vm2, %v4139_v24 }
0x21c6   :  { %9692 = vmatprep.mubr.msk.f32.mxu1 %vm10795_vm0, %v10796_v1  ;;  %10216 = vmatpush3.bf16.msra.mxu1 %v11439_v23 }
0x21c7   :  { %10217 = vmatprep.subr.bf16.mxu1 %v10794_v0 }
0x21c9   :  { %9693 = vmatmul.mubr.f32.vlgmr.msra.gmra.mrb[54].mxu1 %v10796_v1 }
0x21ca   :  { %9699 = vmatprep.mubr.msk.f32.mxu1 %vm10795_vm0, %v10796_v1 }
0x2294   :  { %v4208_v13 = vpop.f32.mrb[50].mxu1  ;;  %v4278_v25 = vpop.f32.mrb[44].mxu0 }
0x2295   :  { %v4282_v4 = vadd.f32 %v4208_v13, %v11227_v10  ;;  %v9662_v27 = vpop.f32.mrb[51].mxu1  ;;  %v9669_v29 = vpop.f32.mrb[45].mxu0 }
0x2297   :  { %v8915_v30 = vmul.f32 -1.442695, %v4282_v4 }
0x2298   :  { %v4366_v33 = vpop.f32.mrb[52].mxu1 }
0x2299   :  { %10569 = vpow2.f32 %v8915_v30  ;;  %v9676_v57 = vpop.f32.mrb[53].mxu1  ;;  %v4367_v39 = vadd.f32 %v11235_v32, %v4366_v33 }
0x22a3   :  { %v10570_v37 = vpop.eup %10569 }
0x22a4   :  { %v4286_v38 = vadd.f32 1.0, %v10570_v37 }
0x22a6   :  { %10571 = vrcp.f32 %v4286_v38 }
0x22b0   :  { %v10572_v40 = vpop.eup %10571 }
0x22b1   :  { %v4370_v35 = vmul.f32 %v10572_v40, %v4367_v39  ;;  %v4401_v39 = vsel %vm175_vm2, %v11101_v19, %v11324_v62 }
0x22b3   :  { %4372 = vrot.lane.b32.xlu0 %v4370_v35, %s10799_s2 }
0x22b7   :  { %4290 = vrot.lane.b32.xlu0 %v4278_v25, %s10800_s23 }
0x22bb   :  { %4388 = vrot.lane.b32.xlu0 %v11020_v31, %s10797_s27  ;;  %v2139_v31 = vpop.permute.xlu1 %2138 }
0x22bc   :  { %v2141_v32 = vadd.f32 %v2139_v31, %v10976_v26  ;;  %v4426_v26 = vld [vmem:[%s11975_s9 + $0x10] sm:$0xff] }
0x22bd   :  { %v10210_v12 = vpack.c.bf16 %v4427_v53, %v4426_v26 }
0x22be   :  { %v8875_v47 = vmul.f32 -1.442695, %v2141_v32  ;;  %v8918_v32 = vld [vmem:[%s11977_s11] ss:$0 sm:$0xff]  ;;  %s8827_s11 = sshll.u32 %s10801_s1, 4  ;;  %s8828_s11 = int_to_ptr.vmem [resolvable:$true] %s8827_s11 }
0x22bf   :  { %4402 = vrot.lane.b32.xlu0 %v11128_v56, %s10797_s27  ;;  %10211 = vmatprep.subr.bf16.mxu0 %v10210_v12  ;;  %v2231_v61 = vpop.permute.xlu1 %2230  ;;  %s10765_s5 = scalar_lea.vmem %s8828_s11, 32  ;;  %p10770_p9 = scmp.lt.s32.totalorder %s8828_s11, %s8828_s11 }
0x22c0   :  { %10573 = vpow2.f32 %v8875_v47  ;;  %10213 = vmatpush3.bf16.msra.mxu0 %v10210_v12  ;;  %p10766_p8 = scmp.ne.s32.totalorder %s8828_s11, %s10765_s5  ;;  %p10771_p10 = scmp.lt.s32.totalorder %s10765_s5, %s10765_s5 }
0x22c1   :  { %10220 = vmatprep.subr.bf16.mxu0 %v10794_v0 }
0x22c2   :  { %p10772_p11 = por %p10771_p10, %p10770_p9 }
0x22c3   :  { %4406 = vrot.lane.b32.xlu0 %v11169_v43, %s10797_s27  ;;  %v4393_v36 = vpop.permute.xlu1 %4392 }
0x22c4   :  { %v4395_v37 = vsel %vm175_vm2, %v4393_v36, %v11378_v34  ;;  %p10773_p12 = pnand %p10772_p11, %p10766_p8 }
0x22c7   :  { %10404 = vrot.lane.b32.xlu0 %v10408_v45, %s10798_s28 }
0x22ca   :  { %v10574_v28 = vpop.eup %10573 }
0x22cb   :  { %v2145_v49 = vadd.f32 1.0, %v10574_v28 }
0x22cd   :  { %10575 = vrcp.f32 %v2145_v49 }
0x22d7   :  { %v10576_v58 = vpop.eup %10575 }
0x22d8   :  { %v2228_v59 = vsub.f32 1.0, %v10576_v58  ;;  %v2236_v2 = vmul.f32 %v10576_v58, %v2234_v63 }
0x22da   :  { %v2233_v7 = vmul.f32 %v2231_v61, %v2228_v59  ;;  %v11532_v59 = vld [vmem:[%s11978_s12] ss:$0 sm:$0xff] }
0x22dc   :  { %v2237_v6 = vadd.f32 %v2236_v2, %v2233_v7 }
0x2325   :  { %v4373_v56 = vpop.permute.xlu0 %4372 }
0x2326   :  { %v4375_v50 = vadd.f32 %v4373_v56, %v11227_v10 }
0x2328   :  { %10577 = vtanh.f32 %v4375_v50 }
0x2329   :  { %v4291_v3 = vpop.permute.xlu0 %4290 }
0x232a   :  { %v4293_v5 = vadd.f32 %v4291_v3, %v11227_v10 }
0x232c   :  { %v8916_v8 = vmul.f32 -1.442695, %v4293_v5 }
0x232d   :  { %v4389_v11 = vpop.permute.xlu0 %4388 }
0x232e   :  { %10579 = vpow2.f32 %v8916_v8  ;;  %v4391_v30 = vsel %vm175_vm2, %v4389_v11, %v11406_v14 }
0x2331   :  { %v4403_v43 = vpop.permute.xlu0 %4402 }
0x2332   :  { %v10578_v60 = vpop.eup %10577  ;;  %v4405_v33 = vsel %vm175_vm2, %v4403_v43, %v11298_v22 }
0x2333   :  { %4379 = vrot.lane.b32.xlu1 %v10578_v60, %s10797_s27  ;;  %v4421_v40 = vsel %vm4415_vm3, %v4401_v39, %v4405_v33 }
0x2335   :  { %v4407_v18 = vpop.permute.xlu0 %4406 }
0x2337   :  { %4396 = vrot.lane.b32.xlu1 %v11074_v46, %s10797_s27 }
0x2338   :  { %v10580_v9 = vpop.eup %10579 }
0x2339   :  { %v4297_v17 = vadd.f32 1.0, %v10580_v9  ;;  %v10405_v25 = vpop.permute.xlu0 %10404 }
0x233a   :  { %v10407_v27 = vunpack.i.h.bf16 %v10405_v25  ;;  %v10406_v29 = vunpack.i.l.bf16 %v10405_v25 }
0x233b   :  { %4411 = vrot.lane.b32.xlu1 %v2237_v6, %s10797_s27  ;;  %10581 = vrcp.f32 %v4297_v17 }
0x233c   :  { %v11492_v42 = vpack.c.bf16 %v10407_v27, %v10406_v29 }
0x233f   :  { %10409 = vrot.lane.b32.xlu1 %v10408_v45, %s10797_s27 }
0x2345   :  { %v10582_v15 = vpop.eup %10581 }
0x2346   :  { %v4377_v20 = vsub.f32 1.0, %v10582_v15  ;;  %v4384_v13 = vmul.f32 %v10582_v15, %v4137_v16  ;;  %v4409_v16 = vsel %vm175_vm2, %v4407_v18, %v11271_v41 }
0x2347   :  { %v4422_v34 = vsel %vm4417_vm5, %v4421_v40, %v4409_v16 }
0x23a5   :  { %v4380_v46 = vpop.permute.xlu1 %4379 }
0x23a6   :  { %v4382_v24 = vmul.f32 %v4380_v46, %v4377_v20 }
0x23a8   :  { %v4385_v4 = vadd.f32 %v4384_v13, %v4382_v24 }
0x23a9   :  { %v4397_v10 = vpop.permute.xlu1 %4396 }
0x23aa   :  { %v4387_v57 = vsel %vm175_vm2, %v10993_v55, %v4385_v4  ;;  %v4399_v14 = vsel %vm175_vm2, %v4397_v10, %v11351_v48 }
0x23ab   :  { %v4416_v38 = vsel %vm4415_vm3, %v4387_v57, %v4391_v30 }
0x23ac   :  { %v4418_v22 = vsel %vm4417_vm5, %v4416_v38, %v4395_v37 }
0x23ad   :  { %v4412_v35 = vpop.permute.xlu1 %4411  ;;  %v11490_v55 = vsel %vm4419_vm4, %v4418_v22, %v4399_v14 }
0x23ae   :  { %v4414_v44 = vsel %vm175_vm2, %v4412_v35, %v11244_v54  ;;  %9685 = vmatprep.mubr.msk.f32.mxu0 %vm93_vm1, %v11490_v55  ;;  %v4585_v54 = vpop.f32.mrb[54].mxu1 }
0x23af   :  { %v11498_v41 = vsel %vm4419_vm4, %v4422_v34, %v4414_v44  ;;  %v9694_v31 = vpop.f32.mrb[55].mxu1 }
0x23b0   :  { %9686 = vmatmul.mubr.msk.f32.vlgmr.msra.gmra.mrb[46].mxu0 %vm93_vm1, %v11498_v41 }
0x23b1   :  { %v10410_v19 = vpop.permute.xlu1 %10409  ;;  %10222 = vmatpush3.bf16.msra.mxu0 %v11492_v42  ;;  %9706 = vmatprep.mubr.msk.f32.mxu0 %vm10795_vm0, %v10796_v1 }
0x23b2   :  { %v10412_v62 = vunpack.i.h.bf16 %v10410_v19  ;;  %v10411_v48 = vunpack.i.l.bf16 %v10410_v19  ;;  %10226 = vmatprep.subr.bf16.mxu0 %v10794_v0 }
0x23b4   :  { %v11506_v45 = vpack.c.bf16 %v10412_v62, %v10411_v48  ;;  %9707 = vmatmul.mubr.f32.vlgmr.msra.gmra.mrb[48].mxu0 %v10796_v1 }
0x23b5   :  { %9720 = vmatprep.mubr.msk.f32.mxu0 %vm10795_vm0, %v10796_v1 }
0x23b6   :  { %10219 = vmatpush3.bf16.msra.mxu1 %v11506_v45  ;;  %10228 = vmatpush3.bf16.msra.mxu0 %v11506_v45 }
0x23b7   :  { %10223 = vmatprep.subr.bf16.mxu1 %v10794_v0  ;;  %10232 = vmatprep.subr.bf16.mxu0 %v10794_v0 }
0x23b9   :  { %9700 = vmatmul.mubr.f32.vlgmr.msra.gmra.mrb[56].mxu1 %v10796_v1 }
0x23ba   :  { %10225 = vmatpush3.bf16.msra.mxu1 %v11439_v23  ;;  %9713 = vmatprep.mubr.msk.f32.mxu1 %vm10795_vm0, %v10796_v1 }
0x23bb   :  { %10229 = vmatprep.subr.bf16.mxu1 %v10794_v0 }
0x2483   :  { %v9687_v47 = vpop.f32.mrb[46].mxu0 }
0x2484   :  { %v11523_v28 = vadd.f32 %v9687_v47, %v8918_v32  ;;  %v4510_v49 = vpop.f32.mrb[47].mxu0 }
0x2485   :  { %v11525_v56 = vadd.f32 %v8918_v32, %v4510_v49 }
0x2487   :  { %v4667_v50 = vadd.f32 %v4585_v54, %v11525_v56  ;;  %v4763_v51 = vpop.f32.mrb[48].mxu0 }
0x2488   :  { %v9708_v21 = vpop.f32.mrb[49].mxu0  ;;  %v4764_v60 = vadd.f32 %v11532_v59, %v4763_v51 }
0x2489   :  { %v8921_v52 = vmul.f32 -1.442695, %v4667_v50 }
0x248b   :  { %10583 = vpow2.f32 %v8921_v52 }
0x248c   :  { %v4663_v26 = vpop.f32.mrb[56].mxu1 }
0x248d   :  { %4675 = vrot.lane.b32.xlu1 %v4663_v26, %s10800_s23  ;;  %v9701_v53 = vpop.f32.mrb[57].mxu1 }
0x2495   :  { %v10584_v12 = vpop.eup %10583 }
0x2496   :  { %v4671_v58 = vadd.f32 1.0, %v10584_v12 }
0x2498   :  { %10585 = vrcp.f32 %v4671_v58 }
0x24a2   :  { %v10586_v61 = vpop.eup %10585 }
0x24a3   :  { %v4767_v63 = vmul.f32 %v10586_v61, %v4764_v60 }
0x24a5   :  { %4769 = vrot.lane.b32.xlu0 %v4767_v63, %s10799_s2 }
0x24ff   :  { %v4676_v3 = vpop.permute.xlu1 %4675 }
0x2500   :  { %v4678_v5 = vadd.f32 %v4676_v3, %v11525_v56 }
0x2502   :  { %v8922_v8 = vmul.f32 -1.442695, %v4678_v5 }
0x2517   :  { %v4770_v7 = vpop.permute.xlu0 %4769 }
0x2518   :  { %v4772_v2 = vadd.f32 %v4770_v7, %v11525_v56 }
0x251a   :  { %10587 = vtanh.f32 %v4772_v2 }
0x251b   :  { %10589 = vpow2.f32 %v8922_v8 }
0x2524   :  { %v10588_v6 = vpop.eup %10587 }
0x2525   :  { %4776 = vrot.lane.b32.xlu0 %v10588_v6, %s10797_s27  ;;  %v10590_v9 = vpop.eup %10589 }
0x2526   :  { %v4682_v17 = vadd.f32 1.0, %v10590_v9 }
0x2528   :  { %10591 = vrcp.f32 %v4682_v17 }
0x2532   :  { %v10592_v11 = vpop.eup %10591 }
0x2533   :  { %v4774_v43 = vsub.f32 1.0, %v10592_v11  ;;  %v4780_v18 = vmul.f32 0.0, %v10592_v11 }
0x2597   :  { %v4777_v15 = vpop.permute.xlu0 %4776 }
0x2598   :  { %v4779_v36 = vmul.f32 %v4777_v15, %v4774_v43 }
0x259a   :  { %v4781_v20 = vadd.f32 %v4780_v18, %v4779_v36 }
0x259c   :  { %4783 = vrot.lane.b32.xlu1 %v4781_v20, %s10797_s27  ;;  %v5035_v32 = vrot.slane %v4781_v20, 6 }
0x260e   :  { %v4784_v46 = vpop.permute.xlu1 %4783 }
0x260f   :  { %9714 = vmatmul.mubr.msk.f32.vlgmr.msra.gmra.mrb[58].mxu1 %vm175_vm2, %v4784_v46  ;;  %9721 = vmatmul.mubr.msk.f32.vlgmr.msra.gmra.mrb[50].mxu0 %vm175_vm2, %v4784_v46 }
0x2610   :  { %10231 = vmatpush3.bf16.msra.mxu1 %v11492_v42  ;;  %9727 = vmatprep.mubr.msk.f32.mxu1 %vm10795_vm0, %v10796_v1 }
0x2611   :  { %10235 = vmatprep.subr.bf16.mxu1 %v10794_v0  ;;  %10234 = vmatpush3.bf16.msra.mxu0 %v11439_v23 }
0x2612   :  { %9734 = vmatprep.mubr.msk.f32.mxu0 %vm10795_vm0, %v10796_v1  ;;  %10238 = vmatprep.subr.bf16.mxu0 %v10794_v0 }
0x2613   :  { %9728 = vmatmul.mubr.msk.f32.vlgmr.msra.gmra.mrb[60].mxu1 %vm175_vm2, %v4784_v46 }
0x2614   :  { %10237 = vmatpush3.bf16.msra.mxu1 %v11506_v45  ;;  %9741 = vmatprep.mubr.msk.f32.mxu1 %vm10795_vm0, %v10796_v1 }
0x2615   :  { %10241 = vmatprep.subr.bf16.mxu1 %v10794_v0 }
0x26e2   :  { %v4853_v24 = vpop.f32.mrb[58].mxu1  ;;  %v4923_v13 = vpop.f32.mrb[50].mxu0 }
0x26e3   :  { %v4928_v25 = vrot.slane %v4853_v24, 6  ;;  %v4938_v4 = vrot.slane %v4923_v13, 6  ;;  %v9715_v10 = vpop.f32.mrb[59].mxu1  ;;  %v9722_v27 = vpop.f32.mrb[51].mxu0 }
0x26e5   :  { %v4930_v29 = vadd.f32 %v4928_v25, %v11525_v56  ;;  %4939 = vrot.lane.b32.xlu1 %v4938_v4, %s10800_s23 }
0x26e6   :  { %v5015_v30 = vpop.f32.mrb[60].mxu1 }
0x26e7   :  { %v8926_v33 = vmul.f32 -1.442695, %v4930_v29  ;;  %v9729_v57 = vpop.f32.mrb[61].mxu1  ;;  %v5016_v38 = vadd.f32 %v11532_v59, %v5015_v30 }
0x26e9   :  { %10593 = vpow2.f32 %v8926_v33  ;;  %v5020_v39 = vrot.slane %v5016_v38, 6 }
0x26f3   :  { %v10594_v37 = vpop.eup %10593 }
0x26f4   :  { %v4934_v16 = vadd.f32 1.0, %v10594_v37 }
0x26f6   :  { %10595 = vrcp.f32 %v4934_v16 }
0x2700   :  { %v10596_v14 = vpop.eup %10595 }
0x2701   :  { %v5022_v22 = vmul.f32 %v10596_v14, %v5020_v39 }
0x2703   :  { %5024 = vrot.lane.b32.xlu0 %v5022_v22, %s10799_s2 }
0x2757   :  { %v4940_v44 = vpop.permute.xlu1 %4939 }
0x2758   :  { %v4942_v19 = vadd.f32 %v4940_v44, %v11525_v56 }
0x275a   :  { %v8927_v62 = vmul.f32 -1.442695, %v4942_v19 }
0x2775   :  { %v5025_v40 = vpop.permute.xlu0 %5024 }
0x2776   :  { %v5027_v35 = vadd.f32 %v5025_v40, %v11525_v56 }
0x2778   :  { %10597 = vtanh.f32 %v5027_v35 }
0x2779   :  { %10599 = vpow2.f32 %v8927_v62 }
0x2782   :  { %v10598_v34 = vpop.eup %10597 }
0x2783   :  { %5031 = vrot.lane.b32.xlu0 %v10598_v34, %s10797_s27  ;;  %v10600_v48 = vpop.eup %10599 }
0x2784   :  { %v4946_v54 = vadd.f32 1.0, %v10600_v48 }
0x2786   :  { %10601 = vrcp.f32 %v4946_v54 }
0x2790   :  { %v10602_v31 = vpop.eup %10601 }
0x2791   :  { %v5029_v47 = vsub.f32 1.0, %v10602_v31  ;;  %v5037_v50 = vmul.f32 %v10602_v31, %v5035_v32 }
0x27f5   :  { %v5032_v49 = vpop.permute.xlu0 %5031 }
0x27f6   :  { %v5034_v51 = vmul.f32 %v5032_v49, %v5029_v47 }
0x27f8   :  { %v5038_v21 = vadd.f32 %v5037_v50, %v5034_v51 }
0x27fa   :  { %v5040_v52 = vrot.slane %v5038_v21, 2  ;;  %v5293_v10 = vrot.slane %v5038_v21, 6 }
0x27fc   :  { %5041 = vrot.lane.b32.xlu1 %v5040_v52, %s10797_s27 }
0x286e   :  { %v5042_v26 = vpop.permute.xlu1 %5041 }
0x286f   :  { %9735 = vmatmul.mubr.msk.f32.vlgmr.msra.gmra.mrb[52].mxu0 %vm175_vm2, %v5042_v26  ;;  %9742 = vmatmul.mubr.msk.f32.vlgmr.msra.gmra.mrb[62].mxu1 %vm175_vm2, %v5042_v26 }
0x2870   :  { %10240 = vmatpush3.bf16.msra.mxu0 %v11492_v42  ;;  %9748 = vmatprep.mubr.msk.f32.mxu0 %vm10795_vm0, %v10796_v1 }
0x2871   :  { %10244 = vmatprep.subr.bf16.mxu0 %v10794_v0  ;;  %10243 = vmatpush3.bf16.msra.mxu1 %v11439_v23 }
0x2872   :  { %9755 = vmatprep.mubr.msk.f32.mxu1 %vm10795_vm0, %v10796_v1  ;;  %10247 = vmatprep.subr.bf16.mxu1 %v10794_v0 }
0x2873   :  { %9749 = vmatmul.mubr.msk.f32.vlgmr.msra.gmra.mrb[54].mxu0 %vm175_vm2, %v5042_v26 }
0x2874   :  { %10246 = vmatpush3.bf16.msra.mxu0 %v11506_v45  ;;  %9762 = vmatprep.mubr.msk.f32.mxu0 %vm10795_vm0, %v10796_v1 }
0x2875   :  { %10250 = vmatprep.subr.bf16.mxu0 %v10794_v0 }
0x2942   :  { %v5111_v53 = vpop.f32.mrb[52].mxu0  ;;  %v5181_v12 = vpop.f32.mrb[62].mxu1 }
0x2943   :  { %v5186_v58 = vrot.slane %v5111_v53, 4  ;;  %v5196_v60 = vrot.slane %v5181_v12, 4  ;;  %v9736_v61 = vpop.f32.mrb[53].mxu0  ;;  %v9743_v63 = vpop.f32.mrb[63].mxu1 }
0x2945   :  { %v5188_v7 = vadd.f32 %v5186_v58, %v11525_v56  ;;  %5197 = vrot.lane.b32.xlu1 %v5196_v60, %s10800_s23 }
0x2946   :  { %v5273_v2 = vpop.f32.mrb[54].mxu0 }
0x2947   :  { %v8931_v6 = vmul.f32 -1.442695, %v5188_v7  ;;  %v9750_v3 = vpop.f32.mrb[55].mxu0  ;;  %v5274_v9 = vadd.f32 %v11532_v59, %v5273_v2 }
0x2949   :  { %10603 = vpow2.f32 %v8931_v6  ;;  %v5278_v17 = vrot.slane %v5274_v9, 4 }
0x2953   :  { %v10604_v5 = vpop.eup %10603 }
0x2954   :  { %v5192_v8 = vadd.f32 1.0, %v10604_v5 }
0x2956   :  { %10605 = vrcp.f32 %v5192_v8 }
0x2960   :  { %v10606_v11 = vpop.eup %10605 }
0x2961   :  { %v5280_v43 = vmul.f32 %v10606_v11, %v5278_v17 }
0x2963   :  { %5282 = vrot.lane.b32.xlu0 %v5280_v43, %s10799_s2 }
0x29b7   :  { %v5198_v20 = vpop.permute.xlu1 %5197 }
0x29b8   :  { %v5200_v46 = vadd.f32 %v5198_v20, %v11525_v56 }
0x29ba   :  { %v8932_v24 = vmul.f32 -1.442695, %v5200_v46 }
0x29d5   :  { %v5283_v15 = vpop.permute.xlu0 %5282 }
0x29d6   :  { %v5285_v36 = vadd.f32 %v5283_v15, %v11525_v56 }
0x29d8   :  { %10607 = vtanh.f32 %v5285_v36 }
0x29d9   :  { %10609 = vpow2.f32 %v8932_v24 }
0x29e2   :  { %v10608_v18 = vpop.eup %10607 }
0x29e3   :  { %5289 = vrot.lane.b32.xlu0 %v10608_v18, %s10797_s27  ;;  %v10610_v13 = vpop.eup %10609 }
0x29e4   :  { %v5204_v25 = vadd.f32 1.0, %v10610_v13 }
0x29e6   :  { %10611 = vrcp.f32 %v5204_v25 }
0x29f0   :  { %v10612_v4 = vpop.eup %10611 }
0x29f1   :  { %v5287_v27 = vsub.f32 1.0, %v10612_v4  ;;  %v5295_v33 = vmul.f32 %v10612_v4, %v5293_v10 }
0x2a55   :  { %v5290_v29 = vpop.permute.xlu0 %5289 }
0x2a56   :  { %v5292_v30 = vmul.f32 %v5290_v29, %v5287_v27 }
0x2a58   :  { %v5296_v57 = vadd.f32 %v5295_v33, %v5292_v30 }
0x2a5a   :  { %v5298_v37 = vrot.slane %v5296_v57, 4  ;;  %v5551_v61 = vrot.slane %v5296_v57, 6 }
0x2a5c   :  { %5299 = vrot.lane.b32.xlu1 %v5298_v37, %s10797_s27 }
0x2ace   :  { %v5300_v16 = vpop.permute.xlu1 %5299 }
0x2acf   :  { %9756 = vmatmul.mubr.msk.f32.vlgmr.msra.gmra.mrb[64].mxu1 %vm175_vm2, %v5300_v16  ;;  %9763 = vmatmul.mubr.msk.f32.vlgmr.msra.gmra.mrb[56].mxu0 %vm175_vm2, %v5300_v16 }
0x2ad0   :  { %10249 = vmatpush3.bf16.msra.mxu1 %v11492_v42  ;;  %9769 = vmatprep.mubr.msk.f32.mxu1 %vm10795_vm0, %v10796_v1 }
0x2ad1   :  { %10253 = vmatprep.subr.bf16.mxu1 %v10794_v0  ;;  %10252 = vmatpush3.bf16.msra.mxu0 %v11439_v23 }
0x2ad2   :  { %9776 = vmatprep.mubr.msk.f32.mxu0 %vm10795_vm0, %v10796_v1  ;;  %10256 = vmatprep.subr.bf16.mxu0 %v10794_v0 }
0x2ad3   :  { %9770 = vmatmul.mubr.msk.f32.vlgmr.msra.gmra.mrb[66].mxu1 %vm175_vm2, %v5300_v16 }
0x2ad4   :  { %10255 = vmatpush3.bf16.msra.mxu1 %v11506_v45  ;;  %9783 = vmatprep.mubr.msk.f32.mxu1 %vm10795_vm0, %v10796_v1 }
0x2ad5   :  { %10259 = vmatprep.subr.bf16.mxu1 %v10794_v0 }
0x2ba2   :  { %v5369_v38 = vpop.f32.mrb[64].mxu1  ;;  %v5439_v39 = vpop.f32.mrb[56].mxu0 }
0x2ba3   :  { %v5444_v14 = vrot.slane %v5369_v38, 2  ;;  %v5454_v22 = vrot.slane %v5439_v39, 2  ;;  %v9757_v40 = vpop.f32.mrb[65].mxu1  ;;  %v9764_v35 = vpop.f32.mrb[57].mxu0 }
0x2ba5   :  { %v5446_v34 = vadd.f32 %v5444_v14, %v11525_v56  ;;  %5455 = vrot.lane.b32.xlu1 %v5454_v22, %s10800_s23 }
0x2ba6   :  { %v5531_v44 = vpop.f32.mrb[66].mxu1 }
0x2ba7   :  { %v8936_v19 = vmul.f32 -1.442695, %v5446_v34  ;;  %v9771_v62 = vpop.f32.mrb[67].mxu1  ;;  %v5532_v31 = vadd.f32 %v11532_v59, %v5531_v44 }
0x2ba9   :  { %10613 = vpow2.f32 %v8936_v19  ;;  %v5536_v32 = vrot.slane %v5532_v31, 2 }
0x2bb3   :  { %v10614_v48 = vpop.eup %10613 }
0x2bb4   :  { %v5450_v54 = vadd.f32 1.0, %v10614_v48 }
0x2bb6   :  { %10615 = vrcp.f32 %v5450_v54 }
0x2bc0   :  { %v10616_v47 = vpop.eup %10615 }
0x2bc1   :  { %v5538_v49 = vmul.f32 %v10616_v47, %v5536_v32 }
0x2bc3   :  { %5540 = vrot.lane.b32.xlu0 %v5538_v49, %s10799_s2 }
0x2c17   :  { %v5456_v52 = vpop.permute.xlu1 %5455 }
0x2c18   :  { %v5458_v26 = vadd.f32 %v5456_v52, %v11525_v56 }
0x2c1a   :  { %v8937_v53 = vmul.f32 -1.442695, %v5458_v26 }
0x2c35   :  { %v5541_v50 = vpop.permute.xlu0 %5540 }
0x2c36   :  { %v5543_v51 = vadd.f32 %v5541_v50, %v11525_v56 }
0x2c38   :  { %10617 = vtanh.f32 %v5543_v51 }
0x2c39   :  { %10619 = vpow2.f32 %v8937_v53 }
0x2c42   :  { %v10618_v21 = vpop.eup %10617 }
0x2c43   :  { %5547 = vrot.lane.b32.xlu0 %v10618_v21, %s10797_s27  ;;  %v10620_v12 = vpop.eup %10619 }
0x2c44   :  { %v5462_v58 = vadd.f32 1.0, %v10620_v12 }
0x2c46   :  { %10621 = vrcp.f32 %v5462_v58 }
0x2c50   :  { %v10622_v60 = vpop.eup %10621 }
0x2c51   :  { %v5545_v63 = vsub.f32 1.0, %v10622_v60  ;;  %v5553_v2 = vmul.f32 %v10622_v60, %v5551_v61 }
0x2cb5   :  { %v5548_v7 = vpop.permute.xlu0 %5547 }
0x2cb6   :  { %v5550_v6 = vmul.f32 %v5548_v7, %v5545_v63 }
0x2cb8   :  { %v5554_v3 = vadd.f32 %v5553_v2, %v5550_v6 }
0x2cba   :  { %v5556_v5 = vrot.slane %v5554_v3, 6 }
0x2cbc   :  { %5557 = vrot.lane.b32.xlu1 %v5556_v5, %s10797_s27 }
0x2d2e   :  { %v5558_v8 = vpop.permute.xlu1 %5557 }
0x2d2f   :  { %9777 = vmatmul.mubr.msk.f32.vlgmr.msra.gmra.mrb[58].mxu0 %vm175_vm2, %v5558_v8  ;;  %9784 = vmatmul.mubr.msk.f32.vlgmr.msra.gmra.mrb[68].mxu1 %vm175_vm2, %v5558_v8 }
0x2d30   :  { %10258 = vmatpush3.bf16.msra.mxu0 %v11492_v42  ;;  %9790 = vmatprep.mubr.msk.f32.mxu0 %vm10795_vm0, %v10796_v1 }
0x2d31   :  { %10262 = vmatprep.subr.bf16.mxu0 %v10794_v0  ;;  %10261 = vmatpush3.bf16.msra.mxu1 %v11439_v23 }
0x2d32   :  { %9797 = vmatprep.mubr.msk.f32.mxu1 %vm10795_vm0, %v10796_v1  ;;  %10265 = vmatprep.subr.bf16.mxu1 %v10794_v0 }
0x2d33   :  { %9791 = vmatmul.mubr.msk.f32.vlgmr.msra.gmra.mrb[60].mxu0 %vm175_vm2, %v5558_v8 }
0x2d34   :  { %10264 = vmatpush3.bf16.msra.mxu0 %v11506_v45  ;;  %9804 = vmatprep.mubr.msk.f32.mxu0 %vm10795_vm0, %v10796_v1 }
0x2d35   :  { %10268 = vmatprep.subr.bf16.mxu0 %v10794_v0 }
0x2e02   :  { %v5627_v56 = vpop.f32.mrb[58].mxu0  ;;  %v5697_v9 = vpop.f32.mrb[68].mxu1 }
0x2e03   :  { %v5701_v17 = vadd.f32 %v5627_v56, %v11523_v28  ;;  %v9778_v11 = vpop.f32.mrb[59].mxu0  ;;  %5709 = vrot.lane.b32.xlu1 %v5697_v9, %s10800_s23  ;;  %v9785_v43 = vpop.f32.mrb[69].mxu1 }
0x2e05   :  { %v8941_v15 = vmul.f32 -1.442695, %v5701_v17 }
0x2e06   :  { %v5785_v36 = vpop.f32.mrb[60].mxu0 }
0x2e07   :  { %10623 = vpow2.f32 %v8941_v15  ;;  %v9792_v18 = vpop.f32.mrb[61].mxu0  ;;  %v5786_v24 = vadd.f32 %v11532_v59, %v5785_v36 }
0x2e11   :  { %v10624_v20 = vpop.eup %10623 }
0x2e12   :  { %v5705_v46 = vadd.f32 1.0, %v10624_v20 }
0x2e14   :  { %10625 = vrcp.f32 %v5705_v46 }
0x2e1e   :  { %v10626_v13 = vpop.eup %10625 }
0x2e1f   :  { %v5789_v25 = vmul.f32 %v10626_v13, %v5786_v24 }
0x2e21   :  { %5791 = vrot.lane.b32.xlu0 %v5789_v25, %s10799_s2 }
0x2e75   :  { %v5710_v29 = vpop.permute.xlu1 %5709 }
0x2e76   :  { %v5712_v30 = vadd.f32 %v5710_v29, %v11523_v28 }
0x2e78   :  { %v8942_v33 = vmul.f32 -1.442695, %v5712_v30 }
0x2e93   :  { %v5792_v4 = vpop.permute.xlu0 %5791 }
0x2e94   :  { %v5794_v10 = vadd.f32 %v5792_v4, %v11523_v28 }
0x2e96   :  { %10627 = vtanh.f32 %v5794_v10 }
0x2e97   :  { %10629 = vpow2.f32 %v8942_v33 }
0x2ea0   :  { %v10628_v27 = vpop.eup %10627 }
0x2ea1   :  { %5798 = vrot.lane.b32.xlu0 %v10628_v27, %s10797_s27  ;;  %v10630_v57 = vpop.eup %10629 }
0x2ea2   :  { %v5716_v37 = vadd.f32 1.0, %v10630_v57 }
0x2ea4   :  { %10631 = vrcp.f32 %v5716_v37 }
0x2eae   :  { %v10632_v16 = vpop.eup %10631 }
0x2eaf   :  { %v5796_v38 = vsub.f32 1.0, %v10632_v16  ;;  %v5803_v22 = vmul.f32 %v10632_v16, %v5556_v5 }
0x2f13   :  { %v5799_v39 = vpop.permute.xlu0 %5798 }
0x2f14   :  { %v5801_v14 = vmul.f32 %v5799_v39, %v5796_v38  ;;  %v6582_v38 = vld [vmem:[%s11980_s14] sm:$0xff]  ;;  %v6583_v39 = vld [vmem:[%s11980_s14 + $0x8] sm:$0xff] }
0x2f16   :  { %v5804_v40 = vadd.f32 %v5803_v22, %v5801_v14  ;;  %v10418_v14 = vpack.i.bf16 %v6583_v39, %v6582_v38  ;;  %v11680_v22 = vpack.c.bf16 %v6583_v39, %v6582_v38 }
0x2f18   :  { %5806 = vrot.lane.b32.xlu1 %v5804_v40, %s10797_s27  ;;  %v6058_v5 = vrot.slane %v5804_v40, 6  ;;  %v6578_v40 = vld [vmem:[%s11979_s13] sm:$0xff] }
0x2f8a   :  { %v5807_v35 = vpop.permute.xlu1 %5806 }
0x2f8b   :  { %9798 = vmatmul.mubr.msk.f32.vlgmr.msra.gmra.mrb[70].mxu1 %vm175_vm2, %v5807_v35  ;;  %9805 = vmatmul.mubr.msk.f32.vlgmr.msra.gmra.mrb[62].mxu0 %vm175_vm2, %v5807_v35 }
0x2f8c   :  { %10267 = vmatpush3.bf16.msra.mxu1 %v11492_v42  ;;  %9811 = vmatprep.mubr.msk.f32.mxu1 %vm10795_vm0, %v10796_v1 }
0x2f8d   :  { %10271 = vmatprep.subr.bf16.mxu1 %v10794_v0  ;;  %10270 = vmatpush3.bf16.msra.mxu0 %v11439_v23 }
0x2f8e   :  { %9818 = vmatprep.mubr.msk.f32.mxu0 %vm10795_vm0, %v10796_v1  ;;  %10274 = vmatprep.subr.bf16.mxu0 %v10794_v0 }
0x2f8f   :  { %9812 = vmatmul.mubr.msk.f32.vlgmr.msra.gmra.mrb[72].mxu1 %vm175_vm2, %v5807_v35  ;;  %v6579_v35 = vld [vmem:[%s11979_s13 + $0x8] sm:$0xff] }
0x2f90   :  { %10273 = vmatpush3.bf16.msra.mxu1 %v11506_v45  ;;  %9825 = vmatprep.mubr.msk.f32.mxu1 %vm10795_vm0, %v10796_v1 }
0x2f91   :  { %10277 = vmatprep.subr.bf16.mxu1 %v10794_v0 }
0x305e   :  { %v5876_v34 = vpop.f32.mrb[70].mxu1  ;;  %v5946_v44 = vpop.f32.mrb[62].mxu0 }
0x305f   :  { %v5951_v19 = vrot.slane %v5876_v34, 6  ;;  %v5961_v62 = vrot.slane %v5946_v44, 6  ;;  %v9799_v48 = vpop.f32.mrb[71].mxu1  ;;  %v9806_v54 = vpop.f32.mrb[63].mxu0  ;;  %v10286_v34 = vpack.c.bf16 %v6579_v35, %v6578_v40 }
0x3061   :  { %v5953_v31 = vadd.f32 %v5951_v19, %v11523_v28  ;;  %5962 = vrot.lane.b32.xlu1 %v5961_v62, %s10800_s23 }
0x3062   :  { %v6038_v32 = vpop.f32.mrb[72].mxu1 }
0x3063   :  { %v8946_v47 = vmul.f32 -1.442695, %v5953_v31  ;;  %v9813_v49 = vpop.f32.mrb[73].mxu1  ;;  %v6039_v21 = vadd.f32 %v11532_v59, %v6038_v32 }
0x3065   :  { %10633 = vpow2.f32 %v8946_v47  ;;  %v6043_v52 = vrot.slane %v6039_v21, 6 }
0x306f   :  { %v10634_v50 = vpop.eup %10633 }
0x3070   :  { %v5957_v51 = vadd.f32 1.0, %v10634_v50 }
0x3072   :  { %10635 = vrcp.f32 %v5957_v51 }
0x307c   :  { %v10636_v26 = vpop.eup %10635 }
0x307d   :  { %v6045_v53 = vmul.f32 %v10636_v26, %v6043_v52 }
0x307f   :  { %6047 = vrot.lane.b32.xlu0 %v6045_v53, %s10799_s2  ;;  %v6580_v53 = vld [vmem:[%s11979_s13 + $0x10] sm:$0xff] }
0x30d3   :  { %v5963_v61 = vpop.permute.xlu1 %5962 }
0x30d4   :  { %v5965_v63 = vadd.f32 %v5963_v61, %v11523_v28 }
0x30d6   :  { %v8947_v7 = vmul.f32 -1.442695, %v5965_v63 }
0x30f1   :  { %v6048_v12 = vpop.permute.xlu0 %6047 }
0x30f2   :  { %v6050_v58 = vadd.f32 %v6048_v12, %v11523_v28  ;;  %v6581_v12 = vld [vmem:[%s11979_s13 + $0x18] sm:$0xff] }
0x30f4   :  { %10637 = vtanh.f32 %v6050_v58 }
0x30f5   :  { %10639 = vpow2.f32 %v8947_v7 }
0x30fe   :  { %v10638_v60 = vpop.eup %10637 }
0x30ff   :  { %6054 = vrot.lane.b32.xlu0 %v10638_v60, %s10797_s27  ;;  %v10640_v2 = vpop.eup %10639  ;;  %v10290_v60 = vpack.c.bf16 %v6581_v12, %v6580_v53 }
0x3100   :  { %v5969_v6 = vadd.f32 1.0, %v10640_v2 }
0x3102   :  { %10641 = vrcp.f32 %v5969_v6 }
0x310c   :  { %v10642_v3 = vpop.eup %10641 }
0x310d   :  { %v6052_v8 = vsub.f32 1.0, %v10642_v3  ;;  %v6060_v9 = vmul.f32 %v10642_v3, %v6058_v5 }
0x3171   :  { %v6055_v56 = vpop.permute.xlu0 %6054 }
0x3172   :  { %v6057_v17 = vmul.f32 %v6055_v56, %v6052_v8 }
0x3174   :  { %v6061_v11 = vadd.f32 %v6060_v9, %v6057_v17 }
0x3176   :  { %v6063_v43 = vrot.slane %v6061_v11, 2  ;;  %v6316_v47 = vrot.slane %v6061_v11, 6 }
0x3178   :  { %6064 = vrot.lane.b32.xlu1 %v6063_v43, %s10797_s27 }
0x31ea   :  { %v6065_v15 = vpop.permute.xlu1 %6064 }
0x31eb   :  { %9819 = vmatmul.mubr.msk.f32.vlgmr.msra.gmra.mrb[64].mxu0 %vm175_vm2, %v6065_v15  ;;  %9826 = vmatmul.mubr.msk.f32.vlgmr.msra.gmra.mrb[74].mxu1 %vm175_vm2, %v6065_v15 }
0x31ec   :  { %10276 = vmatpush3.bf16.msra.mxu0 %v11492_v42  ;;  %9832 = vmatprep.mubr.msk.f32.mxu0 %vm10795_vm0, %v10796_v1 }
0x31ed   :  { %10280 = vmatprep.subr.bf16.mxu0 %v10794_v0  ;;  %10279 = vmatpush3.bf16.msra.mxu1 %v11439_v23 }
0x31ee   :  { %9839 = vmatprep.mubr.msk.f32.mxu1 %vm10795_vm0, %v10796_v1  ;;  %10283 = vmatprep.subr.bf16.mxu1 %v10794_v0 }
0x31ef   :  { %9833 = vmatmul.mubr.msk.f32.vlgmr.msra.gmra.mrb[66].mxu0 %vm175_vm2, %v6065_v15 }
0x31f0   :  { %10282 = vmatpush3.bf16.msra.mxu0 %v11506_v45  ;;  %9846 = vmatprep.mubr.msk.f32.mxu0 %vm10795_vm0, %v10796_v1 }
0x31f1   :  { %10287 = vmatprep.subr.bf16.mxu0 %v10286_v34 }
0x32be   :  { %v6134_v36 = vpop.f32.mrb[64].mxu0  ;;  %v6204_v18 = vpop.f32.mrb[74].mxu1 }
0x32bf   :  { %v6209_v20 = vrot.slane %v6134_v36, 4  ;;  %v6219_v46 = vrot.slane %v6204_v18, 4  ;;  %v9820_v24 = vpop.f32.mrb[65].mxu0  ;;  %v9827_v13 = vpop.f32.mrb[75].mxu1  ;;  %v8959_v36 = vld [vmem:[%s11981_s15] ss:$0 sm:$0xff] }
0x32c1   :  { %v6211_v23 = vadd.f32 %v6209_v20, %v11523_v28  ;;  %6220 = vrot.lane.b32.xlu1 %v6219_v46, %s10800_s23 }
0x32c2   :  { %v6296_v25 = vpop.f32.mrb[66].mxu0 }
0x32c3   :  { %v8951_v4 = vmul.f32 -1.442695, %v6211_v23  ;;  %v9834_v10 = vpop.f32.mrb[67].mxu0  ;;  %v6297_v45 = vadd.f32 %v11532_v59, %v6296_v25 }
0x32c5   :  { %10643 = vpow2.f32 %v8951_v4  ;;  %v6301_v30 = vrot.slane %v6297_v45, 4 }
0x32cf   :  { %v10644_v27 = vpop.eup %10643 }
0x32d0   :  { %v6215_v29 = vadd.f32 1.0, %v10644_v27 }
0x32d2   :  { %10645 = vrcp.f32 %v6215_v29 }
0x32dc   :  { %v10646_v33 = vpop.eup %10645 }
0x32dd   :  { %v6303_v57 = vmul.f32 %v10646_v33, %v6301_v30 }
0x32df   :  { %6305 = vrot.lane.b32.xlu0 %v6303_v57, %s10799_s2 }
0x3333   :  { %v6221_v19 = vpop.permute.xlu1 %6220 }
0x3334   :  { %v6223_v62 = vadd.f32 %v6221_v19, %v11523_v28 }
0x3336   :  { %v8952_v48 = vmul.f32 -1.442695, %v6223_v62 }
0x3351   :  { %v6306_v37 = vpop.permute.xlu0 %6305 }
0x3352   :  { %v6308_v16 = vadd.f32 %v6306_v37, %v11523_v28 }
0x3354   :  { %10647 = vtanh.f32 %v6308_v16 }
0x3355   :  { %10649 = vpow2.f32 %v8952_v48 }
0x335e   :  { %v10648_v44 = vpop.eup %10647 }
0x335f   :  { %6312 = vrot.lane.b32.xlu0 %v10648_v44, %s10797_s27  ;;  %v10650_v54 = vpop.eup %10649 }
0x3360   :  { %v6227_v31 = vadd.f32 1.0, %v10650_v54 }
0x3362   :  { %10651 = vrcp.f32 %v6227_v31 }
0x3363   :  { %10414 = vrot.lane.b32.xlu0 %v10418_v14, %s10798_s28 }
0x336c   :  { %v10652_v32 = vpop.eup %10651 }
0x336d   :  { %v6310_v49 = vsub.f32 1.0, %v10652_v32  ;;  %v6318_v21 = vmul.f32 %v10652_v32, %v6316_v47 }
0x33d1   :  { %v6313_v50 = vpop.permute.xlu0 %6312 }
0x33d2   :  { %v6315_v51 = vmul.f32 %v6313_v50, %v6310_v49 }
0x33d4   :  { %v11691_v52 = vadd.f32 %v6318_v21, %v6315_v51 }
0x33d5   :  { %v10415_v61 = vpop.permute.xlu0 %10414 }
0x33d6   :  { %v6321_v26 = vrot.slane %v11691_v52, 4  ;;  %v10417_v63 = vunpack.i.h.bf16 %v10415_v61  ;;  %v10416_v7 = vunpack.i.l.bf16 %v10415_v61 }
0x33d8   :  { %6322 = vrot.lane.b32.xlu1 %v6321_v26, %s10797_s27 }
0x33dc   :  { %10419 = vrot.lane.b32.xlu1 %v10418_v14, %s10797_s27  ;;  %v11757_v14 = vld [vmem:[%s11982_s16] ss:$0 sm:$0xff] }
0x344a   :  { %v6323_v58 = vpop.permute.xlu1 %6322 }
0x344b   :  { %9840 = vmatmul.mubr.msk.f32.vlgmr.msra.gmra.mrb[76].mxu1 %vm175_vm2, %v6323_v58  ;;  %9847 = vmatmul.mubr.msk.f32.vlgmr.msra.gmra.mrb[68].mxu0 %vm175_vm2, %v6323_v58 }
0x344c   :  { %10285 = vmatpush3.bf16.msra.mxu1 %v11492_v42  ;;  %10289 = vmatpush3.bf16.msra.mxu0 %v10286_v34 }
0x344d   :  { %9864 = vmatprep.mubr.msk.f32.mxu0 %vm93_vm1, %v11490_v55  ;;  %9853 = vmatprep.mubr.msk.f32.mxu1 %vm10795_vm0, %v10796_v1  ;;  %v11717_v55 = vpack.c.bf16 %v10417_v63, %v10416_v7 }
0x344e   :  { %10291 = vmatprep.subr.bf16.mxu0 %v10290_v60  ;;  %10294 = vmatprep.subr.bf16.mxu1 %v10794_v0  ;;  %v10420_v2 = vpop.permute.xlu1 %10419 }
0x344f   :  { %9854 = vmatmul.mubr.msk.f32.vlgmr.msra.gmra.mrb[78].mxu1 %vm175_vm2, %v6323_v58  ;;  %v10422_v6 = vunpack.i.h.bf16 %v10420_v2  ;;  %v10421_v3 = vunpack.i.l.bf16 %v10420_v2 }
0x3450   :  { %10293 = vmatpush3.bf16.msra.mxu0 %v10290_v60  ;;  %10296 = vmatpush3.bf16.msra.mxu1 %v11680_v22 }
0x3451   :  { %v11712_v42 = vpack.c.bf16 %v10422_v6, %v10421_v3  ;;  %9871 = vmatprep.mubr.msk.f32.mxu1 %vm10795_vm0, %v10796_v1  ;;  %10297 = vmatprep.subr.bf16.mxu1 %v10794_v0 }
0x3452   :  { %10300 = vmatprep.subr.bf16.mxu0 %v10794_v0 }
0x3453   :  { %9865 = vmatmul.mubr.msk.f32.vlgmr.msra.gmra.mrb[70].mxu0 %vm93_vm1, %v11498_v41  ;;  %9872 = vmatmul.mubr.f32.vlgmr.msra.gmra.mrb[80].mxu1 %v10796_v1 }
0x3454   :  { %10299 = vmatpush3.bf16.msra.mxu1 %v11712_v42  ;;  %9878 = vmatprep.mubr.msk.f32.mxu1 %vm10795_vm0, %v10796_v1 }
0x3455   :  { %10302 = vmatpush3.bf16.msra.mxu0 %v11717_v55  ;;  %9885 = vmatprep.mubr.msk.f32.mxu0 %vm10795_vm0, %v10796_v1 }
0x3456   :  { %10306 = vmatprep.subr.bf16.mxu0 %v10794_v0  ;;  %10303 = vmatprep.subr.bf16.mxu1 %v10794_v0 }
0x3457   :  { %9879 = vmatmul.mubr.f32.vlgmr.msra.gmra.mrb[82].mxu1 %v10796_v1 }
0x3458   :  { %9886 = vmatmul.mubr.f32.vlgmr.msra.gmra.mrb[72].mxu0 %v10796_v1  ;;  %10305 = vmatpush3.bf16.msra.mxu1 %v11680_v22 }
0x3459   :  { %10308 = vmatpush3.bf16.msra.mxu0 %v11712_v42  ;;  %9892 = vmatprep.mubr.msk.f32.mxu1 %vm10795_vm0, %v10796_v1 }
0x345a   :  { %9899 = vmatprep.mubr.msk.f32.mxu0 %vm10795_vm0, %v10796_v1  ;;  %10309 = vmatprep.subr.bf16.mxu1 %v10794_v0 }
0x345b   :  { %10312 = vmatprep.subr.bf16.mxu0 %v10794_v0 }
0x351e   :  { %v6392_v41 = vpop.f32.mrb[76].mxu1  ;;  %v11741_v5 = vpop.f32.mrb[68].mxu0 }
0x351f   :  { %v6467_v8 = vrot.slane %v6392_v41, 2  ;;  %v9841_v56 = vpop.f32.mrb[77].mxu1  ;;  %v9848_v9 = vpop.f32.mrb[69].mxu0 }
0x3521   :  { %v6469_v17 = vadd.f32 %v6467_v8, %v11523_v28 }
0x3522   :  { %v6554_v11 = vpop.f32.mrb[78].mxu1 }
0x3523   :  { %v8956_v43 = vmul.f32 -1.442695, %v6469_v17  ;;  %v9855_v15 = vpop.f32.mrb[79].mxu1  ;;  %v6555_v38 = vadd.f32 %v11532_v59, %v6554_v11 }
0x3525   :  { %10653 = vpow2.f32 %v8956_v43  ;;  %v6559_v40 = vrot.slane %v6555_v38, 2 }
0x3526   :  { %v9866_v18 = vpop.f32.mrb[70].mxu0  ;;  %v6733_v20 = vpop.f32.mrb[80].mxu1 }
0x3527   :  { %v11747_v46 = vadd.f32 %v9866_v18, %v8959_v36  ;;  %v6658_v24 = vpop.f32.mrb[71].mxu0  ;;  %v6816_v13 = vrot.slane %v6733_v20, 2  ;;  %v9873_v23 = vpop.f32.mrb[81].mxu1 }
0x3528   :  { %v11749_v25 = vadd.f32 %v8959_v36, %v6658_v24 }
0x3529   :  { %v6818_v4 = vadd.f32 %v6816_v13, %v11747_v46 }
0x352a   :  { %v6811_v10 = vpop.f32.mrb[82].mxu1 }
0x352b   :  { %v8962_v27 = vmul.f32 -1.442695, %v6818_v4  ;;  %v6826_v29 = vrot.slane %v6811_v10, 2  ;;  %v6915_v45 = vpop.f32.mrb[72].mxu0  ;;  %v9880_v30 = vpop.f32.mrb[83].mxu1 }
0x352c   :  { %v9887_v33 = vpop.f32.mrb[73].mxu0  ;;  %v6916_v44 = vadd.f32 %v11757_v14, %v6915_v45 }
0x352d   :  { %10655 = vpow2.f32 %v8962_v27  ;;  %6827 = vrot.lane.b32.xlu1 %v6826_v29, %s10800_s23 }
0x352e   :  { %v6920_v19 = vrot.slane %v6916_v44, 2 }
0x352f   :  { %v10654_v57 = vpop.eup %10653 }
0x3530   :  { %v6473_v37 = vadd.f32 1.0, %v10654_v57 }
0x3532   :  { %10657 = vrcp.f32 %v6473_v37 }
0x3537   :  { %v10656_v16 = vpop.eup %10655 }
0x3538   :  { %v6822_v39 = vadd.f32 1.0, %v10656_v16 }
0x353a   :  { %10659 = vrcp.f32 %v6822_v39 }
0x353c   :  { %v10658_v35 = vpop.eup %10657 }
0x353d   :  { %v11759_v34 = vmul.f32 %v10658_v35, %v6559_v40 }
0x3544   :  { %v10660_v62 = vpop.eup %10659 }
0x3545   :  { %v6922_v48 = vmul.f32 %v10660_v62, %v6920_v19 }
0x3547   :  { %6924 = vrot.lane.b32.xlu0 %v6922_v48, %s10799_s2 }
0x359f   :  { %v6828_v32 = vpop.permute.xlu1 %6827 }
0x35a0   :  { %v6830_v47 = vadd.f32 %v6828_v32, %v11747_v46 }
0x35a2   :  { %v8963_v49 = vmul.f32 -1.442695, %v6830_v47 }
0x35b9   :  { %v6925_v54 = vpop.permute.xlu0 %6924 }
0x35ba   :  { %v6927_v59 = vadd.f32 %v6925_v54, %v11747_v46 }
0x35bc   :  { %10661 = vtanh.f32 %v6927_v59 }
0x35bd   :  { %10663 = vpow2.f32 %v8963_v49 }
0x35c6   :  { %v10662_v31 = vpop.eup %10661 }
0x35c7   :  { %6931 = vrot.lane.b32.xlu0 %v10662_v31, %s10797_s27  ;;  %v10664_v50 = vpop.eup %10663 }
0x35c8   :  { %v6834_v51 = vadd.f32 1.0, %v10664_v50 }
0x35ca   :  { %10665 = vrcp.f32 %v6834_v51 }
0x35d4   :  { %v10666_v21 = vpop.eup %10665 }
0x35d5   :  { %v6929_v26 = vsub.f32 1.0, %v10666_v21  ;;  %v6935_v58 = vmul.f32 0.0, %v10666_v21 }
0x3639   :  { %v6932_v53 = vpop.permute.xlu0 %6931 }
0x363a   :  { %v6934_v12 = vmul.f32 %v6932_v53, %v6929_v26 }
0x363c   :  { %v6936_v60 = vadd.f32 %v6935_v58, %v6934_v12 }
0x363e   :  { %v6938_v61 = vrot.slane %v6936_v60, 6  ;;  %v7191_v57 = vrot.slane %v6936_v60, 2 }
0x3640   :  { %6939 = vrot.lane.b32.xlu1 %v6938_v61, %s10797_s27 }
0x36b2   :  { %v6940_v63 = vpop.permute.xlu1 %6939 }
0x36b3   :  { %9893 = vmatmul.mubr.msk.f32.vlgmr.msra.gmra.mrb[84].mxu1 %vm175_vm2, %v6940_v63  ;;  %9900 = vmatmul.mubr.msk.f32.vlgmr.msra.gmra.mrb[74].mxu0 %vm175_vm2, %v6940_v63 }
0x36b4   :  { %10311 = vmatpush3.bf16.msra.mxu1 %v11717_v55  ;;  %9906 = vmatprep.mubr.msk.f32.mxu1 %vm10795_vm0, %v10796_v1 }
0x36b5   :  { %10315 = vmatprep.subr.bf16.mxu1 %v10794_v0  ;;  %10314 = vmatpush3.bf16.msra.mxu0 %v11680_v22 }
0x36b6   :  { %9913 = vmatprep.mubr.msk.f32.mxu0 %vm10795_vm0, %v10796_v1  ;;  %10318 = vmatprep.subr.bf16.mxu0 %v10794_v0 }
0x36b7   :  { %9907 = vmatmul.mubr.msk.f32.vlgmr.msra.gmra.mrb[86].mxu1 %vm175_vm2, %v6940_v63 }
0x36b8   :  { %10317 = vmatpush3.bf16.msra.mxu1 %v11712_v42  ;;  %9920 = vmatprep.mubr.msk.f32.mxu1 %vm10795_vm0, %v10796_v1 }
0x36b9   :  { %10321 = vmatprep.subr.bf16.mxu1 %v10794_v0 }
0x3786   :  { %v7009_v7 = vpop.f32.mrb[84].mxu1  ;;  %v7079_v2 = vpop.f32.mrb[74].mxu0 }
0x3787   :  { %v7084_v6 = vrot.slane %v7009_v7, 4  ;;  %v7094_v3 = vrot.slane %v7079_v2, 4  ;;  %v9894_v41 = vpop.f32.mrb[85].mxu1  ;;  %v9901_v8 = vpop.f32.mrb[75].mxu0 }
0x3789   :  { %v7086_v56 = vadd.f32 %v7084_v6, %v11747_v46  ;;  %7095 = vrot.lane.b32.xlu1 %v7094_v3, %s10800_s23 }
0x378a   :  { %v7171_v9 = vpop.f32.mrb[86].mxu1 }
0x378b   :  { %v8967_v17 = vmul.f32 -1.442695, %v7086_v56  ;;  %v9908_v11 = vpop.f32.mrb[87].mxu1  ;;  %v7172_v36 = vadd.f32 %v11757_v14, %v7171_v9 }
0x378d   :  { %10667 = vpow2.f32 %v8967_v17  ;;  %v7176_v18 = vrot.slane %v7172_v36, 4 }
0x3797   :  { %v10668_v43 = vpop.eup %10667 }
0x3798   :  { %v7090_v15 = vadd.f32 1.0, %v10668_v43 }
0x379a   :  { %10669 = vrcp.f32 %v7090_v15 }
0x37a4   :  { %v10670_v20 = vpop.eup %10669 }
0x37a5   :  { %v7178_v24 = vmul.f32 %v10670_v20, %v7176_v18 }
0x37a7   :  { %7180 = vrot.lane.b32.xlu0 %v7178_v24, %s10799_s2 }
0x37fb   :  { %v7096_v10 = vpop.permute.xlu1 %7095 }
0x37fc   :  { %v7098_v27 = vadd.f32 %v7096_v10, %v11747_v46 }
0x37fe   :  { %v8968_v29 = vmul.f32 -1.442695, %v7098_v27 }
0x3819   :  { %v7181_v13 = vpop.permute.xlu0 %7180 }
0x381a   :  { %v7183_v23 = vadd.f32 %v7181_v13, %v11747_v46 }
0x381c   :  { %10671 = vtanh.f32 %v7183_v23 }
0x381d   :  { %10673 = vpow2.f32 %v8968_v29 }
0x3826   :  { %v10672_v4 = vpop.eup %10671 }
0x3827   :  { %7187 = vrot.lane.b32.xlu0 %v10672_v4, %s10797_s27  ;;  %v10674_v45 = vpop.eup %10673 }
0x3828   :  { %v7102_v30 = vadd.f32 1.0, %v10674_v45 }
0x382a   :  { %10675 = vrcp.f32 %v7102_v30 }
0x3834   :  { %v10676_v33 = vpop.eup %10675 }
0x3835   :  { %v7185_v37 = vsub.f32 1.0, %v10676_v33  ;;  %v7193_v38 = vmul.f32 %v10676_v33, %v7191_v57 }
0x3899   :  { %v7188_v16 = vpop.permute.xlu0 %7187 }
0x389a   :  { %v7190_v39 = vmul.f32 %v7188_v16, %v7185_v37 }
0x389c   :  { %v7194_v40 = vadd.f32 %v7193_v38, %v7190_v39 }
0x389e   :  { %v7196_v35 = vrot.slane %v7194_v40, 4  ;;  %v7449_v56 = vrot.slane %v7194_v40, 2 }
0x38a0   :  { %7197 = vrot.lane.b32.xlu1 %v7196_v35, %s10797_s27 }
0x3912   :  { %v7198_v44 = vpop.permute.xlu1 %7197 }
0x3913   :  { %9914 = vmatmul.mubr.msk.f32.vlgmr.msra.gmra.mrb[76].mxu0 %vm175_vm2, %v7198_v44  ;;  %9921 = vmatmul.mubr.msk.f32.vlgmr.msra.gmra.mrb[88].mxu1 %vm175_vm2, %v7198_v44 }
0x3914   :  { %10320 = vmatpush3.bf16.msra.mxu0 %v11717_v55  ;;  %9927 = vmatprep.mubr.msk.f32.mxu0 %vm10795_vm0, %v10796_v1 }
0x3915   :  { %10324 = vmatprep.subr.bf16.mxu0 %v10794_v0  ;;  %10323 = vmatpush3.bf16.msra.mxu1 %v11680_v22 }
0x3916   :  { %9934 = vmatprep.mubr.msk.f32.mxu1 %vm10795_vm0, %v10796_v1  ;;  %10327 = vmatprep.subr.bf16.mxu1 %v10794_v0 }
0x3917   :  { %9928 = vmatmul.mubr.msk.f32.vlgmr.msra.gmra.mrb[78].mxu0 %vm175_vm2, %v7198_v44 }
0x3918   :  { %10326 = vmatpush3.bf16.msra.mxu0 %v11712_v42  ;;  %9941 = vmatprep.mubr.msk.f32.mxu0 %vm10795_vm0, %v10796_v1 }
0x3919   :  { %10330 = vmatprep.subr.bf16.mxu0 %v10794_v0 }
0x39e6   :  { %v7267_v19 = vpop.f32.mrb[76].mxu0  ;;  %v7337_v62 = vpop.f32.mrb[88].mxu1 }
0x39e7   :  { %v7342_v48 = vrot.slane %v7267_v19, 6  ;;  %v7352_v54 = vrot.slane %v7337_v62, 6  ;;  %v9915_v59 = vpop.f32.mrb[77].mxu0  ;;  %v9922_v31 = vpop.f32.mrb[89].mxu1 }
0x39e9   :  { %v7344_v32 = vadd.f32 %v7342_v48, %v11747_v46  ;;  %7353 = vrot.lane.b32.xlu1 %v7352_v54, %s10800_s23 }
0x39ea   :  { %v7429_v47 = vpop.f32.mrb[78].mxu0 }
0x39eb   :  { %v8972_v49 = vmul.f32 -1.442695, %v7344_v32  ;;  %v9929_v50 = vpop.f32.mrb[79].mxu0  ;;  %v7430_v26 = vadd.f32 %v11757_v14, %v7429_v47 }
0x39ed   :  { %10677 = vpow2.f32 %v8972_v49  ;;  %v7434_v53 = vrot.slane %v7430_v26, 6 }
0x39f7   :  { %v10678_v51 = vpop.eup %10677 }
0x39f8   :  { %v7348_v21 = vadd.f32 1.0, %v10678_v51 }
0x39fa   :  { %10679 = vrcp.f32 %v7348_v21 }
0x3a04   :  { %v10680_v12 = vpop.eup %10679 }
0x3a05   :  { %v7436_v58 = vmul.f32 %v10680_v12, %v7434_v53 }
0x3a07   :  { %7438 = vrot.lane.b32.xlu0 %v7436_v58, %s10799_s2 }
0x3a5b   :  { %v7354_v7 = vpop.permute.xlu1 %7353 }
0x3a5c   :  { %v7356_v2 = vadd.f32 %v7354_v7, %v11747_v46 }
0x3a5e   :  { %v8973_v6 = vmul.f32 -1.442695, %v7356_v2 }
0x3a79   :  { %v7439_v60 = vpop.permute.xlu0 %7438 }
0x3a7a   :  { %v7441_v61 = vadd.f32 %v7439_v60, %v11747_v46 }
0x3a7c   :  { %10681 = vtanh.f32 %v7441_v61 }
0x3a7d   :  { %10683 = vpow2.f32 %v8973_v6 }
0x3a86   :  { %v10682_v63 = vpop.eup %10681 }
0x3a87   :  { %7445 = vrot.lane.b32.xlu0 %v10682_v63, %s10797_s27  ;;  %v10684_v3 = vpop.eup %10683 }
0x3a88   :  { %v7360_v41 = vadd.f32 1.0, %v10684_v3 }
0x3a8a   :  { %10685 = vrcp.f32 %v7360_v41 }
0x3a94   :  { %v10686_v8 = vpop.eup %10685 }
0x3a95   :  { %v7443_v9 = vsub.f32 1.0, %v10686_v8  ;;  %v7451_v43 = vmul.f32 %v10686_v8, %v7449_v56 }
0x3af9   :  { %v7446_v17 = vpop.permute.xlu0 %7445 }
0x3afa   :  { %v7448_v11 = vmul.f32 %v7446_v17, %v7443_v9 }
0x3afc   :  { %v7452_v15 = vadd.f32 %v7451_v43, %v7448_v11 }
0x3afe   :  { %v7454_v36 = vrot.slane %v7452_v15, 2 }
0x3b00   :  { %7455 = vrot.lane.b32.xlu1 %v7454_v36, %s10797_s27 }
0x3b72   :  { %v7456_v18 = vpop.permute.xlu1 %7455 }
0x3b73   :  { %9935 = vmatmul.mubr.msk.f32.vlgmr.msra.gmra.mrb[90].mxu1 %vm175_vm2, %v7456_v18  ;;  %9942 = vmatmul.mubr.msk.f32.vlgmr.msra.gmra.mrb[80].mxu0 %vm175_vm2, %v7456_v18 }
0x3b74   :  { %10329 = vmatpush3.bf16.msra.mxu1 %v11717_v55  ;;  %9948 = vmatprep.mubr.msk.f32.mxu1 %vm10795_vm0, %v10796_v1 }
0x3b75   :  { %10333 = vmatprep.subr.bf16.mxu1 %v10794_v0  ;;  %10332 = vmatpush3.bf16.msra.mxu0 %v11680_v22 }
0x3b76   :  { %9955 = vmatprep.mubr.msk.f32.mxu0 %vm10795_vm0, %v10796_v1  ;;  %10336 = vmatprep.subr.bf16.mxu0 %v10794_v0 }
0x3b77   :  { %9949 = vmatmul.mubr.msk.f32.vlgmr.msra.gmra.mrb[92].mxu1 %vm175_vm2, %v7456_v18 }
0x3b78   :  { %10335 = vmatpush3.bf16.msra.mxu1 %v11712_v42  ;;  %9962 = vmatprep.mubr.msk.f32.mxu1 %vm10795_vm0, %v10796_v1 }
0x3b79   :  { %10339 = vmatprep.subr.bf16.mxu1 %v10794_v0 }
0x3c46   :  { %v7525_v20 = vpop.f32.mrb[90].mxu1  ;;  %v7595_v24 = vpop.f32.mrb[80].mxu0 }
0x3c47   :  { %v7599_v13 = vadd.f32 %v7525_v20, %v11747_v46  ;;  %7607 = vrot.lane.b32.xlu1 %v7595_v24, %s10800_s23  ;;  %v9936_v23 = vpop.f32.mrb[91].mxu1  ;;  %v9943_v4 = vpop.f32.mrb[81].mxu0 }
0x3c49   :  { %v8977_v10 = vmul.f32 -1.442695, %v7599_v13 }
0x3c4a   :  { %v7683_v27 = vpop.f32.mrb[92].mxu1 }
0x3c4b   :  { %10687 = vpow2.f32 %v8977_v10  ;;  %v9950_v29 = vpop.f32.mrb[93].mxu1  ;;  %v7684_v33 = vadd.f32 %v11757_v14, %v7683_v27 }
0x3c55   :  { %v10688_v45 = vpop.eup %10687 }
0x3c56   :  { %v7603_v30 = vadd.f32 1.0, %v10688_v45 }
0x3c58   :  { %10689 = vrcp.f32 %v7603_v30 }
0x3c62   :  { %v10690_v57 = vpop.eup %10689 }
0x3c63   :  { %v7687_v37 = vmul.f32 %v10690_v57, %v7684_v33 }
0x3c65   :  { %7689 = vrot.lane.b32.xlu0 %v7687_v37, %s10799_s2 }
0x3cb9   :  { %v7608_v40 = vpop.permute.xlu1 %7607 }
0x3cba   :  { %v7610_v35 = vadd.f32 %v7608_v40, %v11747_v46 }
0x3cbc   :  { %v8978_v44 = vmul.f32 -1.442695, %v7610_v35 }
0x3cd7   :  { %v7690_v16 = vpop.permute.xlu0 %7689 }
0x3cd8   :  { %v7692_v38 = vadd.f32 %v7690_v16, %v11747_v46 }
0x3cda   :  { %10691 = vtanh.f32 %v7692_v38 }
0x3cdb   :  { %10693 = vpow2.f32 %v8978_v44 }
0x3ce4   :  { %v10692_v39 = vpop.eup %10691 }
0x3ce5   :  { %7696 = vrot.lane.b32.xlu0 %v10692_v39, %s10797_s27  ;;  %v10694_v19 = vpop.eup %10693 }
0x3ce6   :  { %v7614_v62 = vadd.f32 1.0, %v10694_v19 }
0x3ce8   :  { %10695 = vrcp.f32 %v7614_v62 }
0x3cf2   :  { %v10696_v48 = vpop.eup %10695 }
0x3cf3   :  { %v7694_v54 = vsub.f32 1.0, %v10696_v48  ;;  %v7701_v31 = vmul.f32 %v10696_v48, %v7454_v36 }
0x3d57   :  { %v7697_v59 = vpop.permute.xlu0 %7696 }
0x3d58   :  { %v7699_v32 = vmul.f32 %v7697_v59, %v7694_v54 }
0x3d5a   :  { %v7702_v47 = vadd.f32 %v7701_v31, %v7699_v32 }
0x3d5c   :  { %7704 = vrot.lane.b32.xlu1 %v7702_v47, %s10797_s27  ;;  %v7956_v20 = vrot.slane %v7702_v47, 2 }
0x3dce   :  { %v7705_v49 = vpop.permute.xlu1 %7704 }
0x3dcf   :  { %9956 = vmatmul.mubr.msk.f32.vlgmr.msra.gmra.mrb[82].mxu0 %vm175_vm2, %v7705_v49  ;;  %9963 = vmatmul.mubr.msk.f32.vlgmr.msra.gmra.mrb[94].mxu1 %vm175_vm2, %v7705_v49 }
0x3dd0   :  { %10338 = vmatpush3.bf16.msra.mxu0 %v11717_v55  ;;  %9969 = vmatprep.mubr.msk.f32.mxu0 %vm10795_vm0, %v10796_v1 }
0x3dd1   :  { %10342 = vmatprep.subr.bf16.mxu0 %v10794_v0  ;;  %10341 = vmatpush3.bf16.msra.mxu1 %v11680_v22 }
0x3dd2   :  { %9976 = vmatprep.mubr.msk.f32.mxu1 %vm10795_vm0, %v10796_v1  ;;  %10345 = vmatprep.subr.bf16.mxu1 %v10794_v0 }
0x3dd3   :  { %9970 = vmatmul.mubr.msk.f32.vlgmr.msra.gmra.mrb[84].mxu0 %vm175_vm2, %v7705_v49 }
0x3dd4   :  { %10344 = vmatpush3.bf16.msra.mxu0 %v11712_v42  ;;  %9983 = vmatprep.mubr.msk.f32.mxu0 %vm10795_vm0, %v10796_v1 }
0x3dd5   :  { %10348 = vmatprep.subr.bf16.mxu0 %v10794_v0 }
0x3ea2   :  { %v7774_v46 = vpop.f32.mrb[82].mxu0  ;;  %v7844_v50 = vpop.f32.mrb[94].mxu1 }
0x3ea3   :  { %v7849_v51 = vrot.slane %v7774_v46, 2  ;;  %v7859_v21 = vrot.slane %v7844_v50, 2  ;;  %v9957_v26 = vpop.f32.mrb[83].mxu0  ;;  %v9964_v53 = vpop.f32.mrb[95].mxu1 }
0x3ea5   :  { %v7851_v12 = vadd.f32 %v7849_v51, %v11749_v25  ;;  %7860 = vrot.lane.b32.xlu1 %v7859_v21, %s10800_s23 }
0x3ea6   :  { %v7936_v58 = vpop.f32.mrb[84].mxu0 }
0x3ea7   :  { %v8982_v60 = vmul.f32 -1.442695, %v7851_v12  ;;  %v9971_v61 = vpop.f32.mrb[85].mxu0  ;;  %v7937_v2 = vadd.f32 %v11757_v14, %v7936_v58 }
0x3ea9   :  { %10697 = vpow2.f32 %v8982_v60  ;;  %v7941_v6 = vrot.slane %v7937_v2, 2 }
0x3eb3   :  { %v10698_v63 = vpop.eup %10697 }
0x3eb4   :  { %v7855_v7 = vadd.f32 1.0, %v10698_v63 }
0x3eb6   :  { %10699 = vrcp.f32 %v7855_v7 }
0x3ec0   :  { %v10700_v3 = vpop.eup %10699 }
0x3ec1   :  { %v7943_v41 = vmul.f32 %v10700_v3, %v7941_v6 }
0x3ec3   :  { %7945 = vrot.lane.b32.xlu0 %v7943_v41, %s10799_s2 }
0x3f17   :  { %v7861_v17 = vpop.permute.xlu1 %7860 }
0x3f18   :  { %v7863_v11 = vadd.f32 %v7861_v17, %v11749_v25 }
0x3f1a   :  { %v8983_v43 = vmul.f32 -1.442695, %v7863_v11 }
0x3f35   :  { %v7946_v8 = vpop.permute.xlu0 %7945 }
0x3f36   :  { %v7948_v56 = vadd.f32 %v7946_v8, %v11749_v25 }
0x3f38   :  { %10701 = vtanh.f32 %v7948_v56 }
0x3f39   :  { %10703 = vpow2.f32 %v8983_v43 }
0x3f42   :  { %v10702_v9 = vpop.eup %10701 }
0x3f43   :  { %7952 = vrot.lane.b32.xlu0 %v10702_v9, %s10797_s27  ;;  %v10704_v15 = vpop.eup %10703 }
0x3f44   :  { %v7867_v36 = vadd.f32 1.0, %v10704_v15 }
0x3f46   :  { %10705 = vrcp.f32 %v7867_v36 }
0x3f50   :  { %v10706_v18 = vpop.eup %10705 }
0x3f51   :  { %v7950_v24 = vsub.f32 1.0, %v10706_v18  ;;  %v7958_v4 = vmul.f32 %v10706_v18, %v7956_v20 }
0x3fb5   :  { %v7953_v13 = vpop.permute.xlu0 %7952 }
0x3fb6   :  { %v7955_v23 = vmul.f32 %v7953_v13, %v7950_v24 }
0x3fb8   :  { %v7959_v10 = vadd.f32 %v7958_v4, %v7955_v23 }
0x3fba   :  { %v7961_v27 = vrot.slane %v7959_v10, 6  ;;  %v8214_v53 = vrot.slane %v7959_v10, 2 }
0x3fbc   :  { %7962 = vrot.lane.b32.xlu1 %v7961_v27, %s10797_s27 }
0x402e   :  { %v7963_v29 = vpop.permute.xlu1 %7962 }
0x402f   :  { %9977 = vmatmul.mubr.msk.f32.vlgmr.msra.gmra.mrb[96].mxu1 %vm175_vm2, %v7963_v29  ;;  %9984 = vmatmul.mubr.msk.f32.vlgmr.msra.gmra.mrb[86].mxu0 %vm175_vm2, %v7963_v29 }
0x4030   :  { %10347 = vmatpush3.bf16.msra.mxu1 %v11717_v55  ;;  %9990 = vmatprep.mubr.msk.f32.mxu1 %vm10795_vm0, %v10796_v1 }
0x4031   :  { %10351 = vmatprep.subr.bf16.mxu1 %v10794_v0  ;;  %10350 = vmatpush3.bf16.msra.mxu0 %v11680_v22 }
0x4032   :  { %9997 = vmatprep.mubr.msk.f32.mxu0 %vm10795_vm0, %v10796_v1  ;;  %10354 = vmatprep.subr.bf16.mxu0 %v10794_v0 }
0x4033   :  { %9991 = vmatmul.mubr.msk.f32.vlgmr.msra.gmra.mrb[98].mxu1 %vm175_vm2, %v7963_v29 }
0x4034   :  { %10353 = vmatpush3.bf16.msra.mxu1 %v11712_v42  ;;  %10004 = vmatprep.mubr.msk.f32.mxu1 %vm10795_vm0, %v10796_v1 }
0x4035   :  { %10357 = vmatprep.subr.bf16.mxu1 %v10794_v0 }
0x4102   :  { %v8032_v45 = vpop.f32.mrb[96].mxu1  ;;  %v8102_v30 = vpop.f32.mrb[86].mxu0 }
0x4103   :  { %v8107_v33 = vrot.slane %v8032_v45, 4  ;;  %v8117_v57 = vrot.slane %v8102_v30, 4  ;;  %v9978_v37 = vpop.f32.mrb[97].mxu1  ;;  %v9985_v16 = vpop.f32.mrb[87].mxu0 }
0x4105   :  { %v8109_v38 = vadd.f32 %v8107_v33, %v11749_v25  ;;  %8118 = vrot.lane.b32.xlu1 %v8117_v57, %s10800_s23 }
0x4106   :  { %v8194_v39 = vpop.f32.mrb[98].mxu1 }
0x4107   :  { %v8987_v40 = vmul.f32 -1.442695, %v8109_v38  ;;  %v9992_v35 = vpop.f32.mrb[99].mxu1  ;;  %v8195_v62 = vadd.f32 %v11757_v14, %v8194_v39 }
0x4109   :  { %10707 = vpow2.f32 %v8987_v40  ;;  %v8199_v48 = vrot.slane %v8195_v62, 4 }
0x4113   :  { %v10708_v44 = vpop.eup %10707 }
0x4114   :  { %v8113_v19 = vadd.f32 1.0, %v10708_v44 }
0x4116   :  { %10709 = vrcp.f32 %v8113_v19  ;;  %v6477_v19 = vrot.slane %v11741_v5, 2 }
0x4120   :  { %v10710_v54 = vpop.eup %10709 }
0x4121   :  { %v8201_v59 = vmul.f32 %v10710_v54, %v8199_v48 }
0x4123   :  { %8203 = vrot.lane.b32.xlu0 %v8201_v59, %s10799_s2 }
0x4177   :  { %v8119_v49 = vpop.permute.xlu1 %8118 }
0x4178   :  { %v8121_v46 = vadd.f32 %v8119_v49, %v11749_v25 }
0x417a   :  { %v8988_v50 = vmul.f32 -1.442695, %v8121_v46 }
0x4195   :  { %v8204_v31 = vpop.permute.xlu0 %8203 }
0x4196   :  { %v8206_v32 = vadd.f32 %v8204_v31, %v11749_v25 }
0x4198   :  { %10711 = vtanh.f32 %v8206_v32 }
0x4199   :  { %10713 = vpow2.f32 %v8988_v50 }
0x41a2   :  { %v10712_v47 = vpop.eup %10711 }
0x41a3   :  { %8210 = vrot.lane.b32.xlu0 %v10712_v47, %s10797_s27  ;;  %v10714_v51 = vpop.eup %10713 }
0x41a4   :  { %v8125_v21 = vadd.f32 1.0, %v10714_v51 }
0x41a6   :  { %10715 = vrcp.f32 %v8125_v21 }
0x41b0   :  { %v10716_v26 = vpop.eup %10715 }
0x41b1   :  { %v8208_v12 = vsub.f32 1.0, %v10716_v26  ;;  %v8216_v60 = vmul.f32 %v10716_v26, %v8214_v53 }
0x4215   :  { %v8211_v58 = vpop.permute.xlu0 %8210 }
0x4216   :  { %v8213_v61 = vmul.f32 %v8211_v58, %v8208_v12 }
0x4218   :  { %v8217_v63 = vadd.f32 %v8216_v60, %v8213_v61 }
0x421a   :  { %v8219_v7 = vrot.slane %v8217_v63, 4  ;;  %v8472_v57 = vrot.slane %v8217_v63, 2 }
0x421c   :  { %8220 = vrot.lane.b32.xlu1 %v8219_v7, %s10797_s27  ;;  %v6574_v7 = vrot.slane %v11691_v52, 6  ;;  %v8736_v52 = vld [vmem:[%s11983_s17 + $0x10] sm:$0xff] }
0x428e   :  { %v8221_v2 = vpop.permute.xlu1 %8220 }
0x428f   :  { %9998 = vmatmul.mubr.msk.f32.vlgmr.msra.gmra.mrb[88].mxu0 %vm175_vm2, %v8221_v2  ;;  %10005 = vmatmul.mubr.msk.f32.vlgmr.msra.gmra.mrb[100].mxu1 %vm175_vm2, %v8221_v2 }
0x4290   :  { %10356 = vmatpush3.bf16.msra.mxu0 %v11717_v55  ;;  %10011 = vmatprep.mubr.msk.f32.mxu0 %vm10795_vm0, %v10796_v1 }
0x4291   :  { %10360 = vmatprep.subr.bf16.mxu0 %v10794_v0  ;;  %10359 = vmatpush3.bf16.msra.mxu1 %v11680_v22 }
0x4292   :  { %10018 = vmatprep.mubr.msk.f32.mxu1 %vm10795_vm0, %v10796_v1  ;;  %10363 = vmatprep.subr.bf16.mxu1 %v10794_v0 }
0x4293   :  { %10012 = vmatmul.mubr.msk.f32.vlgmr.msra.gmra.mrb[90].mxu0 %vm175_vm2, %v8221_v2 }
0x4294   :  { %10362 = vmatpush3.bf16.msra.mxu0 %v11712_v42  ;;  %10025 = vmatprep.mubr.msk.f32.mxu0 %vm10795_vm0, %v10796_v1 }
0x4295   :  { %10366 = vmatprep.subr.bf16.mxu0 %v10794_v0 }
0x4362   :  { %v8290_v6 = vpop.f32.mrb[88].mxu0  ;;  %v8360_v3 = vpop.f32.mrb[100].mxu1 }
0x4363   :  { %v8365_v41 = vrot.slane %v8290_v6, 6  ;;  %v8375_v8 = vrot.slane %v8360_v3, 6  ;;  %v9999_v56 = vpop.f32.mrb[89].mxu0  ;;  %v10006_v22 = vpop.f32.mrb[101].mxu1 }
0x4364   :  { %v8735_v56 = vld [vmem:[%s11983_s17 + $0x8] sm:$0xff] }
0x4365   :  { %v8367_v9 = vadd.f32 %v8365_v41, %v11749_v25  ;;  %8376 = vrot.lane.b32.xlu1 %v8375_v8, %s10800_s23 }
0x4366   :  { %v8452_v17 = vpop.f32.mrb[90].mxu0 }
0x4367   :  { %v8992_v11 = vmul.f32 -1.442695, %v8367_v9  ;;  %v10013_v43 = vpop.f32.mrb[91].mxu0  ;;  %v8453_v36 = vadd.f32 %v11757_v14, %v8452_v17  ;;  %v8737_v9 = vld [vmem:[%s11983_s17 + $0x18] sm:$0xff] }
0x4368   :  { %v10370_v17 = vpack.c.bf16 %v8737_v9, %v8736_v52 }
0x4369   :  { %10717 = vpow2.f32 %v8992_v11  ;;  %v8457_v18 = vrot.slane %v8453_v36, 6 }
0x4373   :  { %v10718_v42 = vpop.eup %10717 }
0x4374   :  { %v8371_v15 = vadd.f32 1.0, %v10718_v42 }
0x4376   :  { %10719 = vrcp.f32 %v8371_v15 }
0x4380   :  { %v10720_v20 = vpop.eup %10719 }
0x4381   :  { %v8459_v24 = vmul.f32 %v10720_v20, %v8457_v18 }
0x4383   :  { %8461 = vrot.lane.b32.xlu0 %v8459_v24, %s10799_s2 }
0x43d7   :  { %v8377_v10 = vpop.permute.xlu1 %8376 }
0x43d8   :  { %v8379_v27 = vadd.f32 %v8377_v10, %v11749_v25 }
0x43da   :  { %v8993_v29 = vmul.f32 -1.442695, %v8379_v27 }
0x43f5   :  { %v8462_v13 = vpop.permute.xlu0 %8461 }
0x43f6   :  { %v8464_v23 = vadd.f32 %v8462_v13, %v11749_v25 }
0x43f8   :  { %10721 = vtanh.f32 %v8464_v23 }
0x43f9   :  { %10723 = vpow2.f32 %v8993_v29 }
0x4402   :  { %v10722_v4 = vpop.eup %10721 }
0x4403   :  { %8468 = vrot.lane.b32.xlu0 %v10722_v4, %s10797_s27  ;;  %v10724_v45 = vpop.eup %10723 }
0x4404   :  { %v8383_v30 = vadd.f32 1.0, %v10724_v45 }
0x4406   :  { %10725 = vrcp.f32 %v8383_v30 }
0x4407   :  { %6563 = vrot.lane.b32.xlu0 %v11759_v34, %s10799_s2 }
0x4410   :  { %v10726_v33 = vpop.eup %10725 }
0x4411   :  { %v8466_v37 = vsub.f32 1.0, %v10726_v33  ;;  %v8474_v39 = vmul.f32 %v10726_v33, %v8472_v57 }
0x4475   :  { %v8469_v16 = vpop.permute.xlu0 %8468 }
0x4476   :  { %v8471_v38 = vmul.f32 %v8469_v16, %v8466_v37 }
0x4478   :  { %v11906_v40 = vadd.f32 %v8474_v39, %v8471_v38 }
0x4479   :  { %v6564_v35 = vpop.permute.xlu0 %6563 }
0x447a   :  { %v8477_v44 = vrot.slane %v11906_v40, 2  ;;  %v6566_v34 = vadd.f32 %v6564_v35, %v11523_v28 }
0x447c   :  { %10727 = vtanh.f32 %v6566_v34  ;;  %8478 = vrot.lane.b32.xlu1 %v8477_v44, %s10797_s27 }
0x4480   :  { %6478 = vrot.lane.b32.xlu1 %v6477_v19, %s10800_s23 }
0x4486   :  { %v10728_v62 = vpop.eup %10727 }
0x4487   :  { %6570 = vrot.lane.b32.xlu1 %v10728_v62, %s10797_s27 }
0x44ee   :  { %v8479_v48 = vpop.permute.xlu1 %8478 }
0x44ef   :  { %10019 = vmatmul.mubr.msk.f32.vlgmr.msra.gmra.mrb[102].mxu1 %vm175_vm2, %v8479_v48  ;;  %10026 = vmatmul.mubr.msk.f32.vlgmr.msra.gmra.mrb[92].mxu0 %vm175_vm2, %v8479_v48 }
0x44f0   :  { %10365 = vmatpush3.bf16.msra.mxu1 %v11717_v55  ;;  %10032 = vmatprep.mubr.msk.f32.mxu1 %vm10795_vm0, %v10796_v1 }
0x44f1   :  { %10043 = vmatprep.mubr.msk.f32.mxu0 %vm10795_vm0, %v10796_v1 }
0x44f2   :  { %v6479_v5 = vpop.permute.xlu1 %6478 }
0x44f3   :  { %10033 = vmatmul.mubr.msk.f32.vlgmr.msra.gmra.mrb[104].mxu1 %vm175_vm2, %v8479_v48  ;;  %v6481_v54 = vadd.f32 %v6479_v5, %v11523_v28 }
0x44f5   :  { %v8957_v59 = vmul.f32 -1.442695, %v6481_v54 }
0x44f7   :  { %10729 = vpow2.f32 %v8957_v59 }
0x44f9   :  { %v6571_v63 = vpop.permute.xlu1 %6570 }
0x4501   :  { %v10730_v21 = vpop.eup %10729 }
0x4502   :  { %v6485_v26 = vadd.f32 1.0, %v10730_v21 }
0x45c2   :  { %v8548_v31 = vpop.f32.mrb[102].mxu1  ;;  %v8618_v32 = vpop.f32.mrb[92].mxu0 }
0x45c3   :  { %v8622_v47 = vadd.f32 %v8548_v31, %v11749_v25  ;;  %v10020_v49 = vpop.f32.mrb[103].mxu1  ;;  %v10027_v46 = vpop.f32.mrb[93].mxu0 }
0x45c5   :  { %v8997_v55 = vmul.f32 -1.442695, %v8622_v47 }
0x45c6   :  { %v8706_v50 = vpop.f32.mrb[104].mxu1 }
0x45c7   :  { %10731 = vpow2.f32 %v8997_v55  ;;  %v10034_v51 = vpop.f32.mrb[105].mxu1  ;;  %v8707_v28 = vadd.f32 %v11757_v14, %v8706_v50  ;;  %v8734_v14 = vld [vmem:[%s11983_s17] sm:$0xff] }
0x45c8   :  { %10733 = vrcp.f32 %v6485_v26  ;;  %v10367_v22 = vpack.c.bf16 %v8735_v56, %v8734_v14 }
0x45ca   :  { %10368 = vmatpush3.bf16.msra.mxu0 %v10367_v22 }
0x45cb   :  { %10369 = vmatprep.subr.bf16.mxu0 %v10794_v0 }
0x45ce   :  { %10371 = vmatpush3.bf16.msra.mxu0 %v10370_v17 }
0x45d1   :  { %v10732_v1 = vpop.eup %10731 }
0x45d2   :  { %v8626_v53 = vadd.f32 1.0, %v10732_v1  ;;  %v10734_v12 = vpop.eup %10733 }
0x45d3   :  { %v6568_v60 = vsub.f32 1.0, %v10734_v12  ;;  %v6576_v6 = vmul.f32 %v10734_v12, %v6574_v7 }
0x45d4   :  { %10735 = vrcp.f32 %v8626_v53 }
0x45d5   :  { %v6573_v2 = vmul.f32 %v6571_v63, %v6568_v60 }
0x45d7   :  { %v6577_v3 = vadd.f32 %v6576_v6, %v6573_v2 }
0x45de   :  { %v10736_v58 = vpop.eup %10735 }
0x45df   :  { %v8710_v61 = vmul.f32 %v10736_v58, %v8707_v28 }
0x45e1   :  { %8712 = vrot.lane.b32.xlu0 %v8710_v61, %s10799_s2 }
0x45e5   :  { %8630 = vrot.lane.b32.xlu0 %v8618_v32, %s10800_s23 }
0x45e9   :  { %8727 = vrot.lane.b32.xlu0 %v6577_v3, %s10797_s27 }
0x4653   :  { %v8713_v41 = vpop.permute.xlu0 %8712 }
0x4654   :  { %v8715_v8 = vadd.f32 %v8713_v41, %v11749_v25 }
0x4656   :  { %10737 = vtanh.f32 %v8715_v8 }
0x4657   :  { %v8631_v43 = vpop.permute.xlu0 %8630 }
0x4658   :  { %v8633_v42 = vadd.f32 %v8631_v43, %v11749_v25  ;;  %v9000_v25 = vld [vmem:[%s11984_s18] ss:$0 sm:$0xff] }
0x465a   :  { %v8998_v15 = vmul.f32 -1.442695, %v8633_v42 }
0x465b   :  { %v8728_v27 = vpop.permute.xlu0 %8727 }
0x465c   :  { %10739 = vpow2.f32 %v8998_v15 }
0x4660   :  { %v10738_v11 = vpop.eup %10737 }
0x4661   :  { %8719 = vrot.lane.b32.xlu1 %v10738_v11, %s10797_s27 }
0x4666   :  { %v10740_v36 = vpop.eup %10739 }
0x4667   :  { %v8637_v0 = vadd.f32 1.0, %v10740_v36 }
0x4669   :  { %10741 = vrcp.f32 %v8637_v0 }
0x4673   :  { %v10742_v18 = vpop.eup %10741 }
0x4674   :  { %v8717_v20 = vsub.f32 1.0, %v10742_v18  ;;  %v8724_v23 = vmul.f32 %v10742_v18, %v8477_v44 }
0x46d3   :  { %v8720_v24 = vpop.permute.xlu1 %8719 }
0x46d4   :  { %v8722_v13 = vmul.f32 %v8720_v24, %v8717_v20 }
0x46d6   :  { %v8725_v4 = vadd.f32 %v8724_v23, %v8722_v13 }
0x46d8   :  { %v8731_v10 = vrot.slane %v8725_v4, 2 }
0x46da   :  { %v8733_v29 = vsel %vm175_vm2, %v8728_v27, %v8731_v10 }
0x46db   :  { %v8746_v45 = vrot.slane %v8733_v29, 6 }
0x46dd   :  { %10044 = vmatmul.mubr.msk.f32.vlgmr.msra.gmra.mrb[94].mxu0 %vm93_vm1, %v8746_v45 }
0x47b0   :  { %v8815_v30 = vpop.f32.mrb[94].mxu0 }
0x47b1   :  { %v8816_v33 = vadd.f32 %v9000_v25, %v8815_v30  ;;  %v10045_v57 = vpop.f32.mrb[95].mxu0 }
0x47b3   :  { %8820 = vst.msk [vmem:[#allocation5] sm:$0x3] %vm8819_vm6, %v8816_v33 }
0x47b4   :  { %10776 = shalt.err (!%p10773_p12)
}
0x47b5   :  { %s10777_s7 = scalar_lea.hbm %s11985_s19, 32 }
0x47b6   :  { %p10778_p13 = scmp.ne.s32.totalorder %s11985_s19, %s10777_s7  ;;  %p10781_p0 = scmp.lt.u32.totalorder %s10777_s7, %s11985_s19 }
0x47b8   :  { %p10783_p1 = pnand %p10781_p0, %p10778_p13 }
0x47ba   :  { %10786 = shalt.err (!%p10783_p1)
}
0x47bb   :  { %8830 = dma.vmem_to_hbm [thread:$0]  %s8828_s11, 32, %s11985_s19, [#allocation4]  }
0x47bc   :  { %10789 = dma.done.wait [#allocation4], 32  }
0x47bd   :  { %10790 = vsyncadd [#allocation4], 4294967264 }
0x47be   :  { %8834 = vsyncpa [#allocation3], 1 }
0x47bf   :  { %8835 = vsyncpa [#allocation4], 1 }

</bundles_post_ra>
